<compile_context>
chip_gen: v7x
topology: tpu7x:2x2x1
jax: 0.10.0
libtpu: 0.0.40
codegen_flags: <defaults>
</compile_context>

<pallas_src>
import functools
import math

import jax
import jax.numpy as jnp
import numpy as np
from jax import lax
from jax.experimental import pallas as pl
from jax.experimental.pallas import tpu as pltpu


def fgfm_kernel(low_ref, high_ref, up_ref, bg_ref, qlc_ref, qhc_ref, mask_ref,
                wd_ref, wf_ref, wm1_ref, wm2_ref, out_ref, *,
                H, W, Hl, Wl, C, block_n):
    P = H * W
    f32 = jnp.float32
    bf16 = jnp.bfloat16
    pad = W + 1                         # max |flat shift| of a 3x3 tap

    # ---- data-independent constants (resident in VMEM, hoisted per review) ----
    bgx = bg_ref[0:1, :]                # (1, P)  base grid x in [-1, 1]
    bgy = bg_ref[1:2, :]                # (1, P)  base grid y in [-1, 1]
    qlx = qlc_ref[:, 0:1]               # (Ql, 1) low-res source pixel x
    qly = qlc_ref[:, 1:2]               # (Ql, 1) low-res source pixel y
    qhx = qhc_ref[:, 0:1]               # (P, 1)  high-res source pixel x
    qhy = qhc_ref[:, 1:2]               # (P, 1)  high-res source pixel y
    wd = wd_ref[...]                    # (C, Cin)
    wf = wf_ref[...]                    # (4, 9*2C)
    up_matT = up_ref[...]               # (Ql, P) bilinear upsample matrix
    zpad = jnp.zeros((2 * C, pad), f32)
    offsets = [(oy, ox) for oy in (-1, 0, 1) for ox in (-1, 0, 1)]

    def hat(x, y, qx, qy):
        # bilinear interpolation weights; also reproduces the zeros padding of
        # grid_sample (out-of-range samples get zero total weight).
        return (jnp.maximum(1.0 - jnp.abs(x - qx), 0.0) *
                jnp.maximum(1.0 - jnp.abs(y - qy), 0.0))

    for b in range(block_n):
        low = low_ref[b]                # (Cin, Ql) f32
        high = high_ref[b]              # (C,  P)   f32

        # ---- 1x1 "down" conv (bias-free): channel matmul on the MXU ----
        l_feat = jnp.dot(wd, low, preferred_element_type=f32)            # (C, Ql)

        # ---- F.interpolate(bilinear, align_corners=True) via host matrix ----
        l_up = jnp.dot(l_feat, up_matT, preferred_element_type=f32)      # (C, P)

        # ---- fused 3x3 flow conv (padding=1, no bias) ----
        cat = jnp.concatenate([l_up, high], axis=0)                      # (2C, P)
        catp = jnp.concatenate([zpad, cat, zpad], axis=1)                # (2C, P+2*pad)
        parts = []
        for k, (oy, ox) in enumerate(offsets):
            off = oy * W + ox
            if off == 0:
                parts.append(cat)                                        # center tap
            else:
                start = pad + off                                        # static slice
                parts.append(catp[:, start:start + P] * mask_ref[k])     # (2C, P)
        stacked = jnp.concatenate(parts, axis=0)                         # (9*2C, P)
        flow = jnp.dot(wf, stacked, preferred_element_type=f32)          # (4, P)

        # ---- flow_warp == grid_sample(bilinear, zeros, align_corners=True) ----
        xl = (bgx + flow[0:1, :] * (1.0 / W) + 1.0) * (0.5 * (Wl - 1.0))
        yl = (bgy + flow[1:2, :] * (1.0 / H) + 1.0) * (0.5 * (Hl - 1.0))
        hat_l = hat(xl, yl, qlx, qly)                                    # (Ql, P)
        l_warp = jnp.dot(l_feat.astype(bf16), hat_l.astype(bf16),
                         preferred_element_type=f32)                     # (C, P)

        xh = (bgx + flow[2:3, :] * (1.0 / W) + 1.0) * (0.5 * (W - 1.0))
        yh = (bgy + flow[3:4, :] * (1.0 / H) + 1.0) * (0.5 * (H - 1.0))
        hat_h = hat(xh, yh, qhx, qhy)                                    # (P, P)
        h_warp = jnp.dot(high.astype(bf16), hat_h.astype(bf16),
                         preferred_element_type=f32)                     # (C, P)

        # ---- channel attention: avg/max pool -> shared MLP -> sigmoid ----
        fsum = l_warp + h_warp
        avg = jnp.mean(fsum, axis=1, keepdims=True)                      # (C, 1)
        mx = jnp.max(fsum, axis=1, keepdims=True)                        # (C, 1)

        def mlp(v):                                                      # v: (C, 1)
            h1 = jnp.maximum(jnp.dot(wm1_ref[...], v,
                                     preferred_element_type=f32), 0.0)   # (Cr, 1)
            return jnp.dot(wm2_ref[...], h1, preferred_element_type=f32) # (C, 1)

        logits = mlp(avg) + mlp(mx)
        gate = 1.0 / (1.0 + jnp.exp(-logits))                            # (C, 1)

        out_ref[b] = l_warp * gate + h_warp * (1.0 - gate)               # (C, P)


def fgfm_forward(low_nchw, high_nchw, w_down, w_flow, w_mlp1, w_mlp2, *, block_n=1):
    """FGFM forward.  Inputs/weights in PyTorch NCHW / OIHW conventions."""
    N, Cin, Hl, Wl = low_nchw.shape
    _, C, H, W = high_nchw.shape
    P, Ql = H * W, Hl * Wl
    assert N % block_n == 0
    assert H > 1 and W > 1 and Hl > 1 and Wl > 1  # align_corners divisions

    # channel-first flattening only — no NCHW<->NHWC transposes (perf item 1).
    low = low_nchw.reshape(N, Cin, Ql)
    high = high_nchw.reshape(N, C, P)
    wd = w_down[:, :, 0, 0]                                         # (C, Cin)
    wf = jnp.transpose(w_flow, (0, 2, 3, 1)).reshape(4, 9 * 2 * C)  # (4, 9*2C)
    wm1 = w_mlp1[:, :, 0, 0]                                        # (Cr, C)
    wm2 = w_mlp2[:, :, 0, 0]                                        # (C, Cr)
    Cr = wm1.shape[0]

    # ------ host-precomputed, data-independent constants (hoisted) ------
    xg = np.tile(np.arange(W, dtype=np.float32), H)                 # (P,)  x of pixel p
    yg = np.repeat(np.arange(H, dtype=np.float32), W)               # (P,)  y of pixel p
    qlx = np.tile(np.arange(Wl, dtype=np.float32), Hl)              # (Ql,)
    qly = np.repeat(np.arange(Hl, dtype=np.float32), Wl)            # (Ql,)

    # bilinear upsample matrix (align_corners=True), shape (Ql, P)
    xs = xg * (Wl - 1.0) / (W - 1.0)
    ys = yg * (Hl - 1.0) / (H - 1.0)
    up_matT = (np.maximum(1.0 - np.abs(xs[None, :] - qlx[:, None]), 0.0) *
               np.maximum(1.0 - np.abs(ys[None, :] - qly[:, None]), 0.0)
               ).astype(np.float32)

    bg = np.stack([-1.0 + 2.0 * xg / (W - 1.0),
                   -1.0 + 2.0 * yg / (H - 1.0)], axis=0).astype(np.float32)  # (2, P)
    qlc = np.stack([qlx, qly], axis=1).astype(np.float32)           # (Ql, 2)
    qhc = np.stack([xg, yg], axis=1).astype(np.float32)             # (P, 2)

    mask_list = []                                                  # zero-pad masks, 3x3 taps
    for oy in (-1, 0, 1):
        for ox in (-1, 0, 1):
            valid = ((yg + oy >= 0) & (yg + oy < H) &
                     (xg + ox >= 0) & (xg + ox < W))
            mask_list.append(valid.astype(np.float32))
    masks = np.stack(mask_list).reshape(9, 1, P)

    kernel = functools.partial(fgfm_kernel, H=H, W=W, Hl=Hl, Wl=Wl, C=C,
                               block_n=block_n)
    out = pl.pallas_call(
        kernel,
        out_shape=jax.ShapeDtypeStruct((N, C, P), jnp.float32),
        grid_spec=pltpu.PrefetchScalarGridSpec(
            num_scalar_prefetch=0,
            grid=(N // block_n,),
            in_specs=[
                pl.BlockSpec((block_n, Cin, Ql), lambda n: (n, 0, 0)),   # low
                pl.BlockSpec((block_n, C, P), lambda n: (n, 0, 0)),      # high
                pl.BlockSpec((Ql, P), lambda n: (0, 0)),                 # up_matT
                pl.BlockSpec((2, P), lambda n: (0, 0)),                  # base grid
                pl.BlockSpec((Ql, 2), lambda n: (0, 0)),                 # low src coords
                pl.BlockSpec((P, 2), lambda n: (0, 0)),                  # high src coords
                pl.BlockSpec((9, 1, P), lambda n: (0, 0, 0)),            # shift masks
                pl.BlockSpec((C, Cin), lambda n: (0, 0)),                # w_down
                pl.BlockSpec((4, 9 * 2 * C), lambda n: (0, 0)),          # w_flow (flat)
                pl.BlockSpec((Cr, C), lambda n: (0, 0)),                 # w_mlp1
                pl.BlockSpec((C, Cr), lambda n: (0, 0)),                 # w_mlp2
            ],
            out_specs=pl.BlockSpec((block_n, C, P), lambda n: (n, 0, 0)),
        ),
        compiler_params=pltpu.CompilerParams(
            dimension_semantics=("parallel",),           # megacore batch sharding (v7x)
            vmem_limit_bytes=32 * 1024 * 1024),
    )(low, high, jnp.asarray(up_matT), jnp.asarray(bg), jnp.asarray(qlc),
      jnp.asarray(qhc), jnp.asarray(masks), wd, wf, wm1, wm2)

    return out.reshape(N, C, H, W)


# ----------------------- plain-JAX reference (NCHW) -----------------------
def _bilinear_sample_nchw(img, xs, ys):
    # img: (N,C,Hin,Win); xs, ys: (N,Hout,Wout) absolute source coords.
    # Matches grid_sample(bilinear, padding_mode='zeros', align_corners=True).
    N, C, Hin, Win = img.shape
    x0 = jnp.floor(xs)
    y0 = jnp.floor(ys)
    x1 = x0 + 1.0
    y1 = y0 + 1.0
    flat = img.reshape(N, C, Hin * Win)

    def gather(ix, iy):
        valid = ((ix >= 0) & (ix <= Win - 1) & (iy >= 0) & (iy <= Hin - 1)).astype(img.dtype)
        ixc = jnp.clip(ix, 0, Win - 1).astype(jnp.int32)
        iyc = jnp.clip(iy, 0, Hin - 1).astype(jnp.int32)
        idx = (iyc * Win + ixc).reshape(N, 1, -1)
        g = jnp.take_along_axis(flat, idx, axis=2).reshape(N, C, *ix.shape[1:])
        return g * valid[:, None]

    wx1 = xs - x0
    wx0 = 1.0 - wx1
    wy1 = ys - y0
    wy0 = 1.0 - wy1
    return (gather(x0, y0) * (wx0 * wy0)[:, None] +
            gather(x1, y0) * (wx1 * wy0)[:, None] +
            gather(x0, y1) * (wx0 * wy1)[:, None] +
            gather(x1, y1) * (wx1 * wy1)[:, None])


def fgfm_reference(low, high, w_down, w_flow, w_mlp1, w_mlp2):
    N, Cin, Hl, Wl = low.shape
    _, C, H, W = high.shape
    dn = ('NCHW', 'OIHW', 'NCHW')
    prec = lax.Precision.HIGHEST

    l_feat = lax.conv_general_dilated(low, w_down, (1, 1), 'VALID',
                                      dimension_numbers=dn, precision=prec)

    ys = jnp.arange(H, dtype=jnp.float32) * (Hl - 1) / (H - 1)
    xs = jnp.arange(W, dtype=jnp.float32) * (Wl - 1) / (W - 1)
    l_up = _bilinear_sample_nchw(l_feat,
                                 jnp.broadcast_to(xs[None, None, :], (N, H, W)),
                                 jnp.broadcast_to(ys[None, :, None], (N, H, W)))

    cat = jnp.concatenate([l_up, high], axis=1)
    flow = lax.conv_general_dilated(cat, w_flow, (1, 1), ((1, 1), (1, 1)),
                                    dimension_numbers=dn, precision=prec)

    bgx = jnp.broadcast_to(
        (-1.0 + 2.0 * jnp.arange(W, dtype=jnp.float32) / (W - 1))[None, None, :], (N, H, W))
    bgy = jnp.broadcast_to(
        (-1.0 + 2.0 * jnp.arange(H, dtype=jnp.float32) / (H - 1))[None, :, None], (N, H, W))

    gx_l = bgx + flow[:, 0] / W
    gy_l = bgy + flow[:, 1] / H
    l_warp = _bilinear_sample_nchw(l_feat, (gx_l + 1) * 0.5 * (Wl - 1),
                                   (gy_l + 1) * 0.5 * (Hl - 1))

    gx_h = bgx + flow[:, 2] / W
    gy_h = bgy + flow[:, 3] / H
    h_warp = _bilinear_sample_nchw(high, (gx_h + 1) * 0.5 * (W - 1),
                                   (gy_h + 1) * 0.5 * (H - 1))

    fsum = l_warp + h_warp
    avg = fsum.mean(axis=(2, 3))
    mx = fsum.max(axis=(2, 3))
    w1 = w_mlp1[:, :, 0, 0]
    w2 = w_mlp2[:, :, 0, 0]

    def mlp(v):
        h1 = jnp.maximum(jnp.einsum('nc,rc->nr', v, w1, precision=prec), 0.0)
        return jnp.einsum('nr,cr->nc', h1, w2, precision=prec)

    gate = jax.nn.sigmoid(mlp(avg) + mlp(mx))[:, :, None, None]
    return l_warp * gate + h_warp * (1.0 - gate)


if __name__ == "__main__":
    N, Cin, C = 2, 16, 32          # out_channels must be >= 16 (ratio=16 in CA)
    H = W = 16                     # highres spatial  -> P = 256 (lane-dense)
    Hl = Wl = 8                    # lowres spatial   -> Ql = 64
    Cr = C // 16

    key = jax.random.PRNGKey(0)
    ks = jax.random.split(key, 6)
    low = jax.random.normal(ks[0], (N, Cin, Hl, Wl), jnp.float32)
    high = jax.random.normal(ks[1], (N, C, H, W), jnp.float32)
    # deterministic synthetic weights (PyTorch OIHW shapes)
    w_down = jax.random.normal(ks[2], (C, Cin, 1, 1), jnp.float32) / math.sqrt(Cin)
    w_flow = jax.random.normal(ks[3], (4, 2 * C, 3, 3), jnp.float32) * 0.05
    w_mlp1 = jax.random.normal(ks[4], (Cr, C, 1, 1), jnp.float32) / math.sqrt(C)
    w_mlp2 = jax.random.normal(ks[5], (C, Cr, 1, 1), jnp.float32) / math.sqrt(Cr)

    out = jax.jit(fgfm_forward)(low, high, w_down, w_flow, w_mlp1, w_mlp2)
    out = jax.block_until_ready(out)
    assert out.shape == (N, C, H, W)

    ref = fgfm_reference(low, high, w_down, w_flow, w_mlp1, w_mlp2)
    # bf16 operands on the warp matmuls (per perf review) -> slightly wider atol.
    np.testing.assert_allclose(np.asarray(out), np.asarray(ref), rtol=2e-2, atol=3e-2)

    print("KERNEL_OK")
</pallas_src>

<mosaic_0001>
module attributes {stable_mosaic.version = 11 : i64} {
  func.func @fgfm_kernel(%arg0: i32, %arg1: memref<1x16x64xf32, #tpu.memory_space<vmem>>, %arg2: memref<1x32x256xf32, #tpu.memory_space<vmem>>, %arg3: memref<64x256xf32, #tpu.memory_space<vmem>>, %arg4: memref<2x256xf32, #tpu.memory_space<vmem>>, %arg5: memref<64x2xf32, #tpu.memory_space<vmem>>, %arg6: memref<256x2xf32, #tpu.memory_space<vmem>>, %arg7: memref<9x1x256xf32, #tpu.memory_space<vmem>>, %arg8: memref<32x16xf32, #tpu.memory_space<vmem>>, %arg9: memref<4x576xf32, #tpu.memory_space<vmem>>, %arg10: memref<2x32xf32, #tpu.memory_space<vmem>>, %arg11: memref<32x2xf32, #tpu.memory_space<vmem>>, %arg12: memref<1x32x256xf32, #tpu.memory_space<vmem>>) attributes {dimension_semantics = [#tpu.dimension_semantics<parallel>], iteration_bounds = array<i64: 2>, scalar_prefetch = 0 : i64, scratch_operands = 0 : i64, tpu.core_type = #tpu.core_type<tc>, window_params = [{transform_indices = @transform_0, window_bounds = array<i64: 1, 16, 64>}, {transform_indices = @transform_1, window_bounds = array<i64: 1, 32, 256>}, {pipeline_mode = #tpu.pipeline_mode<synchronous>, transform_indices = @transform_2, window_bounds = array<i64: 64, 256>}, {pipeline_mode = #tpu.pipeline_mode<synchronous>, transform_indices = @transform_3, window_bounds = array<i64: 2, 256>}, {pipeline_mode = #tpu.pipeline_mode<synchronous>, transform_indices = @transform_4, window_bounds = array<i64: 64, 2>}, {pipeline_mode = #tpu.pipeline_mode<synchronous>, transform_indices = @transform_5, window_bounds = array<i64: 256, 2>}, {pipeline_mode = #tpu.pipeline_mode<synchronous>, transform_indices = @transform_6, window_bounds = array<i64: 9, 1, 256>}, {pipeline_mode = #tpu.pipeline_mode<synchronous>, transform_indices = @transform_7, window_bounds = array<i64: 32, 16>}, {pipeline_mode = #tpu.pipeline_mode<synchronous>, transform_indices = @transform_8, window_bounds = array<i64: 4, 576>}, {pipeline_mode = #tpu.pipeline_mode<synchronous>, transform_indices = @transform_9, window_bounds = array<i64: 2, 32>}, {pipeline_mode = #tpu.pipeline_mode<synchronous>, transform_indices = @transform_10, window_bounds = array<i64: 32, 2>}, {transform_indices = @transform_11, window_bounds = array<i64: 1, 32, 256>}]} {
    %c0 = arith.constant 0 : index
    %c0_0 = arith.constant 0 : index
    %0 = vector.load %arg4[%c0, %c0_0] : memref<2x256xf32, #tpu.memory_space<vmem>>, vector<1x256xf32>
    %c1 = arith.constant 1 : index
    %c0_1 = arith.constant 0 : index
    %1 = vector.load %arg4[%c1, %c0_1] : memref<2x256xf32, #tpu.memory_space<vmem>>, vector<1x256xf32>
    %c0_2 = arith.constant 0 : index
    %c0_3 = arith.constant 0 : index
    %2 = vector.load %arg5[%c0_2, %c0_3] : memref<64x2xf32, #tpu.memory_space<vmem>>, vector<64x1xf32>
    %c0_4 = arith.constant 0 : index
    %c1_5 = arith.constant 1 : index
    %3 = vector.load %arg5[%c0_4, %c1_5] : memref<64x2xf32, #tpu.memory_space<vmem>>, vector<64x1xf32>
    %c0_6 = arith.constant 0 : index
    %c0_7 = arith.constant 0 : index
    %4 = vector.load %arg6[%c0_6, %c0_7] : memref<256x2xf32, #tpu.memory_space<vmem>>, vector<256x1xf32>
    %c0_8 = arith.constant 0 : index
    %c1_9 = arith.constant 1 : index
    %5 = vector.load %arg6[%c0_8, %c1_9] : memref<256x2xf32, #tpu.memory_space<vmem>>, vector<256x1xf32>
    %c0_10 = arith.constant 0 : index
    %c0_11 = arith.constant 0 : index
    %6 = vector.load %arg8[%c0_10, %c0_11] : memref<32x16xf32, #tpu.memory_space<vmem>>, vector<32x16xf32>
    %c0_12 = arith.constant 0 : index
    %c0_13 = arith.constant 0 : index
    %7 = vector.load %arg9[%c0_12, %c0_13] : memref<4x576xf32, #tpu.memory_space<vmem>>, vector<4x576xf32>
    %c0_14 = arith.constant 0 : index
    %c0_15 = arith.constant 0 : index
    %8 = vector.load %arg3[%c0_14, %c0_15] : memref<64x256xf32, #tpu.memory_space<vmem>>, vector<64x256xf32>
    %cst = arith.constant 0.000000e+00 : f32
    %9 = vector.broadcast %cst : f32 to vector<64x17xf32>
    %c0_16 = arith.constant 0 : index
    %c0_17 = arith.constant 0 : index
    %c0_18 = arith.constant 0 : index
    %10 = vector.load %arg1[%c0_16, %c0_17, %c0_18] : memref<1x16x64xf32, #tpu.memory_space<vmem>>, vector<1x16x64xf32>
    %11 = vector.shape_cast %10 : vector<1x16x64xf32> to vector<16x64xf32>
    %c0_19 = arith.constant 0 : index
    %c0_20 = arith.constant 0 : index
    %c0_21 = arith.constant 0 : index
    %12 = vector.load %arg2[%c0_19, %c0_20, %c0_21] : memref<1x32x256xf32, #tpu.memory_space<vmem>>, vector<1x32x256xf32>
    %13 = vector.shape_cast %12 : vector<1x32x256xf32> to vector<32x256xf32>
    %cst_22 = arith.constant dense<0.000000e+00> : vector<32x64xf32>
    %14 = tpu.matmul %6, %11, %cst_22 {dimension_numbers = #tpu.dot_dimension_numbers<[1], [0], [0], [1], [0, 0, 1, 1], [], []>} : vector<32x16xf32>, vector<16x64xf32>, vector<32x64xf32> -> vector<32x64xf32>
    %cst_23 = arith.constant dense<0.000000e+00> : vector<32x256xf32>
    %15 = tpu.matmul %14, %8, %cst_23 {dimension_numbers = #tpu.dot_dimension_numbers<[1], [0], [0], [1], [0, 0, 1, 1], [], []>} : vector<32x64xf32>, vector<64x256xf32>, vector<32x256xf32> -> vector<32x256xf32>
    %16 = tpu.concatenate %15, %13 in 0 : vector<32x256xf32>, vector<32x256xf32> -> vector<64x256xf32>
    %17 = tpu.concatenate %9, %16, %9 in 1 : vector<64x17xf32>, vector<64x256xf32>, vector<64x17xf32> -> vector<64x290xf32>
    %18 = vector.extract_strided_slice %17 {offsets = [0, 0], sizes = [64, 256], strides = [1, 1]} : vector<64x290xf32> to vector<64x256xf32>
    %c0_24 = arith.constant 0 : index
    %c0_25 = arith.constant 0 : index
    %c0_26 = arith.constant 0 : index
    %19 = vector.load %arg7[%c0_24, %c0_25, %c0_26] : memref<9x1x256xf32, #tpu.memory_space<vmem>>, vector<1x1x256xf32>
    %20 = vector.shape_cast %19 : vector<1x1x256xf32> to vector<1x256xf32>
    %21 = vector.broadcast %20 : vector<1x256xf32> to vector<64x256xf32>
    %22 = arith.mulf %18, %21 : vector<64x256xf32>
    %23 = vector.extract_strided_slice %17 {offsets = [0, 1], sizes = [64, 256], strides = [1, 1]} : vector<64x290xf32> to vector<64x256xf32>
    %c1_27 = arith.constant 1 : index
    %c0_28 = arith.constant 0 : index
    %c0_29 = arith.constant 0 : index
    %24 = vector.load %arg7[%c1_27, %c0_28, %c0_29] : memref<9x1x256xf32, #tpu.memory_space<vmem>>, vector<1x1x256xf32>
    %25 = vector.shape_cast %24 : vector<1x1x256xf32> to vector<1x256xf32>
    %26 = vector.broadcast %25 : vector<1x256xf32> to vector<64x256xf32>
    %27 = arith.mulf %23, %26 : vector<64x256xf32>
    %28 = vector.extract_strided_slice %17 {offsets = [0, 2], sizes = [64, 256], strides = [1, 1]} : vector<64x290xf32> to vector<64x256xf32>
    %c2 = arith.constant 2 : index
    %c0_30 = arith.constant 0 : index
    %c0_31 = arith.constant 0 : index
    %29 = vector.load %arg7[%c2, %c0_30, %c0_31] : memref<9x1x256xf32, #tpu.memory_space<vmem>>, vector<1x1x256xf32>
    %30 = vector.shape_cast %29 : vector<1x1x256xf32> to vector<1x256xf32>
    %31 = vector.broadcast %30 : vector<1x256xf32> to vector<64x256xf32>
    %32 = arith.mulf %28, %31 : vector<64x256xf32>
    %33 = vector.extract_strided_slice %17 {offsets = [0, 16], sizes = [64, 256], strides = [1, 1]} : vector<64x290xf32> to vector<64x256xf32>
    %c3 = arith.constant 3 : index
    %c0_32 = arith.constant 0 : index
    %c0_33 = arith.constant 0 : index
    %34 = vector.load %arg7[%c3, %c0_32, %c0_33] : memref<9x1x256xf32, #tpu.memory_space<vmem>>, vector<1x1x256xf32>
    %35 = vector.shape_cast %34 : vector<1x1x256xf32> to vector<1x256xf32>
    %36 = vector.broadcast %35 : vector<1x256xf32> to vector<64x256xf32>
    %37 = arith.mulf %33, %36 : vector<64x256xf32>
    %38 = vector.extract_strided_slice %17 {offsets = [0, 18], sizes = [64, 256], strides = [1, 1]} : vector<64x290xf32> to vector<64x256xf32>
    %c5 = arith.constant 5 : index
    %c0_34 = arith.constant 0 : index
    %c0_35 = arith.constant 0 : index
    %39 = vector.load %arg7[%c5, %c0_34, %c0_35] : memref<9x1x256xf32, #tpu.memory_space<vmem>>, vector<1x1x256xf32>
    %40 = vector.shape_cast %39 : vector<1x1x256xf32> to vector<1x256xf32>
    %41 = vector.broadcast %40 : vector<1x256xf32> to vector<64x256xf32>
    %42 = arith.mulf %38, %41 : vector<64x256xf32>
    %43 = vector.extract_strided_slice %17 {offsets = [0, 32], sizes = [64, 256], strides = [1, 1]} : vector<64x290xf32> to vector<64x256xf32>
    %c6 = arith.constant 6 : index
    %c0_36 = arith.constant 0 : index
    %c0_37 = arith.constant 0 : index
    %44 = vector.load %arg7[%c6, %c0_36, %c0_37] : memref<9x1x256xf32, #tpu.memory_space<vmem>>, vector<1x1x256xf32>
    %45 = vector.shape_cast %44 : vector<1x1x256xf32> to vector<1x256xf32>
    %46 = vector.broadcast %45 : vector<1x256xf32> to vector<64x256xf32>
    %47 = arith.mulf %43, %46 : vector<64x256xf32>
    %48 = vector.extract_strided_slice %17 {offsets = [0, 33], sizes = [64, 256], strides = [1, 1]} : vector<64x290xf32> to vector<64x256xf32>
    %c7 = arith.constant 7 : index
    %c0_38 = arith.constant 0 : index
    %c0_39 = arith.constant 0 : index
    %49 = vector.load %arg7[%c7, %c0_38, %c0_39] : memref<9x1x256xf32, #tpu.memory_space<vmem>>, vector<1x1x256xf32>
    %50 = vector.shape_cast %49 : vector<1x1x256xf32> to vector<1x256xf32>
    %51 = vector.broadcast %50 : vector<1x256xf32> to vector<64x256xf32>
    %52 = arith.mulf %48, %51 : vector<64x256xf32>
    %53 = vector.extract_strided_slice %17 {offsets = [0, 34], sizes = [64, 256], strides = [1, 1]} : vector<64x290xf32> to vector<64x256xf32>
    %c8 = arith.constant 8 : index
    %c0_40 = arith.constant 0 : index
    %c0_41 = arith.constant 0 : index
    %54 = vector.load %arg7[%c8, %c0_40, %c0_41] : memref<9x1x256xf32, #tpu.memory_space<vmem>>, vector<1x1x256xf32>
    %55 = vector.shape_cast %54 : vector<1x1x256xf32> to vector<1x256xf32>
    %56 = vector.broadcast %55 : vector<1x256xf32> to vector<64x256xf32>
    %57 = arith.mulf %53, %56 : vector<64x256xf32>
    %58 = tpu.concatenate %22, %27, %32, %37, %16, %42, %47, %52, %57 in 0 : vector<64x256xf32>, vector<64x256xf32>, vector<64x256xf32>, vector<64x256xf32>, vector<64x256xf32>, vector<64x256xf32>, vector<64x256xf32>, vector<64x256xf32>, vector<64x256xf32> -> vector<576x256xf32>
    %cst_42 = arith.constant dense<0.000000e+00> : vector<4x256xf32>
    %59 = tpu.matmul %7, %58, %cst_42 {dimension_numbers = #tpu.dot_dimension_numbers<[1], [0], [0], [1], [0, 0, 1, 1], [], []>} : vector<4x576xf32>, vector<576x256xf32>, vector<4x256xf32> -> vector<4x256xf32>
    %60 = vector.extract_strided_slice %59 {offsets = [0, 0], sizes = [1, 256], strides = [1, 1]} : vector<4x256xf32> to vector<1x256xf32>
    %cst_43 = arith.constant 6.250000e-02 : f32
    %61 = vector.broadcast %cst_43 : f32 to vector<1x256xf32>
    %62 = arith.mulf %60, %61 : vector<1x256xf32>
    %63 = arith.addf %0, %62 : vector<1x256xf32>
    %cst_44 = arith.constant 1.000000e+00 : f32
    %64 = vector.broadcast %cst_44 : f32 to vector<1x256xf32>
    %65 = arith.addf %63, %64 : vector<1x256xf32>
    %cst_45 = arith.constant 3.500000e+00 : f32
    %66 = vector.broadcast %cst_45 : f32 to vector<1x256xf32>
    %67 = arith.mulf %65, %66 : vector<1x256xf32>
    %68 = vector.extract_strided_slice %59 {offsets = [1, 0], sizes = [1, 256], strides = [1, 1]} : vector<4x256xf32> to vector<1x256xf32>
    %cst_46 = arith.constant 6.250000e-02 : f32
    %69 = vector.broadcast %cst_46 : f32 to vector<1x256xf32>
    %70 = arith.mulf %68, %69 : vector<1x256xf32>
    %71 = arith.addf %1, %70 : vector<1x256xf32>
    %cst_47 = arith.constant 1.000000e+00 : f32
    %72 = vector.broadcast %cst_47 : f32 to vector<1x256xf32>
    %73 = arith.addf %71, %72 : vector<1x256xf32>
    %cst_48 = arith.constant 3.500000e+00 : f32
    %74 = vector.broadcast %cst_48 : f32 to vector<1x256xf32>
    %75 = arith.mulf %73, %74 : vector<1x256xf32>
    %76 = vector.broadcast %67 : vector<1x256xf32> to vector<64x256xf32>
    %77 = vector.broadcast %2 : vector<64x1xf32> to vector<64x256xf32>
    %78 = arith.subf %76, %77 : vector<64x256xf32>
    %79 = math.absf %78 : vector<64x256xf32>
    %cst_49 = arith.constant 1.000000e+00 : f32
    %80 = vector.broadcast %cst_49 : f32 to vector<64x256xf32>
    %81 = arith.subf %80, %79 : vector<64x256xf32>
    %cst_50 = arith.constant 0.000000e+00 : f32
    %82 = vector.broadcast %cst_50 : f32 to vector<64x256xf32>
    %83 = arith.maximumf %81, %82 : vector<64x256xf32>
    %84 = vector.broadcast %75 : vector<1x256xf32> to vector<64x256xf32>
    %85 = vector.broadcast %3 : vector<64x1xf32> to vector<64x256xf32>
    %86 = arith.subf %84, %85 : vector<64x256xf32>
    %87 = math.absf %86 : vector<64x256xf32>
    %cst_51 = arith.constant 1.000000e+00 : f32
    %88 = vector.broadcast %cst_51 : f32 to vector<64x256xf32>
    %89 = arith.subf %88, %87 : vector<64x256xf32>
    %cst_52 = arith.constant 0.000000e+00 : f32
    %90 = vector.broadcast %cst_52 : f32 to vector<64x256xf32>
    %91 = arith.maximumf %89, %90 : vector<64x256xf32>
    %92 = arith.mulf %83, %91 : vector<64x256xf32>
    %93 = arith.truncf %14 : vector<32x64xf32> to vector<32x64xbf16>
    %94 = arith.truncf %92 : vector<64x256xf32> to vector<64x256xbf16>
    %cst_53 = arith.constant dense<0.000000e+00> : vector<32x256xf32>
    %95 = tpu.matmul %93, %94, %cst_53 {dimension_numbers = #tpu.dot_dimension_numbers<[1], [0], [0], [1], [0, 0, 1, 1], [], []>} : vector<32x64xbf16>, vector<64x256xbf16>, vector<32x256xf32> -> vector<32x256xf32>
    %96 = vector.extract_strided_slice %59 {offsets = [2, 0], sizes = [1, 256], strides = [1, 1]} : vector<4x256xf32> to vector<1x256xf32>
    %cst_54 = arith.constant 6.250000e-02 : f32
    %97 = vector.broadcast %cst_54 : f32 to vector<1x256xf32>
    %98 = arith.mulf %96, %97 : vector<1x256xf32>
    %99 = arith.addf %0, %98 : vector<1x256xf32>
    %cst_55 = arith.constant 1.000000e+00 : f32
    %100 = vector.broadcast %cst_55 : f32 to vector<1x256xf32>
    %101 = arith.addf %99, %100 : vector<1x256xf32>
    %cst_56 = arith.constant 7.500000e+00 : f32
    %102 = vector.broadcast %cst_56 : f32 to vector<1x256xf32>
    %103 = arith.mulf %101, %102 : vector<1x256xf32>
    %104 = vector.extract_strided_slice %59 {offsets = [3, 0], sizes = [1, 256], strides = [1, 1]} : vector<4x256xf32> to vector<1x256xf32>
    %cst_57 = arith.constant 6.250000e-02 : f32
    %105 = vector.broadcast %cst_57 : f32 to vector<1x256xf32>
    %106 = arith.mulf %104, %105 : vector<1x256xf32>
    %107 = arith.addf %1, %106 : vector<1x256xf32>
    %cst_58 = arith.constant 1.000000e+00 : f32
    %108 = vector.broadcast %cst_58 : f32 to vector<1x256xf32>
    %109 = arith.addf %107, %108 : vector<1x256xf32>
    %cst_59 = arith.constant 7.500000e+00 : f32
    %110 = vector.broadcast %cst_59 : f32 to vector<1x256xf32>
    %111 = arith.mulf %109, %110 : vector<1x256xf32>
    %112 = vector.broadcast %103 : vector<1x256xf32> to vector<256x256xf32>
    %113 = vector.broadcast %4 : vector<256x1xf32> to vector<256x256xf32>
    %114 = arith.subf %112, %113 : vector<256x256xf32>
    %115 = math.absf %114 : vector<256x256xf32>
    %cst_60 = arith.constant 1.000000e+00 : f32
    %116 = vector.broadcast %cst_60 : f32 to vector<256x256xf32>
    %117 = arith.subf %116, %115 : vector<256x256xf32>
    %cst_61 = arith.constant 0.000000e+00 : f32
    %118 = vector.broadcast %cst_61 : f32 to vector<256x256xf32>
    %119 = arith.maximumf %117, %118 : vector<256x256xf32>
    %120 = vector.broadcast %111 : vector<1x256xf32> to vector<256x256xf32>
    %121 = vector.broadcast %5 : vector<256x1xf32> to vector<256x256xf32>
    %122 = arith.subf %120, %121 : vector<256x256xf32>
    %123 = math.absf %122 : vector<256x256xf32>
    %cst_62 = arith.constant 1.000000e+00 : f32
    %124 = vector.broadcast %cst_62 : f32 to vector<256x256xf32>
    %125 = arith.subf %124, %123 : vector<256x256xf32>
    %cst_63 = arith.constant 0.000000e+00 : f32
    %126 = vector.broadcast %cst_63 : f32 to vector<256x256xf32>
    %127 = arith.maximumf %125, %126 : vector<256x256xf32>
    %128 = arith.mulf %119, %127 : vector<256x256xf32>
    %129 = arith.truncf %13 : vector<32x256xf32> to vector<32x256xbf16>
    %130 = arith.truncf %128 : vector<256x256xf32> to vector<256x256xbf16>
    %cst_64 = arith.constant dense<0.000000e+00> : vector<32x256xf32>
    %131 = tpu.matmul %129, %130, %cst_64 {dimension_numbers = #tpu.dot_dimension_numbers<[1], [0], [0], [1], [0, 0, 1, 1], [], []>} : vector<32x256xbf16>, vector<256x256xbf16>, vector<32x256xf32> -> vector<32x256xf32>
    %132 = arith.addf %95, %131 : vector<32x256xf32>
    %cst_65 = arith.constant dense<0.000000e+00> : vector<32xf32>
    %133 = vector.multi_reduction <add>, %132, %cst_65 [1] : vector<32x256xf32> to vector<32xf32>
    %134 = vector.shape_cast %133 : vector<32xf32> to vector<32x1xf32>
    %cst_66 = arith.constant 2.560000e+02 : f32
    %135 = vector.broadcast %cst_66 : f32 to vector<32x1xf32>
    %136 = arith.divf %134, %135 : vector<32x1xf32>
    %cst_67 = arith.constant dense<0xFF800000> : vector<32xf32>
    %137 = vector.multi_reduction <maximumf>, %132, %cst_67 [1] : vector<32x256xf32> to vector<32xf32>
    %138 = vector.shape_cast %137 : vector<32xf32> to vector<32x1xf32>
    %c0_68 = arith.constant 0 : index
    %c0_69 = arith.constant 0 : index
    %139 = vector.load %arg10[%c0_68, %c0_69] : memref<2x32xf32, #tpu.memory_space<vmem>>, vector<2x32xf32>
    %cst_70 = arith.constant dense<0.000000e+00> : vector<2x1xf32>
    %140 = tpu.matmul %139, %136, %cst_70 {dimension_numbers = #tpu.dot_dimension_numbers<[1], [0], [0], [1], [0, 0, 1, 1], [], []>} : vector<2x32xf32>, vector<32x1xf32>, vector<2x1xf32> -> vector<2x1xf32>
    %cst_71 = arith.constant 0.000000e+00 : f32
    %141 = vector.broadcast %cst_71 : f32 to vector<2x1xf32>
    %142 = arith.maximumf %140, %141 : vector<2x1xf32>
    %c0_72 = arith.constant 0 : index
    %c0_73 = arith.constant 0 : index
    %143 = vector.load %arg11[%c0_72, %c0_73] : memref<32x2xf32, #tpu.memory_space<vmem>>, vector<32x2xf32>
    %cst_74 = arith.constant dense<0.000000e+00> : vector<32x1xf32>
    %144 = tpu.matmul %143, %142, %cst_74 {dimension_numbers = #tpu.dot_dimension_numbers<[1], [0], [0], [1], [0, 0, 1, 1], [], []>} : vector<32x2xf32>, vector<2x1xf32>, vector<32x1xf32> -> vector<32x1xf32>
    %c0_75 = arith.constant 0 : index
    %c0_76 = arith.constant 0 : index
    %145 = vector.load %arg10[%c0_75, %c0_76] : memref<2x32xf32, #tpu.memory_space<vmem>>, vector<2x32xf32>
    %cst_77 = arith.constant dense<0.000000e+00> : vector<2x1xf32>
    %146 = tpu.matmul %145, %138, %cst_77 {dimension_numbers = #tpu.dot_dimension_numbers<[1], [0], [0], [1], [0, 0, 1, 1], [], []>} : vector<2x32xf32>, vector<32x1xf32>, vector<2x1xf32> -> vector<2x1xf32>
    %cst_78 = arith.constant 0.000000e+00 : f32
    %147 = vector.broadcast %cst_78 : f32 to vector<2x1xf32>
    %148 = arith.maximumf %146, %147 : vector<2x1xf32>
    %c0_79 = arith.constant 0 : index
    %c0_80 = arith.constant 0 : index
    %149 = vector.load %arg11[%c0_79, %c0_80] : memref<32x2xf32, #tpu.memory_space<vmem>>, vector<32x2xf32>
    %cst_81 = arith.constant dense<0.000000e+00> : vector<32x1xf32>
    %150 = tpu.matmul %149, %148, %cst_81 {dimension_numbers = #tpu.dot_dimension_numbers<[1], [0], [0], [1], [0, 0, 1, 1], [], []>} : vector<32x2xf32>, vector<2x1xf32>, vector<32x1xf32> -> vector<32x1xf32>
    %151 = arith.addf %144, %150 : vector<32x1xf32>
    %cst_82 = arith.constant 0.000000e+00 : f32
    %152 = vector.broadcast %cst_82 : f32 to vector<32x1xf32>
    %153 = arith.subf %152, %151 : vector<32x1xf32>
    %154 = math.exp %153 : vector<32x1xf32>
    %cst_83 = arith.constant 1.000000e+00 : f32
    %155 = vector.broadcast %cst_83 : f32 to vector<32x1xf32>
    %156 = arith.addf %155, %154 : vector<32x1xf32>
    %cst_84 = arith.constant 1.000000e+00 : f32
    %157 = vector.broadcast %cst_84 : f32 to vector<32x1xf32>
    %158 = arith.divf %157, %156 : vector<32x1xf32>
    %159 = vector.broadcast %158 : vector<32x1xf32> to vector<32x256xf32>
    %160 = arith.mulf %95, %159 : vector<32x256xf32>
    %cst_85 = arith.constant 1.000000e+00 : f32
    %161 = vector.broadcast %cst_85 : f32 to vector<32x1xf32>
    %162 = arith.subf %161, %158 : vector<32x1xf32>
    %163 = vector.broadcast %162 : vector<32x1xf32> to vector<32x256xf32>
    %164 = arith.mulf %131, %163 : vector<32x256xf32>
    %165 = arith.addf %160, %164 : vector<32x256xf32>
    %c0_86 = arith.constant 0 : index
    %c0_87 = arith.constant 0 : index
    %c0_88 = arith.constant 0 : index
    %166 = vector.load %arg12[%c0_86, %c0_87, %c0_88] : memref<1x32x256xf32, #tpu.memory_space<vmem>>, vector<1x32x256xf32>
    %167 = vector.shape_cast %166 : vector<1x32x256xf32> to vector<32x256xf32>
    %168 = vector.shape_cast %165 : vector<32x256xf32> to vector<1x32x256xf32>
    tpu.vector_store %arg12[%c0_86, %c0_87, %c0_88], %168 {strides = array<i32>} : memref<1x32x256xf32, #tpu.memory_space<vmem>>, vector<1x32x256xf32>,
    return
  }
  func.func @transform_0(%arg0: i32) -> (i32, i32, i32) {
    %c0_i32 = arith.constant 0 : i32
    %c0_i32_0 = arith.constant 0 : i32
    %c0_i32_1 = arith.constant 0 : i32
    return %arg0, %c0_i32, %c0_i32_0 : i32, i32, i32
  }
  func.func @transform_1(%arg0: i32) -> (i32, i32, i32) {
    %c0_i32 = arith.constant 0 : i32
    %c0_i32_0 = arith.constant 0 : i32
    %c0_i32_1 = arith.constant 0 : i32
    return %arg0, %c0_i32, %c0_i32_0 : i32, i32, i32
  }
  func.func @transform_2(%arg0: i32) -> (i32, i32) {
    %c0_i32 = arith.constant 0 : i32
    %c0_i32_0 = arith.constant 0 : i32
    %c0_i32_1 = arith.constant 0 : i32
    return %c0_i32, %c0_i32_0 : i32, i32
  }
  func.func @transform_3(%arg0: i32) -> (i32, i32) {
    %c0_i32 = arith.constant 0 : i32
    %c0_i32_0 = arith.constant 0 : i32
    %c0_i32_1 = arith.constant 0 : i32
    return %c0_i32, %c0_i32_0 : i32, i32
  }
  func.func @transform_4(%arg0: i32) -> (i32, i32) {
    %c0_i32 = arith.constant 0 : i32
    %c0_i32_0 = arith.constant 0 : i32
    %c0_i32_1 = arith.constant 0 : i32
    return %c0_i32, %c0_i32_0 : i32, i32
  }
  func.func @transform_5(%arg0: i32) -> (i32, i32) {
    %c0_i32 = arith.constant 0 : i32
    %c0_i32_0 = arith.constant 0 : i32
    %c0_i32_1 = arith.constant 0 : i32
    return %c0_i32, %c0_i32_0 : i32, i32
  }
  func.func @transform_6(%arg0: i32) -> (i32, i32, i32) {
    %c0_i32 = arith.constant 0 : i32
    %c0_i32_0 = arith.constant 0 : i32
    %c0_i32_1 = arith.constant 0 : i32
    %c0_i32_2 = arith.constant 0 : i32
    return %c0_i32, %c0_i32_0, %c0_i32_1 : i32, i32, i32
  }
  func.func @transform_7(%arg0: i32) -> (i32, i32) {
    %c0_i32 = arith.constant 0 : i32
    %c0_i32_0 = arith.constant 0 : i32
    %c0_i32_1 = arith.constant 0 : i32
    return %c0_i32, %c0_i32_0 : i32, i32
  }
  func.func @transform_8(%arg0: i32) -> (i32, i32) {
    %c0_i32 = arith.constant 0 : i32
    %c0_i32_0 = arith.constant 0 : i32
    %c0_i32_1 = arith.constant 0 : i32
    return %c0_i32, %c0_i32_0 : i32, i32
  }
  func.func @transform_9(%arg0: i32) -> (i32, i32) {
    %c0_i32 = arith.constant 0 : i32
    %c0_i32_0 = arith.constant 0 : i32
    %c0_i32_1 = arith.constant 0 : i32
    return %c0_i32, %c0_i32_0 : i32, i32
  }
  func.func @transform_10(%arg0: i32) -> (i32, i32) {
    %c0_i32 = arith.constant 0 : i32
    %c0_i32_0 = arith.constant 0 : i32
    %c0_i32_1 = arith.constant 0 : i32
    return %c0_i32, %c0_i32_0 : i32, i32
  }
  func.func @transform_11(%arg0: i32) -> (i32, i32, i32) {
    %c0_i32 = arith.constant 0 : i32
    %c0_i32_0 = arith.constant 0 : i32
    %c0_i32_1 = arith.constant 0 : i32
    return %arg0, %c0_i32, %c0_i32_0 : i32, i32, i32
  }
}

</mosaic_0001>

<bundles_post_ra>
// kernel: fgfm_forward.1
= control target key start
LH: loop header
LB: loop body
LE: loop exit
PB: predicated region body
PF: predicated region fallthrough
CT: control target
= control target key end

     0   :  { %s4848_s17 = smov 0   ;;  %s7862_s0 = inlined_call_operand.vmem [shape: f32[2,16,64], index: 0, kind: input, shape index: {}]   ;;  %s7863_s1 = inlined_call_operand.vmem [shape: f32[2,32,256], index: 1, kind: input, shape index: {}]   ;;  %s7864_s2 = inlined_call_operand.vmem [shape: f32[64,256], index: 2, kind: input, shape index: {}]   ;;  %s7865_s3 = inlined_call_operand.vmem [shape: f32[2,256], index: 3, kind: input, shape index: {}]   ;;  %s7866_s4 = inlined_call_operand.vmem [shape: f32[64,2], index: 4, kind: input, shape index: {}]   ;;  %s7867_s5 = inlined_call_operand.vmem [shape: f32[256,2], index: 5, kind: input, shape index: {}]   ;;  %s7868_s6 = inlined_call_operand.vmem [shape: f32[9,1,256], index: 6, kind: input, shape index: {}]   ;;  %s7869_s7 = inlined_call_operand.vmem [shape: f32[32,16], index: 7, kind: input, shape index: {}]   ;;  %s7870_s8 = inlined_call_operand.vmem [shape: f32[4,576], index: 8, kind: input, shape index: {}]   ;;  %s7871_s9 = inlined_call_operand.vmem [shape: f32[2,32], index: 9, kind: input, shape index: {}]   ;;  %s7872_s10 = inlined_call_operand.vmem [shape: f32[32,2], index: 10, kind: input, shape index: {}]   ;;  %s7873_s11 = inlined_call_operand.vmem [shape: f32[2,32,256], index: 11, kind: output, shape index: {}]  }
   0x1 LB: > { %s3943_s18 = sadd.s32 4294967295, %s4765_s17   ;;  %p3947_p0 = scmp.ge.s32.totalorder %s4765_s17, 1  ;;  %s4765_s17 = sphi %s4848_s17, %s21_s17  }
   0x2   : > { %p347_p1 = scmp.lt.s32.totalorder %s4765_s17, 3 }
   0x4   : > { %p348_p2 = pnand %p3947_p0, %p347_p1 }
   0x6   : > { %351 = sbr.rel (%p348_p2) target bundleno = 2374 (0x946), region = 64 }
   0xd   : > { %p392_p3 = scmp.lt.s32.totalorder %s3943_s18, 1  ;;  %v451_v0 = vld [vmem:[%s7869_s7] sm:$0xff]  ;;  %vm484_vm0 = vcmask 130048   ;;  %v459_v1 = vld [vmem:[%s7864_s2 + $0x8] sm:$0xff]  ;;  %v461_v2 = vld [vmem:[%s7864_s2 + $0x18] sm:$0xff]  ;;  %v7874_v31 = vmov 0.0   ;;  %v783_v35 = vlaneseq }
   0xe   : > { %4020 = vmatprep.mubr.msk.f32.mxu1 %vm484_vm0, %v451_v0  ;;  %v4068_v6 = vpack.c.bf16 %v461_v2, %v459_v1  ;;  %v458_v7 = vld [vmem:[%s7864_s2] sm:$0xff]  ;;  %v460_v8 = vld [vmem:[%s7864_s2 + $0x10] sm:$0xff]  ;;  %v463_v9 = vld [vmem:[%s7864_s2 + $0x28] sm:$0xff]  ;;  %s4768_s14 = smov 17   ;;  %s4769_s19 = smov 1   ;;  %vm582_vm1 = vcmask 523264  }
   0xf   : > { %s8623_s18 = smov (!%p392_p3, %s3943_s18), 1  ;;  %v465_v10 = vld [vmem:[%s7864_s2 + $0x38] sm:$0xff]  ;;  %v452_v11 = vld [vmem:[%s7869_s7 + $0x8] sm:$0xff]  ;;  %v4070_v12 = vpack.c.bf16 %v460_v8, %v458_v7  ;;  %v453_v13 = vld [vmem:[%s7869_s7 + $0x10] sm:$0xff]  ;;  %v4939_v39 = vshrl.u32 %v783_v35, 7  ;;  %s4770_s24 = smov 2  }
  0x10   : > { %s3987_s21 = sshll.u32 %s8623_s18, 4  ;;  %v4072_v14 = vpack.c.bf16 %v465_v10, %v463_v9  ;;  %v462_v15 = vld [vmem:[%s7864_s2 + $0x20] sm:$0xff]  ;;  %v464_v16 = vld [vmem:[%s7864_s2 + $0x30] sm:$0xff]  ;;  %v467_v17 = vld [vmem:[%s7864_s2 + $0x48] sm:$0xff]  ;;  %s3988_s29 = sshll.u32 %s8623_s18, 6  ;;  %vm732_vm2 = vcmask 138240  }
  0x11   : > { %s396_s28 = scalar_lea.vmem %s7862_s0, %s3987_s21  ;;  %v469_v18 = vld [vmem:[%s7864_s2 + $0x58] sm:$0xff]  ;;  %v4074_v20 = vpack.c.bf16 %v464_v16, %v462_v15  ;;  %v466_v22 = vld [vmem:[%s7864_s2 + $0x40] sm:$0xff]  ;;  %v468_v23 = vld [vmem:[%s7864_s2 + $0x50] sm:$0xff]  ;;  %s401_s13 = scalar_lea.vmem %s7863_s1, %s3988_s29  ;;  %8053 = vst [vmem:[#allocation4_spill] sm:$0xff] %v4939_v39  ;;  %v4947_v46 = vsub.s32 1, %v4939_v39  ;;  %v4950_v47 = vsub.s32 0, %v4939_v39 }
  0x12   : > { %v474_v3 = vld [vmem:[%s396_s28] sm:$0xff]  ;;  %v475_v4 = vld [vmem:[%s396_s28 + $0x8] sm:$0xff]  ;;  %v454_v19 = vld [vmem:[%s7869_s7 + $0x18] sm:$0xff]  ;;  %v4076_v21 = vpack.c.bf16 %v469_v18, %v467_v17  ;;  %v4078_v26 = vpack.c.bf16 %v468_v23, %v466_v22  ;;  %s4771_s25 = smov 16   ;;  %vm824_vm3 = vcmask 7168   ;;  %s4772_s28 = smov 18  }
  0x13   : > { %v4064_v5 = vpack.c.bf16 %v475_v4, %v474_v3  ;;  %v471_v24 = vld [vmem:[%s7864_s2 + $0x68] sm:$0xff]  ;;  %v473_v25 = vld [vmem:[%s7864_s2 + $0x78] sm:$0xff]  ;;  %v470_v28 = vld [vmem:[%s7864_s2 + $0x60] sm:$0xff]  ;;  %8055 = vst [vmem:[#allocation6_spill] sm:$0xff] %v4947_v46  ;;  %s4773_s30 = smov 127   ;;  %vm868_vm4 = vcmask 15360   ;;  %s7837_s21 = scalar_lea.vmem %s7873_s11, %s3988_s29 }
  0x14   : > { %v4080_v27 = vpack.c.bf16 %v473_v25, %v471_v24  ;;  %v472_v29 = vld [vmem:[%s7864_s2 + $0x70] sm:$0xff]  ;;  %v477_v32 = vld [vmem:[%s401_s13 + $0x8] sm:$0xff]  ;;  %v479_v33 = vld [vmem:[%s401_s13 + $0x18] sm:$0xff]  ;;  %8056 = vst [vmem:[#allocation7_spill] sm:$0xff] %v4950_v47  ;;  %s4775_s15 = smov 126   ;;  %s4776_s20 = smov 33  }
  0x15   : > { %4065 = vmatprep.subr.bf16.mxu1 %v4064_v5  ;;  %v4082_v30 = vpack.c.bf16 %v472_v29, %v470_v28  ;;  %v476_v34 = vld [vmem:[%s401_s13] sm:$0xff]  ;;  %718 = vrot.lane.b32.xlu1 %v477_v32, %s4768_s14  ;;  %v4934_v36 = vpack.c.bf16 %v479_v33, %v477_v32  ;;  %v478_v37 = vld [vmem:[%s401_s13 + $0x10] sm:$0xff]  ;;  %v481_v40 = vld [vmem:[%s401_s13 + $0x28] sm:$0xff]  ;;  %s4777_s23 = smov 112   ;;  %vm955_vm5 = vcmask 146432   ;;  %s4778_s26 = smov 34  }
  0x16   : > { %4067 = vmatpush3.bf16.msra.mxu1 %v4064_v5  ;;  %716 = vrot.lane.b32.xlu0 %v476_v34, %s4768_s14  ;;  %v4937_v38 = vpack.c.bf16 %v478_v37, %v476_v34  ;;  %v483_v41 = vld [vmem:[%s401_s13 + $0x38] sm:$0xff]  ;;  %v3963_v42 = vld [vmem:[%s7868_s6 + $0x2] sm:$0x3]  ;;  %v482_v45 = vld [vmem:[%s401_s13 + $0x30] sm:$0xff]  ;;  %s4779_s27 = smov 110   ;;  %vm999_vm6 = vcmask 261120  }
  0x17   : > { %4069 = vmatprep.subr.bf16.mxu1 %v4068_v6  ;;  %8051 = vst [vmem:[#allocation2_spill] sm:$0xff] %v4934_v36  ;;  %v480_v43 = vld [vmem:[%s401_s13 + $0x20] sm:$0xff]  ;;  %v4944_v44 = vpack.c.bf16 %v483_v41, %v481_v40  ;;  %v819_v49 = vrot.slane %v3963_v42, %v4947_v46  ;;  %v815_v50 = vrot.slane %v3963_v42, %v4950_v47  ;;  %v3966_v18 = vld [vmem:[%s7868_s6 + $0xa] sm:$0x3]  ;;  %s4781_s12 = smov 96   ;;  %vm1043_vm7 = vcmask 269312  }
  0x18   : > { %8052 = vst [vmem:[#allocation3_spill] sm:$0xff] %v4937_v38  ;;  %v4952_v48 = vpack.c.bf16 %v482_v45, %v480_v43  ;;  %v3964_v51 = vld [vmem:[%s7868_s6 + $0x4] sm:$0x3]  ;;  %v3965_v54 = vld [vmem:[%s7868_s6 + $0x6] sm:$0x3]  ;;  %s4782_s13 = smov 95  }
  0x19   : > { %4021 = vmatmul.mubr.msk.f32.vlgmr.msra.gmra.mrb[0].mxu1 %vm484_vm0, %v452_v11  ;;  %8054 = vst [vmem:[#allocation5_spill] sm:$0xff] %v4944_v44  ;;  %822 = vrot.lane.b32.xlu1 %v819_v49, %s4769_s19  ;;  %v863_v52 = vrot.slane %v3964_v51, %v4947_v46  ;;  %v859_v53 = vrot.slane %v3964_v51, %v4950_v47  ;;  %vm1188_vm8 = vcmask 1039360   ;;  %vm1293_vm9 = vcmask 1031168  }
  0x1a   : > { %4023 = vmatprep.mubr.msk.f32.mxu1 %vm484_vm0, %v453_v13  ;;  %4071 = vmatpush1.bf16.msra.mxu1 %v4070_v12  ;;  %8057 = vst [vmem:[#allocation8_spill] sm:$0xff] %v4952_v48  ;;  %v907_v55 = vrot.slane %v3965_v54, %v4947_v46  ;;  %v903_v56 = vrot.slane %v3965_v54, %v4950_v47  ;;  %vm1087_vm10 = vcmask 277504   ;;  %vm1398_vm11 = vcmask 916480  }
  0x1b   : > { %4073 = vmatprep.subr.bf16.mxu1 %v4072_v14  ;;  %820 = vrot.lane.b32.xlu0 %v815_v50, %s4769_s19  ;;  %vm1503_vm12 = vcmask 900096   ;;  %vm1608_vm13 = vcmask 785408   ;;  %vm1713_vm14 = vcmask 777216   ;;  %vm1818_vm15 = vcmask 769024  }
  0x1d   : > { %4024 = vmatmul.mubr.msk.f32.gmra.mrb[2].mxu1 %vm484_vm0, %v454_v19  ;;  %722 = vrot.lane.b32.xlu1 %v479_v33, %s4768_s14 }
  0x1e   : > { %4075 = vmatpush1.bf16.msra.mxu1 %v4074_v20  ;;  %659 = vmatprep.mubr.f32.mxu1 %v7874_v31 }
  0x1f   : > { %4077 = vmatprep.subr.bf16.mxu1 %v4076_v21  ;;  %720 = vrot.lane.b32.xlu0 %v478_v37, %s4768_s14  ;;  %v946_v37 = vrot.slane %v3966_v18, %v4950_v47 }
  0x21   : > { %726 = vrot.lane.b32.xlu1 %v481_v40, %s4768_s14 }
  0x22   : > { %4079 = vmatpush1.bf16.msra.mxu1 %v4078_v26  ;;  %v950_v26 = vrot.slane %v3966_v18, %v4947_v46 }
  0x23   : > { %4081 = vmatprep.subr.bf16.mxu1 %v4080_v27  ;;  %724 = vrot.lane.b32.xlu0 %v480_v43, %s4768_s14 }
  0x25   : > { %730 = vrot.lane.b32.xlu1 %v483_v41, %s4768_s14 }
  0x26   : > { %4083 = vmatpush1.bf16.msra.mxu1 %v4082_v30 }
  0x27   : > { %728 = vrot.lane.b32.xlu0 %v482_v45, %s4768_s14 }
  0x29   : > { %866 = vrot.lane.b32.xlu1 %v863_v52, %s4770_s24 }
  0x2b   : > { %864 = vrot.lane.b32.xlu0 %v859_v53, %s4770_s24 }
  0x2d   : > { %910 = vrot.lane.b32.xlu1 %v907_v55, %s4771_s25 }
  0x2f   : > { %908 = vrot.lane.b32.xlu0 %v903_v56, %s4771_s25 }
  0x87   : > { %v719_v63 = vpop.permute.xlu1 %718 }
  0x88   : > { %v717_v0 = vpop.permute.xlu0 %716  ;;  %v5020_v14 = vsel %vm732_vm2, %v719_v63, 0.0 }
  0x89   : > { %v5023_v15 = vsel %vm732_vm2, %v717_v0, %v719_v63  ;;  %v5045_v22 = vsel %vm732_vm2, 0.0, %v717_v0 }
  0x8b   : > { %v4995_v1 = vpop.permute.xlu1 %822 }
  0x8c   : > { %v843_v21 = vmul.f32 %v4995_v1, %v5020_v14 }
  0x8d   : > { %v4997_v2 = vpop.permute.xlu0 %820 }
  0x8e   : > { %v5033_v17 = vsel %vm824_vm3, %v4997_v2, %v4995_v1  ;;  %v841_v40 = vmul.f32 %v4997_v2, %v5045_v22 }
  0x8f   : > { %v723_v5 = vpop.permute.xlu1 %722  ;;  %v842_v20 = vmul.f32 %v5033_v17, %v5023_v15 }
  0x90   : > { %v5060_v27 = vsel %vm732_vm2, %v723_v5, 0.0 }
  0x91   : > { %v721_v6 = vpop.permute.xlu0 %720  ;;  %v4277_v35 = vpack.i.bf16 %v843_v21, %v842_v20  ;;  %v846_v49 = vmul.f32 %v4995_v1, %v5060_v27  ;;  %v3967_v21 = vld [vmem:[%s7868_s6 + $0xc] sm:$0x3] }
  0x92   : > { %v5054_v24 = vsel %vm732_vm2, 0.0, %v721_v6  ;;  %v5063_v28 = vsel %vm732_vm2, %v721_v6, %v723_v5 }
  0x93   : > { %v727_v11 = vpop.permute.xlu1 %726  ;;  %v844_v41 = vmul.f32 %v4997_v2, %v5054_v24  ;;  %v845_v45 = vmul.f32 %v5033_v17, %v5063_v28 }
  0x94   : > { %v5068_v33 = vsel %vm732_vm2, %v727_v11, 0.0 }
  0x95   : > { %v725_v13 = vpop.permute.xlu0 %724  ;;  %v849_v53 = vmul.f32 %v4995_v1, %v5068_v33  ;;  %v4287_v54 = vpack.i.bf16 %v844_v41, %v841_v40  ;;  %v4282_v55 = vpack.i.bf16 %v846_v49, %v845_v45  ;;  %v990_v45 = vrot.slane %v3967_v21, %v4950_v47 }
  0x96   : > { %v5071_v34 = vsel %vm732_vm2, %v725_v13, %v727_v11  ;;  %v5100_v56 = vsel %vm732_vm2, 0.0, %v725_v13 }
  0x97   : > { %v731_v30 = vpop.permute.xlu1 %730  ;;  %v848_v52 = vmul.f32 %v5033_v17, %v5071_v34  ;;  %v847_v18 = vmul.f32 %v4997_v2, %v5100_v56 }
  0x98   : > { %v5081_v42 = vsel %vm732_vm2, %v731_v30, 0.0 }
  0x99   : > { %v729_v32 = vpop.permute.xlu0 %728  ;;  %8070 = vst [vmem:[#allocation21_spill] sm:$0xff] %v5081_v42  ;;  %v852_v51 = vmul.f32 %v4995_v1, %v5081_v42  ;;  %v4292_v11 = vpack.i.bf16 %v849_v53, %v848_v52 }
  0x9a   : > { %v5084_v43 = vsel %vm732_vm2, %v729_v32, %v731_v30  ;;  %v5103_v63 = vsel %vm732_vm2, 0.0, %v729_v32  ;;  %v994_v32 = vrot.slane %v3967_v21, %v4947_v46 }
  0x9b   : > { %8071 = vst [vmem:[#allocation22_spill] sm:$0xff] %v5084_v43  ;;  %v851_v50 = vmul.f32 %v5033_v17, %v5084_v43  ;;  %v5105_v0 = vpop.permute.xlu1 %866  ;;  %v850_v13 = vmul.f32 %v4997_v2, %v5103_v63 }
  0x9c   : > { %v887_v30 = vmul.f32 %v5105_v0, %v5020_v14  ;;  %v896_v53 = vmul.f32 %v5105_v0, %v5081_v42 }
  0x9d   : > { %v5107_v5 = vpop.permute.xlu0 %864  ;;  %v4297_v6 = vpack.i.bf16 %v852_v51, %v851_v50  ;;  %v890_v50 = vmul.f32 %v5105_v0, %v5060_v27 }
  0x9e   : > { %v5118_v20 = vsel %vm868_vm4, %v5107_v5, %v5105_v0  ;;  %v885_v40 = vmul.f32 %v5107_v5, %v5045_v22  ;;  %v888_v41 = vmul.f32 %v5107_v5, %v5054_v24  ;;  %v894_v21 = vmul.f32 %v5107_v5, %v5103_v63 }
  0x9f   : > { %v889_v49 = vmul.f32 %v5118_v20, %v5063_v28  ;;  %v895_v52 = vmul.f32 %v5118_v20, %v5084_v43 }
  0xa0   : > { %v4317_v51 = vpack.i.bf16 %v888_v41, %v885_v40  ;;  %v5165_v40 = vpop.permute.xlu1 %910 }
  0xec   : > { %v4972_v57 = vpop.f32.mrb[0].mxu1 }
  0xed   : > { %8058 = vst [vmem:[#allocation9_spill] sm:$0xff] %v4972_v57  ;;  %v4974_v58 = vpop.f32.mrb[1].mxu1 }
  0xee   : > { %8059 = vst [vmem:[#allocation10_spill] sm:$0xff] %v4974_v58  ;;  %3959 = vmatmul.mubr.msk.f32.vlgmr.msra.gmra.mrb[4].mxu1 %vm582_vm1, %v4974_v58 }
  0xef   : > { %665 = vmatprep.mubr.f32.mxu1 %v7874_v31 }
  0xf0   : > { %v4981_v60 = vpop.f32.mrb[2].mxu1 }
  0xf1   : > { %8060 = vst [vmem:[#allocation11_spill] sm:$0xff] %v4981_v60  ;;  %v4983_v61 = vpop.f32.mrb[3].mxu1 }
  0xf2   : > { %8061 = vst [vmem:[#allocation12_spill] sm:$0xff] %v4983_v61  ;;  %3960 = vmatmul.mubr.msk.f32.gmra.mrb[6].mxu1 %vm582_vm1, %v4972_v57 }
  0xf3   : > { %671 = vmatprep.mubr.f32.mxu1 %v7874_v31 }
  0xf6   : > { %3961 = vmatmul.mubr.msk.f32.gmra.mrb[8].mxu1 %vm582_vm1, %v4983_v61 }
  0xf7   : > { %677 = vmatprep.mubr.f32.mxu1 %v7874_v31 }
  0xfa   : > { %3962 = vmatmul.mubr.msk.f32.gmra.mrb[10].mxu1 %vm582_vm1, %v4981_v60 }
 0x1c1   : > { %v4999_v3 = vpop.f32.mrb[4].mxu1 }
 0x1c2   : > { %8062 = vst [vmem:[#allocation13_spill] sm:$0xff] %v4999_v3  ;;  %700 = vrot.lane.b32.xlu0 %v4999_v3, %s4768_s14  ;;  %v5003_v4 = vpop.f32.mrb[5].mxu1 }
 0x1c3   : > { %8063 = vst [vmem:[#allocation14_spill] sm:$0xff] %v5003_v4 }
 0x1c5   : > { %v5005_v7 = vpop.f32.mrb[6].mxu1 }
 0x1c6   : > { %8064 = vst [vmem:[#allocation15_spill] sm:$0xff] %v5005_v7  ;;  %702 = vrot.lane.b32.xlu0 %v5003_v4, %s4768_s14  ;;  %704 = vrot.lane.b32.xlu1 %v5005_v7, %s4768_s14  ;;  %v5013_v9 = vpop.f32.mrb[7].mxu1 }
 0x1c7   : > { %8065 = vst [vmem:[#allocation16_spill] sm:$0xff] %v5013_v9 }
 0x1c9   : > { %v5017_v12 = vpop.f32.mrb[8].mxu1 }
 0x1ca   : > { %8066 = vst [vmem:[#allocation17_spill] sm:$0xff] %v5017_v12  ;;  %706 = vrot.lane.b32.xlu1 %v5013_v9, %s4768_s14  ;;  %708 = vrot.lane.b32.xlu0 %v5017_v12, %s4768_s14  ;;  %v5029_v16 = vpop.f32.mrb[9].mxu1 }
 0x1cb   : > { %8067 = vst [vmem:[#allocation18_spill] sm:$0xff] %v5029_v16 }
 0x1cd   : > { %v5038_v19 = vpop.f32.mrb[10].mxu1 }
 0x1ce   : > { %8068 = vst [vmem:[#allocation19_spill] sm:$0xff] %v5038_v19  ;;  %710 = vrot.lane.b32.xlu1 %v5029_v16, %s4768_s14  ;;  %712 = vrot.lane.b32.xlu0 %v5038_v19, %s4768_s14  ;;  %v5056_v25 = vpop.f32.mrb[11].mxu1 }
 0x1cf   : > { %8069 = vst [vmem:[#allocation20_spill] sm:$0xff] %v5056_v25 }
 0x1d2   : > { %953 = vrot.lane.b32.xlu0 %v950_v26, %s4772_s28  ;;  %714 = vrot.lane.b32.xlu1 %v5056_v25, %s4768_s14  ;;  %v886_v26 = vmul.f32 %v5118_v20, %v5023_v15  ;;  %s4774_s14 = smov 32  }
 0x1d6   : > { %4278 = vrot.lane.b32.xlu0 %v4277_v35, %s4773_s30  ;;  %951 = vrot.lane.b32.xlu1 %v946_v37, %s4772_s28  ;;  %v4302_v35 = vpack.i.bf16 %v850_v13, %v847_v18  ;;  %v4307_v37 = vpack.i.bf16 %v887_v30, %v886_v26  ;;  %v891_v13 = vmul.f32 %v5107_v5, %v5100_v56  ;;  %v3968_v26 = vld [vmem:[%s7868_s6 + $0xe] sm:$0x3] }
 0x1d7   : > { %v1038_v30 = vrot.slane %v3968_v26, %v4947_v46 }
 0x1da   : > { %4288 = vrot.lane.b32.xlu0 %v4287_v54, %s4773_s30  ;;  %4283 = vrot.lane.b32.xlu1 %v4282_v55, %s4773_s30  ;;  %v4312_v54 = vpack.i.bf16 %v890_v50, %v889_v49  ;;  %v892_v55 = vmul.f32 %v5118_v20, %v5071_v34  ;;  %v781_v50 = vld [vmem:[%s7868_s6] sm:$0x3] }
 0x1de   : > { %4298 = vrot.lane.b32.xlu0 %v4297_v6, %s4773_s30  ;;  %4293 = vrot.lane.b32.xlu1 %v4292_v11, %s4773_s30  ;;  %v893_v6 = vmul.f32 %v5105_v0, %v5068_v33  ;;  %v4327_v11 = vpack.i.bf16 %v896_v53, %v895_v52 }
 0x1e0   : > { %v4322_v18 = vpack.i.bf16 %v893_v6, %v892_v55  ;;  %v5184_v6 = vrot.slane %v781_v50, %v4947_v46 }
 0x1e2   : > { %997 = vrot.lane.b32.xlu0 %v994_v32, %s4774_s14  ;;  %4303 = vrot.lane.b32.xlu1 %v4302_v35, %s4773_s30  ;;  %v4332_v32 = vpack.i.bf16 %v894_v21, %v891_v13  ;;  %v1034_v35 = vrot.slane %v3968_v26, %v4950_v47 }
 0x1e6   : > { %4308 = vrot.lane.b32.xlu0 %v4307_v37, %s4775_s15  ;;  %995 = vrot.lane.b32.xlu1 %v990_v45, %s4774_s14  ;;  %v5163_v37 = vpop.permute.xlu0 %908  ;;  %s4783_s14 = smov 94  }
 0x1ea   : > { %4318 = vrot.lane.b32.xlu0 %v4317_v51, %s4775_s15  ;;  %4313 = vrot.lane.b32.xlu1 %v4312_v54, %s4775_s15 }
 0x1ee   : > { %4328 = vrot.lane.b32.xlu0 %v4327_v11, %s4775_s15  ;;  %4323 = vrot.lane.b32.xlu1 %v4322_v18, %s4775_s15  ;;  %v5187_v11 = vrot.slane %v781_v50, %v4950_v47 }
 0x1f0   : > { %v803_v48 = vmul.f32 %v5187_v11, %v5054_v24 }
 0x1f2   : > { %1041 = vrot.lane.b32.xlu0 %v1038_v30, %s4776_s20  ;;  %4333 = vrot.lane.b32.xlu1 %v4332_v32, %s4775_s15 }
 0x1f6   : > { %1039 = vrot.lane.b32.xlu1 %v1034_v35, %s4776_s20 }
 0x234   : > { %v701_v41 = vpop.permute.xlu0 %700 }
 0x235   : > { %v5190_v18 = vsel %vm732_vm2, 0.0, %v701_v41 }
 0x236   : > { %v793_v62 = vmul.f32 %v5187_v11, %v5190_v18 }
 0x238   : > { %v703_v45 = vpop.permute.xlu0 %702  ;;  %v705_v49 = vpop.permute.xlu1 %704 }
 0x239   : > { %v5171_v51 = vsel %vm732_vm2, %v701_v41, %v703_v45  ;;  %v5174_v52 = vsel %vm732_vm2, %v703_v45, 0.0  ;;  %v5177_v53 = vsel %vm732_vm2, 0.0, %v705_v49  ;;  %v5207_v41 = vsel %vm484_vm0, %v5163_v37, %v5165_v40 }
 0x23a   : > { %v830_v54 = vmul.f32 %v5033_v17, %v5171_v51  ;;  %v831_v55 = vmul.f32 %v4995_v1, %v5174_v52  ;;  %v874_v30 = vmul.f32 %v5118_v20, %v5171_v51  ;;  %v875_v32 = vmul.f32 %v5105_v0, %v5174_v52 }
 0x23b   : > { %v795_v50 = vmul.f32 %v5187_v11, %v5177_v53  ;;  %v917_v59 = vmul.f32 %v5207_v41, %v5171_v51  ;;  %v918_v10 = vmul.f32 %v5165_v40, %v5174_v52  ;;  %vm4787_vm0 = vmmov 0  }
 0x23c   : > { %v707_v13 = vpop.permute.xlu1 %706  ;;  %v709_v21 = vpop.permute.xlu0 %708  ;;  %v4337_v26 = vpack.i.bf16 %v831_v55, %v830_v54  ;;  %v794_v54 = vmul.f32 %v5184_v6, %v5171_v51  ;;  %v4342_v29 = vpack.i.bf16 %v875_v32, %v874_v30  ;;  %v802_v30 = vmul.f32 %v5184_v6, %v5023_v15 }
 0x23d   : > { %v5197_v35 = vsel %vm732_vm2, %v705_v49, %v707_v13  ;;  %v5200_v45 = vsel %vm732_vm2, %v707_v13, 0.0  ;;  %v4086_v61 = vpack.c.bf16 %v795_v50, %v793_v62  ;;  %v5229_v57 = vsel %vm732_vm2, 0.0, %v709_v21 }
 0x23e   : > { %4338 = vrot.lane.b32.xlu0 %v4337_v26, %s4773_s30  ;;  %v796_v49 = vmul.f32 %v5184_v6, %v5197_v35  ;;  %v833_v55 = vmul.f32 %v5033_v17, %v5197_v35  ;;  %v834_v13 = vmul.f32 %v4995_v1, %v5200_v45  ;;  %v877_v60 = vmul.f32 %v5118_v20, %v5197_v35 }
 0x23f   : > { %v878_v58 = vmul.f32 %v5105_v0, %v5200_v45  ;;  %v797_v32 = vmul.f32 %v5187_v11, %v5229_v57 }
 0x240   : > { %v711_v31 = vpop.permute.xlu1 %710  ;;  %v713_v26 = vpop.permute.xlu0 %712  ;;  %v4084_v23 = vpack.c.bf16 %v796_v49, %v794_v54  ;;  %v4367_v8 = vpack.i.bf16 %v834_v13, %v833_v55  ;;  %v4347_v49 = vpack.i.bf16 %v918_v10, %v917_v59  ;;  %v920_v55 = vmul.f32 %v5207_v41, %v5197_v35 }
 0x241   : > { %v5232_v39 = vsel %vm732_vm2, 0.0, %v713_v26  ;;  %v5238_v62 = vsel %vm732_vm2, %v709_v21, %v711_v31  ;;  %v804_v21 = vmul.f32 %v5184_v6, %v5063_v28  ;;  %v921_v13 = vmul.f32 %v5165_v40, %v5200_v45 }
 0x242   : > { %4085 = vmatprep.subr.bf16.mxu0 %v4084_v23  ;;  %4343 = vrot.lane.b32.xlu0 %v4342_v29, %s4775_s15  ;;  %v799_v50 = vmul.f32 %v5187_v11, %v5232_v39  ;;  %v832_v23 = vmul.f32 %v4997_v2, %v5177_v53  ;;  %v798_v29 = vmul.f32 %v5184_v6, %v5238_v62  ;;  %v5259_v59 = vsel %vm732_vm2, %v711_v31, 0.0 }
 0x243   : > { %4368 = vrot.lane.b32.xlu1 %v4367_v8, %s4773_s30  ;;  %4087 = vmatpush1.bf16.msra.mxu0 %v4086_v61  ;;  %v4372_v61 = vpack.i.bf16 %v878_v58, %v877_v60  ;;  %v829_v10 = vmul.f32 %v4997_v2, %v5190_v18  ;;  %v801_v60 = vmul.f32 %v5187_v11, %v5045_v22 }
 0x244   : > { %v715_v54 = vpop.permute.xlu1 %714  ;;  %v4090_v58 = vpack.c.bf16 %v799_v50, %v797_v32  ;;  %v4377_v38 = vpack.i.bf16 %v921_v13, %v920_v55  ;;  %v4092_v36 = vpack.c.bf16 %v804_v21, %v802_v30  ;;  %v836_v12 = vmul.f32 %v5033_v17, %v5238_v62 }
 0x245   : > { %v5252_v8 = vsel %vm732_vm2, %v713_v26, %v715_v54  ;;  %v4352_v31 = vpack.i.bf16 %v832_v23, %v829_v10  ;;  %v873_v32 = vmul.f32 %v5107_v5, %v5190_v18  ;;  %v806_v50 = vmul.f32 %v5184_v6, %v5071_v34 }
 0x246   : > { %4348 = vrot.lane.b32.xlu0 %v4347_v49, %s4777_s23  ;;  %v800_v26 = vmul.f32 %v5184_v6, %v5252_v8  ;;  %v876_v49 = vmul.f32 %v5107_v5, %v5177_v53  ;;  %v808_v23 = vmul.f32 %v5184_v6, %v5084_v43  ;;  %v4094_v30 = vpack.c.bf16 %v803_v48, %v801_v60 }
 0x247   : > { %4373 = vrot.lane.b32.xlu1 %v4372_v61, %s4775_s15  ;;  %v837_v61 = vmul.f32 %v4995_v1, %v5259_v59  ;;  %v919_v21 = vmul.f32 %v5163_v37, %v5177_v53  ;;  %v807_v55 = vmul.f32 %v5187_v11, %v5103_v63  ;;  %v5292_v13 = vsel %vm732_vm2, %v715_v54, 0.0 }
 0x248   : > { %v4088_v44 = vpack.c.bf16 %v800_v26, %v798_v29  ;;  %v4357_v29 = vpack.i.bf16 %v876_v49, %v873_v32  ;;  %v4096_v48 = vpack.c.bf16 %v808_v23, %v806_v50  ;;  %v916_v6 = vmul.f32 %v5163_v37, %v5190_v18 }
 0x249   : > { %v4382_v10 = vpack.i.bf16 %v837_v61, %v836_v12  ;;  %v839_v12 = vmul.f32 %v5033_v17, %v5252_v8  ;;  %v840_v54 = vmul.f32 %v4995_v1, %v5292_v13  ;;  %v923_v60 = vmul.f32 %v5207_v41, %v5238_v62 }
 0x24a   : > { %4353 = vrot.lane.b32.xlu0 %v4352_v31, %s4773_s30  ;;  %4089 = vmatprep.subr.bf16.mxu0 %v4088_v44  ;;  %v805_v44 = vmul.f32 %v5187_v11, %v5100_v56  ;;  %v4362_v11 = vpack.i.bf16 %v919_v21, %v916_v6  ;;  %v924_v31 = vmul.f32 %v5165_v40, %v5259_v59 }
 0x24b   : > { %4378 = vrot.lane.b32.xlu1 %v4377_v38, %s4777_s23  ;;  %4091 = vmatpush1.bf16.msra.mxu0 %v4090_v58  ;;  %v880_v38 = vmul.f32 %v5118_v20, %v5238_v62  ;;  %v4412_v49 = vpack.i.bf16 %v840_v54, %v839_v12  ;;  %v929_v17 = vmul.f32 %v5207_v41, %v5023_v15 }
 0x24c   : > { %4093 = vmatprep.subr.bf16.mxu0 %v4092_v36  ;;  %v881_v36 = vmul.f32 %v5105_v0, %v5259_v59  ;;  %v4098_v58 = vpack.c.bf16 %v807_v55, %v805_v44  ;;  %v930_v1 = vmul.f32 %v5165_v40, %v5020_v14  ;;  %v4392_v61 = vpack.i.bf16 %v924_v31, %v923_v60  ;;  %v5350_v60 = vpop.permute.xlu1 %951  ;;  %v5357_v31 = vpop.permute.xlu0 %953 }
 0x24d   : > { %v838_v32 = vmul.f32 %v4997_v2, %v5232_v39  ;;  %v835_v50 = vmul.f32 %v4997_v2, %v5229_v57  ;;  %v882_v44 = vmul.f32 %v5107_v5, %v5232_v39  ;;  %v879_v55 = vmul.f32 %v5107_v5, %v5229_v57 }
 0x24e   : > { %4358 = vrot.lane.b32.xlu0 %v4357_v29, %s4775_s15  ;;  %v4387_v26 = vpack.i.bf16 %v881_v36, %v880_v38  ;;  %v4417_v23 = vpack.i.bf16 %v930_v1, %v929_v17  ;;  %v931_v29 = vmul.f32 %v5163_v37, %v5054_v24  ;;  %v938_v2 = vmul.f32 %v5207_v41, %v5084_v43 }
 0x24f   : > { %4383 = vrot.lane.b32.xlu1 %v4382_v10, %s4773_s30  ;;  %4095 = vmatpush1.bf16.msra.mxu0 %v4094_v30  ;;  %v928_v30 = vmul.f32 %v5163_v37, %v5045_v22  ;;  %v4397_v21 = vpack.i.bf16 %v838_v32, %v835_v50  ;;  %v939_v38 = vmul.f32 %v5165_v40, %v5081_v42 }
 0x250   : > { %4097 = vmatprep.subr.bf16.mxu0 %v4096_v48  ;;  %v4402_v36 = vpack.i.bf16 %v882_v44, %v879_v55  ;;  %v925_v48 = vmul.f32 %v5163_v37, %v5232_v39  ;;  %v922_v6 = vmul.f32 %v5163_v37, %v5229_v57  ;;  %v883_v5 = vmul.f32 %v5118_v20, %v5252_v8  ;;  %v3969_v20 = vld [vmem:[%s7868_s6 + $0x10] sm:$0x3]  ;;  %v5370_v50 = vpop.permute.xlu1 %4283  ;;  %v5378_v44 = vpop.permute.xlu0 %4278 }
 0x251   : > { %v4427_v10 = vpack.i.bf16 %v931_v29, %v928_v30  ;;  %v884_v12 = vmul.f32 %v5105_v0, %v5292_v13  ;;  %v935_v17 = vmul.f32 %v5207_v41, %v5071_v34  ;;  %v936_v1 = vmul.f32 %v5165_v40, %v5068_v33 }
 0x252   : > { %4363 = vrot.lane.b32.xlu0 %v4362_v11, %s4777_s23  ;;  %v4437_v11 = vpack.i.bf16 %v939_v38, %v938_v2  ;;  %v4407_v54 = vpack.i.bf16 %v925_v48, %v922_v6  ;;  %v1078_v32 = vrot.slane %v3969_v20, %v4950_v47  ;;  %v934_v29 = vmul.f32 %v5163_v37, %v5100_v56 }
 0x253   : > { %4388 = vrot.lane.b32.xlu1 %v4387_v26, %s4775_s15  ;;  %4099 = vmatpush1.bf16.msra.mxu0 %v4098_v58  ;;  %v932_v26 = vmul.f32 %v5207_v41, %v5063_v28  ;;  %v933_v58 = vmul.f32 %v5165_v40, %v5060_v27  ;;  %v4447_v0 = vpack.i.bf16 %v884_v12, %v883_v5 }
 0x254   : > { %v4432_v30 = vpack.i.bf16 %v936_v1, %v935_v17  ;;  %v962_v55 = vmul.f32 %v5357_v31, %v5174_v52  ;;  %v960_v2 = vmul.f32 %v5350_v60, %v5190_v18  ;;  %v963_v38 = vmul.f32 %v5350_v60, %v5177_v53  ;;  %v5387_v48 = vpop.permute.xlu1 %4293  ;;  %v5392_v6 = vpop.permute.xlu0 %4288 }
 0x255   : > { %v926_v5 = vmul.f32 %v5207_v41, %v5252_v8  ;;  %v927_v12 = vmul.f32 %v5165_v40, %v5292_v13  ;;  %v974_v17 = vmul.f32 %v5357_v31, %v5020_v14  ;;  %v968_v1 = vmul.f32 %v5357_v31, %v5259_v59 }
 0x256   : > { %4413 = vrot.lane.b32.xlu0 %v4412_v49, %s4773_s30  ;;  %v4422_v49 = vpack.i.bf16 %v933_v58, %v932_v26  ;;  %v965_v26 = vmul.f32 %v5357_v31, %v5200_v45  ;;  %v4291_v16 = vunpack.i.h.bf16 %v5392_v6  ;;  %v4296_v7 = vunpack.i.h.bf16 %v5387_v48 }
 0x257   : > { %4393 = vrot.lane.b32.xlu1 %v4392_v61, %s4777_s23  ;;  %v5365_v61 = vsel %vm955_vm5, %v5350_v60, %v5357_v31 }
 0x258   : > { %v5403_v58 = vpop.permute.xlu1 %4303  ;;  %v967_v41 = vmul.f32 %v5365_v61, %v5238_v62  ;;  %v5409_v40 = vpop.permute.xlu0 %4298 }
 0x259   : > { %v4301_v25 = vunpack.i.h.bf16 %v5409_v40  ;;  %v4300_v3 = vunpack.i.l.bf16 %v5409_v40  ;;  %v4306_v40 = vunpack.i.h.bf16 %v5403_v58  ;;  %v4305_v9 = vunpack.i.l.bf16 %v5403_v58 }
 0x25a   : > { %4418 = vrot.lane.b32.xlu0 %v4417_v23, %s4777_s23  ;;  %v961_v23 = vmul.f32 %v5365_v61, %v5171_v51 }
 0x25b   : > { %4398 = vrot.lane.b32.xlu1 %v4397_v21, %s4773_s30  ;;  %v937_v21 = vmul.f32 %v5163_v37, %v5103_v63  ;;  %v1082_v37 = vrot.slane %v3969_v20, %v4947_v46  ;;  %v4477_v20 = vpack.i.bf16 %v927_v12, %v926_v5  ;;  %v983_v12 = vmul.f32 %v5357_v31, %v5081_v42 }
 0x25e   : > { %4428 = vrot.lane.b32.xlu0 %v4427_v10, %s4777_s23  ;;  %v4452_v10 = vpack.i.bf16 %v962_v55, %v961_v23  ;;  %v972_v23 = vmul.f32 %v5350_v60, %v5045_v22  ;;  %v969_v55 = vmul.f32 %v5350_v60, %v5232_v39 }
 0x25f   : > { %4403 = vrot.lane.b32.xlu1 %v4402_v36, %s4775_s15  ;;  %v4442_v36 = vpack.i.bf16 %v937_v21, %v934_v29  ;;  %v4467_v29 = vpack.i.bf16 %v968_v1, %v967_v41  ;;  %v966_v21 = vmul.f32 %v5350_v60, %v5229_v57 }
 0x262   : > { %4438 = vrot.lane.b32.xlu0 %v4437_v11, %s4777_s23  ;;  %v4462_v11 = vpack.i.bf16 %v963_v38, %v960_v2  ;;  %v5429_v2 = vpop.permute.xlu0 %997 }
 0x263   : > { %4408 = vrot.lane.b32.xlu1 %v4407_v54, %s4777_s23  ;;  %v964_v54 = vmul.f32 %v5365_v61, %v5197_v35 }
 0x266   : > { %4448 = vrot.lane.b32.xlu0 %v4447_v0, %s4775_s15  ;;  %v973_v0 = vmul.f32 %v5365_v61, %v5023_v15 }
 0x267   : > { %4423 = vrot.lane.b32.xlu1 %v4422_v49, %s4777_s23  ;;  %v4457_v49 = vpack.i.bf16 %v965_v26, %v964_v54  ;;  %v977_v54 = vmul.f32 %v5357_v31, %v5060_v27 }
 0x26a   : > { %1083 = vrot.lane.b32.xlu0 %v1078_v32, %s4778_s26  ;;  %v4482_v32 = vpack.i.bf16 %v974_v17, %v973_v0  ;;  %v979_v17 = vmul.f32 %v5365_v61, %v5071_v34 }
 0x26b   : > { %4433 = vrot.lane.b32.xlu1 %v4432_v30, %s4777_s23  ;;  %v975_v30 = vmul.f32 %v5350_v60, %v5054_v24 }
 0x26d   : > { %v4492_v38 = vpack.i.bf16 %v975_v30, %v972_v23  ;;  %v1006_v23 = vmul.f32 %v5429_v2, %v5174_v52  ;;  %v980_v30 = vmul.f32 %v5357_v31, %v5068_v33 }
 0x26e   : > { %4453 = vrot.lane.b32.xlu0 %v4452_v10, %s4779_s27  ;;  %v5425_v10 = vpop.permute.xlu1 %995 }
 0x26f   : > { %4443 = vrot.lane.b32.xlu1 %v4442_v36, %s4777_s23  ;;  %v982_v36 = vmul.f32 %v5365_v61, %v5084_v43  ;;  %v5438_v5 = vsel %vm999_vm6, %v5425_v10, %v5429_v2 }
 0x270   : > { %v1005_v0 = vmul.f32 %v5438_v5, %v5171_v51 }
 0x272   : > { %4463 = vrot.lane.b32.xlu0 %v4462_v11, %s4779_s27  ;;  %v976_v11 = vmul.f32 %v5365_v61, %v5063_v28  ;;  %v5446_v26 = vpop.permute.xlu1 %4313 }
 0x273   : > { %1085 = vrot.lane.b32.xlu1 %v1082_v37, %s4778_s26  ;;  %v4472_v37 = vpack.i.bf16 %v969_v55, %v966_v21  ;;  %v1004_v21 = vmul.f32 %v5425_v10, %v5190_v18  ;;  %v1007_v55 = vmul.f32 %v5425_v10, %v5177_v53 }
 0x274   : > { %v4487_v41 = vpack.i.bf16 %v977_v54, %v976_v11  ;;  %v7886_v11 = vmov 0  }
 0x275   : > { %4698 = vset.pattern.permute.xlu1 %v7886_v11  ;;  %4697 = vset.pattern.permute.xlu0 %v7886_v11 }
 0x276   : > { %4478 = vrot.lane.b32.xlu0 %v4477_v20, %s4777_s23  ;;  %v4502_v20 = vpack.i.bf16 %v983_v12, %v982_v36  ;;  %v978_v36 = vmul.f32 %v5350_v60, %v5100_v56  ;;  %v5477_v12 = vpop.permute.xlu1 %4323  ;;  %2394 = vmatprep.mubr.bf16.mxu1 %v7886_v11 }
 0x277   : > { %4458 = vrot.lane.b32.xlu1 %v4457_v49, %s4779_s27  ;;  %v5453_v49 = vld [vmem:[%s7870_s8] sm:$0xff] }
 0x278   : > { %8072 = vst [vmem:[#allocation23_spill] sm:$0xff] %v5453_v49  ;;  %v1854_v1 = vcombine.high %v5453_v49, %v5453_v49 }
 0x27a   : > { %4483 = vrot.lane.b32.xlu0 %v4482_v32, %s4779_s27  ;;  %v5459_v32 = vpop.permute.xlu0 %4308  ;;  %1924 = vmatprep.mubr.f32.mxu0 %v1854_v1  ;;  %v1009_v1 = vmul.f32 %v5429_v2, %v5200_v45 }
 0x27b   : > { %4468 = vrot.lane.b32.xlu1 %v4467_v29, %s4779_s27  ;;  %v4512_v29 = vpack.i.bf16 %v1006_v23, %v1005_v0  ;;  %v5494_v23 = vpop.permute.xlu1 %4333 }
 0x27e   : > { %4493 = vrot.lane.b32.xlu0 %v4492_v38, %s4779_s27  ;;  %v4497_v38 = vpack.i.bf16 %v980_v30, %v979_v17  ;;  %v5482_v54 = vpop.permute.xlu0 %4318  ;;  %v1018_v17 = vmul.f32 %v5429_v2, %v5020_v14 }
 0x27f   : > { %4473 = vrot.lane.b32.xlu1 %v4472_v37, %s4779_s27  ;;  %v981_v37 = vmul.f32 %v5350_v60, %v5103_v63  ;;  %v1017_v60 = vmul.f32 %v5438_v5, %v5023_v15 }
 0x281   : > { %v4507_v0 = vpack.i.bf16 %v981_v37, %v978_v36  ;;  %v4537_v30 = vpack.i.bf16 %v1018_v17, %v1017_v60  ;;  %v1012_v37 = vmul.f32 %v5429_v2, %v5259_v59  ;;  %v970_v60 = vmul.f32 %v5365_v61, %v5252_v8 }
 0x282   : > { %4503 = vrot.lane.b32.xlu0 %v4502_v20, %s4779_s27  ;;  %v4522_v20 = vpack.i.bf16 %v1007_v55, %v1004_v21  ;;  %v1019_v21 = vmul.f32 %v5425_v10, %v5054_v24  ;;  %v5502_v36 = vpop.permute.xlu0 %4328  ;;  %v1013_v17 = vmul.f32 %v5425_v10, %v5232_v39 }
 0x283   : > { %4488 = vrot.lane.b32.xlu1 %v4487_v41, %s4779_s27  ;;  %v1008_v41 = vmul.f32 %v5438_v5, %v5197_v35 }
 0x285   : > { %v4517_v55 = vpack.i.bf16 %v1009_v1, %v1008_v41  ;;  %v1010_v41 = vmul.f32 %v5425_v10, %v5229_v57  ;;  %v5514_v1 = vpop.permute.xlu1 %1039 }
 0x286   : > { %4513 = vrot.lane.b32.xlu0 %v4512_v29, %s4781_s12  ;;  %v1016_v29 = vmul.f32 %v5425_v10, %v5045_v22 }
 0x287   : > { %4498 = vrot.lane.b32.xlu1 %v4497_v38, %s4779_s27  ;;  %v1011_v38 = vmul.f32 %v5438_v5, %v5238_v62 }
 0x28a   : > { %4523 = vrot.lane.b32.xlu0 %v4522_v20, %s4781_s12  ;;  %v4547_v20 = vpack.i.bf16 %v1019_v21, %v1016_v29  ;;  %v5520_v29 = vpop.permute.xlu0 %1041  ;;  %v1026_v21 = vmul.f32 %v5438_v5, %v5084_v43 }
 0x28b   : > { %4508 = vrot.lane.b32.xlu1 %v4507_v0, %s4779_s27  ;;  %v4527_v0 = vpack.i.bf16 %v1012_v37, %v1011_v38  ;;  %v1020_v38 = vmul.f32 %v5438_v5, %v5063_v28  ;;  %v1044_v37 = vsel %vm1043_vm7, %v5514_v1, %v5520_v29 }
 0x28c   : > { %v1052_v11 = vmul.f32 %v1044_v37, %v5197_v35 }
 0x28e   : > { %4538 = vrot.lane.b32.xlu0 %v4537_v30, %s4781_s12  ;;  %v971_v30 = vmul.f32 %v5357_v31, %v5292_v13  ;;  %v1027_v31 = vmul.f32 %v5429_v2, %v5081_v42 }
 0x28f   : > { %4518 = vrot.lane.b32.xlu1 %v4517_v55, %s4781_s12  ;;  %v4532_v55 = vpack.i.bf16 %v1013_v17, %v1010_v41  ;;  %v1023_v17 = vmul.f32 %v5438_v5, %v5071_v34 }
 0x290   : > { %v4557_v61 = vpack.i.bf16 %v971_v30, %v970_v60  ;;  %v4562_v60 = vpack.i.bf16 %v1027_v31, %v1026_v21  ;;  %v1050_v30 = vmul.f32 %v5520_v29, %v5174_v52  ;;  %v1048_v21 = vmul.f32 %v5514_v1, %v5190_v18 }
 0x292   : > { %4548 = vrot.lane.b32.xlu0 %v4547_v20, %s4781_s12  ;;  %v1021_v20 = vmul.f32 %v5429_v2, %v5060_v27 }
 0x293   : > { %4528 = vrot.lane.b32.xlu1 %v4527_v0, %s4781_s12  ;;  %v1049_v0 = vmul.f32 %v1044_v37, %v5171_v51 }
 0x294   : > { %v4542_v41 = vpack.i.bf16 %v1021_v20, %v1020_v38  ;;  %v1051_v38 = vmul.f32 %v5514_v1, %v5177_v53  ;;  %v1022_v20 = vmul.f32 %v5425_v10, %v5100_v56 }
 0x296   : > { %4558 = vrot.lane.b32.xlu0 %v4557_v61, %s4779_s27  ;;  %v1024_v61 = vmul.f32 %v5429_v2, %v5068_v33 }
 0x297   : > { %4533 = vrot.lane.b32.xlu1 %v4532_v55, %s4781_s12  ;;  %v4572_v55 = vpack.i.bf16 %v1050_v30, %v1049_v0  ;;  %v1014_v0 = vmul.f32 %v5438_v5, %v5252_v8  ;;  %v1062_v5 = vmul.f32 %v5520_v29, %v5020_v14 }
 0x298   : > { %v4552_v31 = vpack.i.bf16 %v1024_v61, %v1023_v17  ;;  %v1015_v17 = vmul.f32 %v5429_v2, %v5292_v13  ;;  %v1056_v2 = vmul.f32 %v5520_v29, %v5259_v59 }
 0x29a   : > { %4563 = vrot.lane.b32.xlu0 %v4562_v60, %s4781_s12  ;;  %v1025_v60 = vmul.f32 %v5425_v10, %v5103_v63  ;;  %v1053_v10 = vmul.f32 %v5520_v29, %v5200_v45  ;;  %v4597_v61 = vpack.i.bf16 %v1015_v17, %v1014_v0  ;;  %v1057_v0 = vmul.f32 %v5514_v1, %v5232_v39 }
 0x29b   : > { %4543 = vrot.lane.b32.xlu1 %v4542_v41, %s4781_s12  ;;  %v4582_v41 = vpack.i.bf16 %v1051_v38, %v1048_v21  ;;  %v1055_v38 = vmul.f32 %v1044_v37, %v5238_v62  ;;  %v1070_v17 = vmul.f32 %v1044_v37, %v5084_v43  ;;  %v1204_v43 = vsel %vm1188_vm8, %v4300_v3, %v4301_v25 }
 0x29c   : > { %v4567_v30 = vpack.i.bf16 %v1025_v60, %v1022_v20  ;;  %v4577_v21 = vpack.i.bf16 %v1053_v10, %v1052_v11  ;;  %v1060_v20 = vmul.f32 %v5514_v1, %v5045_v22  ;;  %v1063_v60 = vmul.f32 %v5514_v1, %v5054_v24 }
 0x29d   : > { %v4587_v11 = vpack.i.bf16 %v1056_v2, %v1055_v38  ;;  %v1058_v2 = vmul.f32 %v1044_v37, %v5252_v8 }
 0x29e   : > { %4573 = vrot.lane.b32.xlu0 %v4572_v55, %s4782_s13  ;;  %v1061_v55 = vmul.f32 %v1044_v37, %v5023_v15 }
 0x29f   : > { %4553 = vrot.lane.b32.xlu1 %v4552_v31, %s4781_s12 }
 0x2a0   : > { %v4602_v31 = vpack.i.bf16 %v1062_v5, %v1061_v55  ;;  %v1071_v55 = vmul.f32 %v5520_v29, %v5081_v42 }
 0x2a2   : > { %4583 = vrot.lane.b32.xlu0 %v4582_v41, %s4782_s13  ;;  %v1054_v41 = vmul.f32 %v5514_v1, %v5229_v57  ;;  %v4622_v5 = vpack.i.bf16 %v1071_v55, %v1070_v17 }
 0x2a3   : > { %4568 = vrot.lane.b32.xlu1 %v4567_v30, %s4781_s12  ;;  %v4612_v30 = vpack.i.bf16 %v1063_v60, %v1060_v20  ;;  %v1067_v20 = vmul.f32 %v1044_v37, %v5071_v34  ;;  %v1059_v60 = vmul.f32 %v5520_v29, %v5292_v13 }
 0x2a4   : > { %v4592_v10 = vpack.i.bf16 %v1057_v0, %v1054_v41 }
 0x2a5   : > { %v4632_v17 = vpack.i.bf16 %v1059_v60, %v1058_v2 }
 0x2a6   : > { %4598 = vrot.lane.b32.xlu0 %v4597_v61, %s4781_s12  ;;  %v1064_v61 = vmul.f32 %v1044_v37, %v5063_v28  ;;  %v1066_v37 = vmul.f32 %v5514_v1, %v5100_v56 }
 0x2a7   : > { %4578 = vrot.lane.b32.xlu1 %v4577_v21, %s4782_s13  ;;  %v1065_v21 = vmul.f32 %v5520_v29, %v5060_v27 }
 0x2aa   : > { %4603 = vrot.lane.b32.xlu0 %v4602_v31, %s4782_s13  ;;  %v4607_v31 = vpack.i.bf16 %v1065_v21, %v1064_v61  ;;  %v1069_v61 = vmul.f32 %v5514_v1, %v5103_v63 }
 0x2ab   : > { %4588 = vrot.lane.b32.xlu1 %v4587_v11, %s4782_s13  ;;  %v1068_v11 = vmul.f32 %v5520_v29, %v5068_v33 }
 0x2ad   : > { %v4617_v55 = vpack.i.bf16 %v1068_v11, %v1067_v20  ;;  %v4627_v20 = vpack.i.bf16 %v1069_v61, %v1066_v37 }
 0x2ae   : > { %4613 = vrot.lane.b32.xlu0 %v4612_v30, %s4782_s13 }
 0x2af   : > { %4593 = vrot.lane.b32.xlu1 %v4592_v10, %s4782_s13 }
 0x2b0   : > { %v4339_v38 = vpop.permute.xlu0 %4338 }
 0x2b1   : > { %v4341_v41 = vunpack.i.h.bf16 %v4339_v38  ;;  %v4340_v0 = vunpack.i.l.bf16 %v4339_v38 }
 0x2b2   : > { %4623 = vrot.lane.b32.xlu0 %v4622_v5, %s4782_s13 }
 0x2b3   : > { %4608 = vrot.lane.b32.xlu1 %v4607_v31, %s4782_s13  ;;  %v1190_v38 = vsel %vm1188_vm8, %v4340_v0, %v4341_v41 }
 0x2b4   : > { %v5596_v30 = vpop.permute.xlu0 %4343 }
 0x2b5   : > { %v4369_v10 = vpop.permute.xlu1 %4368  ;;  %v4345_v58 = vunpack.i.l.bf16 %v5596_v30 }
 0x2b6   : > { %v4371_v21 = vunpack.i.h.bf16 %v4369_v10  ;;  %v4370_v5 = vunpack.i.l.bf16 %v4369_v10  ;;  %4633 = vrot.lane.b32.xlu0 %v4632_v17, %s4782_s13 }
 0x2b7   : > { %4618 = vrot.lane.b32.xlu1 %v4617_v55, %s4782_s13 }
 0x2b8   : > { %v5604_v29 = vpop.permute.xlu0 %4348  ;;  %v1192_v2 = vsel %vm1188_vm8, %v4370_v5, %v4371_v21 }
 0x2b9   : > { %v5608_v31 = vpop.permute.xlu1 %4373  ;;  %v4100_v60 = vpack.c.bf16 %v1192_v2, %v1190_v38 }
 0x2bb   : > { %4628 = vrot.lane.b32.xlu1 %v4627_v20, %s4782_s13  ;;  %4101 = vmatprep.subr.bf16.mxu0 %v4100_v60 }
 0x2bc   : > { %v4354_v1 = vpop.permute.xlu0 %4353 }
 0x2bd   : > { %v4356_v11 = vunpack.i.h.bf16 %v4354_v1  ;;  %v4355_v10 = vunpack.i.l.bf16 %v4354_v1  ;;  %v5611_v17 = vpop.permute.xlu1 %4378 }
 0x2bf   : > { %v1189_v55 = vsel %vm1188_vm8, %v4355_v10, %v4340_v0  ;;  %v1191_v46 = vsel %vm1188_vm8, %v4356_v11, %v4370_v5  ;;  %v4281_v0 = vunpack.i.h.bf16 %v5378_v44  ;;  %v4280_v5 = vunpack.i.l.bf16 %v5378_v44 }
 0x2c0   : > { %v5615_v47 = vpop.permute.xlu0 %4358  ;;  %v4102_v41 = vpack.c.bf16 %v1191_v46, %v1189_v55  ;;  %v4286_v11 = vunpack.i.h.bf16 %v5370_v50  ;;  %v4285_v46 = vunpack.i.l.bf16 %v5370_v50  ;;  %v4295_v50 = vunpack.i.l.bf16 %v5387_v48 }
 0x2c1   : > { %v4384_v21 = vpop.permute.xlu1 %4383  ;;  %v4360_v25 = vunpack.i.l.bf16 %v5615_v47 }
 0x2c2   : > { %4103 = vmatpush1.bf16.msra.mxu0 %v4102_v41  ;;  %v4386_v61 = vunpack.i.h.bf16 %v4384_v21  ;;  %v4385_v38 = vunpack.i.l.bf16 %v4384_v21 }
 0x2c4   : > { %v5617_v19 = vpop.permute.xlu0 %4363  ;;  %v1194_v10 = vsel %vm1188_vm8, %v4385_v38, %v4386_v61 }
 0x2c5   : > { %v5619_v37 = vpop.permute.xlu1 %4388 }
 0x2c8   : > { %v4414_v2 = vpop.permute.xlu0 %4413 }
 0x2c9   : > { %v4416_v20 = vunpack.i.h.bf16 %v4414_v2  ;;  %v4415_v60 = vunpack.i.l.bf16 %v4414_v2  ;;  %v5621_v1 = vpop.permute.xlu1 %4393  ;;  %v4290_v2 = vunpack.i.l.bf16 %v5392_v6 }
 0x2cb   : > { %v1196_v55 = vsel %vm1188_vm8, %v4415_v60, %v4416_v20  ;;  %v1198_v20 = vsel %vm1188_vm8, %v4280_v5, %v4281_v0  ;;  %v1199_v0 = vsel %vm1188_vm8, %v4291_v16, %v4285_v46 }
 0x2cc   : > { %v5629_v41 = vpop.permute.xlu0 %4418  ;;  %v4104_v21 = vpack.c.bf16 %v1196_v55, %v1194_v10  ;;  %v1200_v10 = vsel %vm1188_vm8, %v4285_v46, %v4286_v11  ;;  %v1202_v11 = vsel %vm1188_vm8, %v4295_v50, %v4296_v7  ;;  %v4361_v7 = vunpack.i.h.bf16 %v5615_v47 }
 0x2cd   : > { %v4399_v44 = vpop.permute.xlu1 %4398  ;;  %v4112_v46 = vpack.c.bf16 %v1204_v43, %v1202_v11  ;;  %v4321_v43 = vunpack.i.h.bf16 %v5482_v54  ;;  %v4315_v11 = vunpack.i.l.bf16 %v5446_v26 }
 0x2ce   : > { %v4401_v49 = vunpack.i.h.bf16 %v4399_v44  ;;  %v4400_v61 = vunpack.i.l.bf16 %v4399_v44  ;;  %4105 = vmatprep.subr.bf16.mxu0 %v4104_v21  ;;  %v1197_v44 = vsel %vm1188_vm8, %v4290_v2, %v4280_v5  ;;  %v4108_v21 = vpack.c.bf16 %v1200_v10, %v1198_v20 }
 0x2cf   : > { %v4110_v16 = vpack.c.bf16 %v1199_v0, %v1197_v44  ;;  %v1201_v2 = vsel %vm1188_vm8, %v4305_v9, %v4295_v50  ;;  %v4390_v20 = vunpack.i.l.bf16 %v5619_v37 }
 0x2d0   : > { %v5639_v55 = vpop.permute.xlu0 %4428  ;;  %v1193_v6 = vsel %vm1188_vm8, %v4400_v61, %v4385_v38  ;;  %v1195_v4 = vsel %vm1188_vm8, %v4401_v49, %v4415_v60  ;;  %v4376_v38 = vunpack.i.h.bf16 %v5608_v31  ;;  %v4375_v49 = vunpack.i.l.bf16 %v5608_v31 }
 0x2d1   : > { %v5645_v42 = vpop.permute.xlu1 %4403  ;;  %v4106_v48 = vpack.c.bf16 %v1195_v4, %v1193_v6  ;;  %v4346_v4 = vunpack.i.h.bf16 %v5596_v30  ;;  %v1203_v31 = vsel %vm1188_vm8, %v4306_v40, %v4300_v3  ;;  %v4391_v61 = vunpack.i.h.bf16 %v5619_v37 }
 0x2d2   : > { %v1297_v10 = vsel %vm1293_vm9, %v4375_v49, %v4376_v38  ;;  %v4311_v30 = vunpack.i.h.bf16 %v5459_v32  ;;  %v4310_v6 = vunpack.i.l.bf16 %v5459_v32  ;;  %v4114_v3 = vpack.c.bf16 %v1203_v31, %v1201_v2 }
 0x2d3   : > { %4107 = vmatpush1.bf16.msra.mxu0 %v4106_v48  ;;  %v1295_v50 = vsel %vm1293_vm9, %v4345_v58, %v4346_v4  ;;  %v4320_v37 = vunpack.i.l.bf16 %v5482_v54  ;;  %v1296_v0 = vsel %vm1293_vm9, %v4361_v7, %v4375_v49  ;;  %v4316_v32 = vunpack.i.h.bf16 %v5446_v26 }
 0x2d4   : > { %4109 = vmatprep.subr.bf16.mxu0 %v4108_v21  ;;  %v5653_v60 = vpop.permute.xlu0 %4438  ;;  %v4116_v40 = vpack.c.bf16 %v1297_v10, %v1295_v50  ;;  %v1294_v21 = vsel %vm1293_vm9, %v4360_v25, %v4345_v58  ;;  %v1299_v38 = vsel %vm1293_vm9, %v4390_v20, %v4391_v61  ;;  %v4406_v4 = vunpack.i.h.bf16 %v5645_v42 }
 0x2d5   : > { %v5657_v5 = vpop.permute.xlu1 %4408  ;;  %v4405_v54 = vunpack.i.l.bf16 %v5645_v42  ;;  %v4330_v49 = vunpack.i.l.bf16 %v5502_v36  ;;  %v4326_v7 = vunpack.i.h.bf16 %v5477_v12  ;;  %v4325_v26 = vunpack.i.l.bf16 %v5477_v12 }
 0x2d6   : > { %v4118_v31 = vpack.c.bf16 %v1296_v0, %v1294_v21  ;;  %v4336_v61 = vunpack.i.h.bf16 %v5494_v23  ;;  %v4335_v10 = vunpack.i.l.bf16 %v5494_v23  ;;  %v1303_v42 = vsel %vm1293_vm9, %v4310_v6, %v4311_v30 }
 0x2d7   : > { %4111 = vmatpush1.bf16.msra.mxu0 %v4110_v16  ;;  %v1302_v12 = vsel %vm1293_vm9, %v4320_v37, %v4310_v6  ;;  %v1304_v21 = vsel %vm1293_vm9, %v4321_v43, %v4315_v11  ;;  %v1307_v23 = vsel %vm1293_vm9, %v4325_v26, %v4326_v7  ;;  %v4381_v6 = vunpack.i.h.bf16 %v5611_v17 }
 0x2d8   : > { %4113 = vmatprep.subr.bf16.mxu0 %v4112_v46  ;;  %v4449_v48 = vpop.permute.xlu0 %4448  ;;  %v4331_v46 = vunpack.i.h.bf16 %v5502_v36  ;;  %v1306_v30 = vsel %vm1293_vm9, %v4335_v10, %v4325_v26  ;;  %v4380_v37 = vunpack.i.l.bf16 %v5611_v17 }
 0x2d9   : > { %v4451_v47 = vunpack.i.h.bf16 %v4449_v48  ;;  %v4450_v44 = vunpack.i.l.bf16 %v4449_v48  ;;  %v5669_v9 = vpop.permute.xlu1 %4423 }
 0x2db   : > { %4115 = vmatpush1.bf16.msra.mxu0 %v4114_v3  ;;  %v1301_v16 = vsel %vm1293_vm9, %v4450_v44, %v4451_v47  ;;  %v1300_v48 = vsel %vm1293_vm9, %v4406_v4, %v4450_v44  ;;  %v1305_v47 = vsel %vm1293_vm9, %v4315_v11, %v4316_v32  ;;  %v1298_v3 = vsel %vm1293_vm9, %v4405_v54, %v4390_v20 }
 0x2dc   : > { %4117 = vmatprep.subr.bf16.mxu0 %v4116_v40  ;;  %v5682_v2 = vpop.permute.xlu0 %1083  ;;  %v4120_v58 = vpack.c.bf16 %v1301_v16, %v1299_v38  ;;  %v4122_v40 = vpack.c.bf16 %v1300_v48, %v1298_v3  ;;  %v1309_v44 = vsel %vm1293_vm9, %v4330_v49, %v4331_v46  ;;  %v4124_v0 = vpack.c.bf16 %v1305_v47, %v1303_v42 }
 0x2dd   : > { %v5687_v25 = vpop.permute.xlu1 %4433  ;;  %v1308_v32 = vsel %vm1293_vm9, %v4336_v61, %v4330_v49  ;;  %v4351_v38 = vunpack.i.h.bf16 %v5604_v29  ;;  %v4350_v20 = vunpack.i.l.bf16 %v5604_v29  ;;  %v4126_v11 = vpack.c.bf16 %v1304_v21, %v1302_v12 }
 0x2de   : > { %v4128_v16 = vpack.c.bf16 %v1309_v44, %v1307_v23  ;;  %v4366_v46 = vunpack.i.h.bf16 %v5617_v19  ;;  %v4365_v4 = vunpack.i.l.bf16 %v5617_v19  ;;  %v4396_v54 = vunpack.i.h.bf16 %v5621_v1 }
 0x2df   : > { %4119 = vmatpush1.bf16.msra.mxu0 %v4118_v31  ;;  %v4130_v29 = vpack.c.bf16 %v1308_v32, %v1306_v30  ;;  %v4395_v49 = vunpack.i.l.bf16 %v5621_v1  ;;  %v1400_v1 = vsel %vm1398_vm11, %v4350_v20, %v4351_v38  ;;  %v1402_v61 = vsel %vm1398_vm11, %v4380_v37, %v4381_v6 }
 0x2e0   : > { %4121 = vmatprep.subr.bf16.mxu0 %v4120_v58  ;;  %v5694_v36 = vpop.permute.xlu0 %4453  ;;  %v1399_v21 = vsel %vm1398_vm11, %v4365_v4, %v4350_v20  ;;  %v4425_v44 = vunpack.i.l.bf16 %v5669_v9  ;;  %v1098_v38 = vmul.f32 %v5682_v2, %v5229_v57  ;;  %v1101_v20 = vmul.f32 %v5682_v2, %v5232_v39 }
 0x2e1   : > { %v5698_v50 = vpop.permute.xlu1 %4443  ;;  %v1404_v23 = vsel %vm1398_vm11, %v4395_v49, %v4396_v54  ;;  %v4431_v57 = vunpack.i.h.bf16 %v5639_v55  ;;  %v4430_v39 = vunpack.i.l.bf16 %v5639_v55 }
 0x2e3   : > { %4123 = vmatpush1.bf16.msra.mxu0 %v4122_v40  ;;  %v4132_v40 = vpack.c.bf16 %v1402_v61, %v1400_v1  ;;  %v4441_v61 = vunpack.i.h.bf16 %v5653_v60 }
 0x2e4   : > { %4125 = vmatprep.subr.bf16.mxu0 %v4124_v0  ;;  %v5709_v43 = vpop.permute.xlu0 %4463  ;;  %v4411_v0 = vunpack.i.h.bf16 %v5657_v5 }
 0x2e5   : > { %v5714_v58 = vpop.permute.xlu1 %1085 }
 0x2e6   : > { %v5720_v17 = vsel %vm1087_vm10, %v5682_v2, %v5714_v58  ;;  %v1097_v7 = vmul.f32 %v5714_v58, %v5200_v45  ;;  %v1094_v26 = vmul.f32 %v5714_v58, %v5174_v52  ;;  %v1100_v45 = vmul.f32 %v5714_v58, %v5259_v59 }
 0x2e7   : > { %4127 = vmatpush1.bf16.msra.mxu0 %v4126_v11  ;;  %v1096_v19 = vmul.f32 %v5720_v17, %v5197_v35  ;;  %v1093_v31 = vmul.f32 %v5720_v17, %v5171_v51  ;;  %v1099_v48 = vmul.f32 %v5720_v17, %v5238_v62  ;;  %v1092_v52 = vmul.f32 %v5682_v2, %v5190_v18 }
 0x2e8   : > { %4129 = vmatprep.subr.bf16.mxu0 %v4128_v16  ;;  %v4479_v10 = vpop.permute.xlu0 %4478  ;;  %v1095_v35 = vmul.f32 %v5682_v2, %v5177_v53  ;;  %v1401_v62 = vsel %vm1398_vm11, %v4366_v46, %v4380_v37  ;;  %v4410_v59 = vunpack.i.l.bf16 %v5657_v5  ;;  %v4426_v18 = vunpack.i.h.bf16 %v5669_v9 }
 0x2e9   : > { %v4481_v42 = vunpack.i.h.bf16 %v4479_v10  ;;  %v4480_v51 = vunpack.i.l.bf16 %v4479_v10  ;;  %v5740_v47 = vpop.permute.xlu1 %4458  ;;  %v4642_v3 = vpack.i.bf16 %v1097_v7, %v1096_v19  ;;  %v4637_v12 = vpack.i.bf16 %v1094_v26, %v1093_v31 }
 0x2ea   : > { %v4647_v32 = vpack.i.bf16 %v1095_v35, %v1092_v52  ;;  %v4652_v6 = vpack.i.bf16 %v1100_v45, %v1099_v48  ;;  %v1105_v11 = vmul.f32 %v5720_v17, %v5023_v15  ;;  %v1106_v5 = vmul.f32 %v5714_v58, %v5020_v14 }
 0x2eb   : > { %4643 = vrot.lane.b32.xlu1 %v4642_v3, %s4783_s14  ;;  %4638 = vrot.lane.b32.xlu0 %v4637_v12, %s4783_s14  ;;  %v1406_v53 = vsel %vm1398_vm11, %v4480_v51, %v4481_v42  ;;  %v4421_v16 = vunpack.i.h.bf16 %v5629_v41  ;;  %v4420_v46 = vunpack.i.l.bf16 %v5629_v41  ;;  %v4134_v4 = vpack.c.bf16 %v1401_v62, %v1399_v21 }
 0x2ec   : > { %4131 = vmatpush1.bf16.msra.mxu0 %v4130_v29  ;;  %v5752_v30 = vpop.permute.xlu0 %4483  ;;  %v4136_v37 = vpack.c.bf16 %v1406_v53, %v1404_v23  ;;  %v1403_v54 = vsel %vm1398_vm11, %v4410_v59, %v4395_v49  ;;  %v1405_v15 = vsel %vm1398_vm11, %v4411_v0, %v4480_v51  ;;  %v1410_v29 = vsel %vm1398_vm11, %v4425_v44, %v4426_v18 }
 0x2ed   : > { %4133 = vmatprep.subr.bf16.mxu0 %v4132_v40  ;;  %v5758_v9 = vpop.permute.xlu1 %4468  ;;  %v4436_v14 = vunpack.i.h.bf16 %v5687_v25  ;;  %v4435_v7 = vunpack.i.l.bf16 %v5687_v25  ;;  %v4657_v26 = vpack.i.bf16 %v1101_v20, %v1098_v38  ;;  %v1108_v55 = vmul.f32 %v5720_v17, %v5063_v28  ;;  %v8074_v20 = vld [vmem:[#allocation21_spill] sm:$0xff] }
 0x2ee   : > { %v4662_v31 = vpack.i.bf16 %v1106_v5, %v1105_v11  ;;  %v1109_v49 = vmul.f32 %v5714_v58, %v5060_v27  ;;  %v1102_v1 = vmul.f32 %v5720_v17, %v5252_v8  ;;  %v1103_v25 = vmul.f32 %v5714_v58, %v5292_v13  ;;  %v5829_v11 = vld [vmem:[%s7870_s8 + $0x8] sm:$0xff] }
 0x2ef   : > { %4653 = vrot.lane.b32.xlu1 %v4652_v6, %s4783_s14  ;;  %4648 = vrot.lane.b32.xlu0 %v4647_v32, %s4783_s14  ;;  %v4440_v10 = vunpack.i.l.bf16 %v5653_v60  ;;  %v4138_v48 = vpack.c.bf16 %v1405_v15, %v1403_v54  ;;  %v1408_v28 = vsel %vm1398_vm11, %v4420_v46, %v4421_v16  ;;  %v4446_v45 = vunpack.i.h.bf16 %v5698_v50  ;;  %v8073_v32 = vld [vmem:[#allocation22_spill] sm:$0xff]  ;;  %v8079_v54 = vld [vmem:[#allocation15_spill] sm:$0xff]  ;;  %v8080_v15 = vld [vmem:[#allocation13_spill] sm:$0xff] }
 0x2f0   : > { %4135 = vmatpush1.bf16.msra.mxu0 %v4134_v4  ;;  %v5775_v41 = vpop.permute.xlu0 %4493  ;;  %v4445_v52 = vunpack.i.l.bf16 %v5698_v50  ;;  %v4140_v27 = vpack.c.bf16 %v1410_v29, %v1408_v28  ;;  %v1409_v8 = vsel %vm1398_vm11, %v4431_v57, %v4425_v44  ;;  %v1407_v35 = vsel %vm1398_vm11, %v4430_v39, %v4420_v46  ;;  %v8078_v57 = vld [vmem:[#allocation23_spill] sm:$0xff] }
 0x2f1   : > { %4137 = vmatprep.subr.bf16.mxu0 %v4136_v37  ;;  %v5779_v19 = vpop.permute.xlu1 %4473  ;;  %v1412_v60 = vsel %vm1398_vm11, %v4435_v7, %v4436_v14  ;;  %v1104_v42 = vmul.f32 %v5682_v2, %v5045_v22  ;;  %v1107_v50 = vmul.f32 %v5682_v2, %v5054_v24  ;;  %v4667_v3 = vpack.i.bf16 %v1109_v49, %v1108_v55  ;;  %v5850_v39 = vld [vmem:[%s7866_s4 + $0x8] sm:$0xff] }
 0x2f2   : > { %v4672_v12 = vpack.i.bf16 %v1103_v25, %v1102_v1  ;;  %v1111_v40 = vmul.f32 %v5720_v17, %v5071_v34  ;;  %v1112_v21 = vmul.f32 %v5714_v58, %v5068_v33  ;;  %v4142_v62 = vpack.c.bf16 %v1409_v8, %v1407_v35 }
 0x2f3   : > { %4658 = vrot.lane.b32.xlu1 %v4657_v26, %s4783_s14  ;;  %4663 = vrot.lane.b32.xlu0 %v4662_v31, %s4783_s14  ;;  %v1414_v23 = vsel %vm1398_vm11, %v4440_v10, %v4441_v61  ;;  %v1411_v24 = vsel %vm1398_vm11, %v4445_v52, %v4435_v7  ;;  %v1413_v59 = vsel %vm1398_vm11, %v4446_v45, %v4440_v10  ;;  %v8082_v7 = vld [vmem:[#allocation20_spill] sm:$0xff]  ;;  %v8083_v26 = vld [vmem:[#allocation18_spill] sm:$0xff]  ;;  %v4461_v1 = vunpack.i.h.bf16 %v5740_v47  ;;  %v8085_v61 = vld [vmem:[#allocation19_spill] sm:$0xff] }
 0x2f4   : > { %4139 = vmatpush1.bf16.msra.mxu0 %v4138_v48  ;;  %v5795_v13 = vpop.permute.xlu0 %4503  ;;  %v4144_v22 = vpack.c.bf16 %v1414_v23, %v1412_v60  ;;  %v1110_v34 = vmul.f32 %v5682_v2, %v5100_v56  ;;  %v1113_v33 = vmul.f32 %v5682_v2, %v5103_v63  ;;  %v4682_v53 = vpack.i.bf16 %v1112_v21, %v1111_v40  ;;  %v8075_v63 = vld [vmem:[#allocation16_spill] sm:$0xff]  ;;  %v8076_v2 = vld [vmem:[#allocation14_spill] sm:$0xff]  ;;  %v8086_v10 = vld [vmem:[#allocation17_spill] sm:$0xff] }
 0x2f5   : > { %4141 = vmatprep.subr.bf16.mxu0 %v4140_v27  ;;  %v5803_v51 = vpop.permute.xlu1 %4488  ;;  %v4677_v0 = vpack.i.bf16 %v1107_v50, %v1104_v42  ;;  %v1114_v38 = vmul.f32 %v5720_v17, %v8073_v32  ;;  %v1115_v6 = vmul.f32 %v5714_v58, %v8074_v20  ;;  %v4146_v37 = vpack.c.bf16 %v1413_v59, %v1411_v24  ;;  %v411_v31 = vld [vmem:[%s7866_s4] sm:$0xff]  ;;  %v8090_v23 = vld [vmem:[#allocation5_spill] sm:$0xff] }
 0x2f6   : > { %v8077_v5 = vpack.c.bf16 %v8075_v63, %v8076_v2  ;;  %v4692_v58 = vpack.i.bf16 %v1113_v33, %v1110_v34  ;;  %v1855_v46 = vcombine.high %v5829_v11, %v5829_v11  ;;  %v8081_v29 = vpack.c.bf16 %v8079_v54, %v8080_v15  ;;  %v8088_v45 = vld [vmem:[#allocation2_spill] sm:$0xff] }
 0x2f7   : > { %4668 = vrot.lane.b32.xlu1 %v4667_v3, %s4783_s14  ;;  %4673 = vrot.lane.b32.xlu0 %v4672_v12, %s4783_s14  ;;  %v4687_v16 = vpack.i.bf16 %v1115_v6, %v1114_v38  ;;  %v8084_v55 = vpack.c.bf16 %v8082_v7, %v8083_v26  ;;  %v4460_v25 = vunpack.i.l.bf16 %v5740_v47  ;;  %v8087_v48 = vpack.c.bf16 %v8085_v61, %v8086_v10  ;;  %v5877_v52 = vld [vmem:[%s7866_s4 + $0x20] sm:$0xff]  ;;  %v8089_v3 = vld [vmem:[#allocation3_spill] sm:$0xff]  ;;  %v8092_v6 = vld [vmem:[#allocation8_spill] sm:$0xff] }
 0x2f8   : > { %4143 = vmatpush1.bf16.msra.mxu0 %v4142_v62  ;;  %v5814_v18 = vpop.permute.xlu0 %4513  ;;  %v4456_v27 = vunpack.i.h.bf16 %v5694_v36  ;;  %v4455_v8 = vunpack.i.l.bf16 %v5694_v36  ;;  %v4784_v35 = vmov 1   ;;  %v4465_v47 = vunpack.i.l.bf16 %v5709_v43 }
 0x2f9   : > { %4145 = vmatprep.subr.bf16.mxu0 %v4144_v22  ;;  %v5820_v44 = vpop.permute.xlu1 %4498  ;;  %v4471_v60 = vunpack.i.h.bf16 %v5758_v9  ;;  %v4470_v50 = vunpack.i.l.bf16 %v5758_v9  ;;  %v1507_v36 = vsel %vm1503_vm12, %v4460_v25, %v4461_v1  ;;  %v4466_v62 = vunpack.i.h.bf16 %v5709_v43  ;;  %v5895_v22 = vld [vmem:[%s7866_s4 + $0x10] sm:$0xff]  ;;  %v5900_v9 = vld [vmem:[%s7867_s5] sm:$0xff] }
 0x2fa   : > { %v1505_v24 = vsel %vm1503_vm12, %v4455_v8, %v4456_v27  ;;  %v4491_v34 = vunpack.i.h.bf16 %v5803_v51  ;;  %v4490_v33 = vunpack.i.l.bf16 %v5803_v51  ;;  %v1504_v38 = vsel %vm1503_vm12, %v4465_v47, %v4455_v8 }
 0x2fb   : > { %4683 = vrot.lane.b32.xlu1 %v4682_v53, %s4783_s14  ;;  %4678 = vrot.lane.b32.xlu0 %v4677_v0, %s4783_s14  ;;  %v1506_v43 = vsel %vm1503_vm12, %v4466_v62, %v4460_v25  ;;  %v8091_v53 = vmov 0   ;;  %v4164_v0 = vpack.c.bf16 %v1507_v36, %v1505_v24  ;;  %v4486_v20 = vunpack.i.h.bf16 %v5752_v30 }
 0x2fc   : > { %4147 = vmatpush1.bf16.msra.mxu0 %v4146_v37  ;;  %v5833_v56 = vpop.permute.xlu0 %4523  ;;  %v1509_v63 = vsel %vm1503_vm12, %v4470_v50, %v4471_v60  ;;  %v4485_v2 = vunpack.i.l.bf16 %v5752_v30  ;;  %v4476_v51 = vunpack.i.h.bf16 %v5779_v19  ;;  %v4496_v15 = vunpack.i.h.bf16 %v5775_v41 }
 0x2fd   : > { %4149 = vmatprep.subr.bf16.mxu0 %v8077_v5  ;;  %v5838_v17 = vpop.permute.xlu1 %4508  ;;  %v4475_v5 = vunpack.i.l.bf16 %v5779_v19  ;;  %v1515_v19 = vsel %vm1503_vm12, %v4490_v33, %v4491_v34  ;;  %v4501_v7 = vunpack.i.h.bf16 %v5820_v44  ;;  %v4500_v26 = vunpack.i.l.bf16 %v5820_v44 }
 0x2fe   : > { %v4506_v1 = vunpack.i.h.bf16 %v5795_v13  ;;  %v4505_v25 = vunpack.i.l.bf16 %v5795_v13  ;;  %v1513_v61 = vsel %vm1503_vm12, %v4485_v2, %v4486_v20  ;;  %v1514_v44 = vsel %vm1503_vm12, %v4496_v15, %v4490_v33 }
 0x2ff   : > { %4693 = vrot.lane.b32.xlu1 %v4692_v58, %s4783_s14  ;;  %4688 = vrot.lane.b32.xlu0 %v4687_v16, %s4783_s14  ;;  %v414_v16 = vld [vmem:[%s7866_s4 + $0x18] sm:$0xff]  ;;  %v4511_v27 = vunpack.i.h.bf16 %v5838_v17  ;;  %v4510_v8 = vunpack.i.l.bf16 %v5838_v17  ;;  %v4515_v36 = vunpack.i.l.bf16 %v5814_v18  ;;  %v4525_v62 = vunpack.i.l.bf16 %v5833_v56 }
 0x300   : > { %1925 = vmatmul.mubr.f32.vlgmr.msra.gmra.mrb[0].mxu0 %v8078_v57  ;;  %v5845_v4 = vpop.permute.xlu0 %4538  ;;  %v4166_v57 = vpack.c.bf16 %v1506_v43, %v1504_v38 }
 0x301   : > { %4151 = vmatpush1.bf16.msra.mxu0 %v8081_v29  ;;  %v5855_v14 = vpop.permute.xlu1 %4518  ;;  %1995 = vmatprep.mubr.f32.mxu0 %v1855_v46  ;;  %v5927_v46 = vld [vmem:[%s7867_s5 + $0x20] sm:$0xff]  ;;  %v4495_v29 = vunpack.i.l.bf16 %v5775_v41  ;;  %v1516_v43 = vsel %vm1503_vm12, %v4510_v8, %v4500_v26 }
 0x302   : > { %4153 = vmatprep.subr.bf16.mxu0 %v8084_v55  ;;  %v5947_v41 = vld [vmem:[%s7867_s5 + $0x40] sm:$0xff]  ;;  %v4521_v13 = vunpack.i.h.bf16 %v5855_v14  ;;  %v4520_v47 = vunpack.i.l.bf16 %v5855_v14  ;;  %v1519_v14 = vsel %vm1503_vm12, %v4505_v25, %v4506_v1 }
 0x303   : > { %2126 = vperm.xlu1 %4698, %v5850_v39   ;;  %2121 = vperm.xlu0 %4697, %v411_v31   ;;  %v1512_v17 = vsel %vm1503_vm12, %v4495_v29, %v4485_v2 }
 0x304   : > { %v5864_v49 = vpop.permute.xlu0 %4548  ;;  %v4174_v24 = vpack.c.bf16 %v1514_v44, %v1512_v17  ;;  %v1612_v38 = vsel %vm1608_vm13, %v4520_v47, %v4521_v13 }
 0x305   : > { %4155 = vmatpush1.bf16.msra.mxu0 %v8087_v48  ;;  %v5871_v28 = vpop.permute.xlu1 %4528  ;;  %v4172_v48 = vpack.c.bf16 %v1515_v19, %v1513_v61  ;;  %v4540_v61 = vunpack.i.l.bf16 %v5845_v4 }
 0x306   : > { %4157 = vmatprep.subr.bf16.mxu0 %v8088_v45  ;;  %v4531_v20 = vunpack.i.h.bf16 %v5871_v28 }
 0x307   : > { %4699 = vset.pattern.permute.xlu1 %v4784_v35  ;;  %2141 = vperm.xlu0 %4697, %v5877_v52  }
 0x308   : > { %2235 = vperm.xlu1 %4699, %v411_v31   ;;  %v4559_v42 = vpop.permute.xlu0 %4558  ;;  %v1508_v31 = vsel %vm1503_vm12, %v4475_v5, %v4470_v50 }
 0x309   : > { %4159 = vmatpush1.bf16.msra.mxu0 %v8089_v3  ;;  %v4561_v12 = vunpack.i.h.bf16 %v4559_v42  ;;  %v4560_v40 = vunpack.i.l.bf16 %v4559_v42  ;;  %v5887_v21 = vpop.permute.xlu1 %4533  ;;  %v5960_v42 = vld [vmem:[%s7867_s5 + $0x60] sm:$0xff] }
 0x30a   : > { %4161 = vmatprep.subr.bf16.mxu0 %v8090_v23  ;;  %v4535_v44 = vunpack.i.l.bf16 %v5887_v21 }
 0x30b   : > { %v1511_v59 = vsel %vm1503_vm12, %v4560_v40, %v4561_v12  ;;  %2438 = vperm.xlu0 %4697, %v5900_v9   ;;  %v1510_v30 = vsel %vm1503_vm12, %v4476_v51, %v4560_v40  ;;  %v1517_v12 = vsel %vm1503_vm12, %v4500_v26, %v4501_v7  ;;  %v4516_v40 = vunpack.i.h.bf16 %v5814_v18  ;;  %v5983_v18 = vld [vmem:[%s7867_s5 + $0x80] sm:$0xff] }
 0x30c   : > { %4700 = vset.pattern.permute.xlu1 %v8091_v53  ;;  %v5909_v32 = vpop.permute.xlu0 %4563  ;;  %v4168_v58 = vpack.c.bf16 %v1511_v59, %v1509_v63  ;;  %v4170_v10 = vpack.c.bf16 %v1510_v30, %v1508_v31  ;;  %v1518_v59 = vsel %vm1503_vm12, %v4511_v27, %v4505_v25  ;;  %v4176_v34 = vpack.c.bf16 %v1519_v14, %v1517_v12  ;;  %v6003_v7 = vld [vmem:[%s7867_s5 + $0xa0] sm:$0xff] }
 0x30d   : > { %4163 = vmatpush1.bf16.msra.mxu0 %v8092_v6  ;;  %2131 = vperm.xlu1 %4700, %v5895_v22   ;;  %v5915_v37 = vpop.permute.xlu1 %4543  ;;  %v4530_v63 = vunpack.i.l.bf16 %v5871_v28  ;;  %v1609_v26 = vsel %vm1608_vm13, %v4525_v62, %v4515_v36  ;;  %v4541_v31 = vunpack.i.h.bf16 %v5845_v4  ;;  %v6023_v4 = vld [vmem:[%s7867_s5 + $0xc0] sm:$0xff]  ;;  %v6037_v62 = vld [vmem:[%s7866_s4 + $0x30] sm:$0xff] }
 0x30e   : > { %4165 = vmatprep.subr.bf16.mxu0 %v4164_v0  ;;  %v5977_v0 = vld [vmem:[%s7866_s4 + $0x28] sm:$0xff]  ;;  %v4546_v19 = vunpack.i.h.bf16 %v5915_v37  ;;  %v4545_v15 = vunpack.i.l.bf16 %v5915_v37  ;;  %v4536_v37 = vunpack.i.h.bf16 %v5887_v21  ;;  %v4551_v21 = vunpack.i.h.bf16 %v5864_v49 }
 0x30f   : > { %2458 = vperm.xlu0 %4697, %v5927_v46   ;;  %v1614_v25 = vsel %vm1608_vm13, %v4530_v63, %v4531_v20  ;;  %v1613_v14 = vsel %vm1608_vm13, %v4535_v44, %v4530_v63 }
 0x310   : > { %v5931_v54 = vpop.permute.xlu0 %4573  ;;  %v1620_v13 = vsel %vm1608_vm13, %v4545_v15, %v4546_v19 }
 0x311   : > { %4167 = vmatpush1.bf16.msra.mxu0 %v4166_v57  ;;  %2136 = vperm.xlu1 %4700, %v414_v16   ;;  %v5938_v55 = vpop.permute.xlu1 %4553  ;;  %v1610_v57 = vsel %vm1608_vm13, %v4515_v36, %v4516_v40  ;;  %v4566_v40 = vunpack.i.h.bf16 %v5909_v32  ;;  %v1618_v36 = vsel %vm1608_vm13, %v4540_v61, %v4541_v31 }
 0x312   : > { %4169 = vmatprep.subr.bf16.mxu0 %v4168_v58  ;;  %v4526_v58 = vunpack.i.h.bf16 %v5833_v56  ;;  %v4180_v29 = vpack.c.bf16 %v1612_v38, %v1610_v57  ;;  %v4555_v12 = vunpack.i.l.bf16 %v5938_v55 }
 0x313   : > { %2478 = vperm.xlu0 %4697, %v5947_v41  }
 0x314   : > { %v5955_v60 = vpop.permute.xlu0 %4583  ;;  %v1611_v28 = vsel %vm1608_vm13, %v4526_v58, %v4520_v47  ;;  %v4556_v47 = vunpack.i.h.bf16 %v5938_v55  ;;  %v1619_v55 = vsel %vm1608_vm13, %v4551_v21, %v4545_v15  ;;  %v4575_v58 = vunpack.i.l.bf16 %v5931_v54 }
 0x315   : > { %4171 = vmatpush1.bf16.msra.mxu0 %v4170_v10  ;;  %4701 = vset.pattern.permute.xlu1 %v4784_v35  ;;  %v5963_v50 = vpop.permute.xlu1 %4568 }
 0x316   : > { %4173 = vmatprep.subr.bf16.mxu0 %v4172_v48  ;;  %2247 = vperm.xlu1 %4701, %v414_v16   ;;  %v4178_v16 = vpack.c.bf16 %v1518_v59, %v1516_v43  ;;  %v4182_v48 = vpack.c.bf16 %v1611_v28, %v1609_v26  ;;  %v4188_v43 = vpack.c.bf16 %v1620_v13, %v1618_v36 }
 0x317   : > { %2498 = vperm.xlu0 %4697, %v5960_v42  }
 0x318   : > { %v4599_v33 = vpop.permute.xlu0 %4598 }
 0x319   : > { %4175 = vmatpush1.bf16.msra.mxu0 %v4174_v24  ;;  %v4601_v2 = vunpack.i.h.bf16 %v4599_v33  ;;  %v4600_v51 = vunpack.i.l.bf16 %v4599_v33  ;;  %v5987_v5 = vpop.permute.xlu1 %4578  ;;  %v4565_v24 = vunpack.i.l.bf16 %v5909_v32  ;;  %v6052_v32 = vld [vmem:[%s7867_s5 + $0xe0] sm:$0xff] }
 0x31a   : > { %4177 = vmatprep.subr.bf16.mxu0 %v4176_v34  ;;  %4702 = vset.pattern.permute.xlu1 %v8091_v53  ;;  %v4570_v34 = vunpack.i.l.bf16 %v5963_v50  ;;  %v4581_v33 = vunpack.i.h.bf16 %v5987_v5  ;;  %v4580_v38 = vunpack.i.l.bf16 %v5987_v5  ;;  %v4576_v5 = vunpack.i.h.bf16 %v5931_v54 }
 0x31b   : > { %2146 = vperm.xlu1 %4702, %v5977_v0   ;;  %v1616_v30 = vsel %vm1608_vm13, %v4600_v51, %v4601_v2  ;;  %2518 = vperm.xlu0 %4697, %v5983_v18   ;;  %v1615_v27 = vsel %vm1608_vm13, %v4536_v37, %v4600_v51  ;;  %v418_v51 = vld [vmem:[%s7866_s4 + $0x38] sm:$0xff]  ;;  %v1624_v57 = vsel %vm1608_vm13, %v4565_v24, %v4566_v40  ;;  %v4585_v37 = vunpack.i.l.bf16 %v5955_v60 }
 0x31c   : > { %v5998_v56 = vpop.permute.xlu0 %4603  ;;  %v4184_v10 = vpack.c.bf16 %v1616_v30, %v1614_v25  ;;  %v4186_v59 = vpack.c.bf16 %v1615_v27, %v1613_v14  ;;  %v1621_v28 = vsel %vm1608_vm13, %v4570_v34, %v4555_v12 }
 0x31d   : > { %4179 = vmatpush1.bf16.msra.mxu0 %v4178_v16  ;;  %v6007_v1 = vpop.permute.xlu1 %4588  ;;  %v4605_v36 = vunpack.i.l.bf16 %v5998_v56 }
 0x31e   : > { %4181 = vmatprep.subr.bf16.mxu0 %v4180_v29  ;;  %v1717_v29 = vsel %vm1713_vm14, %v4580_v38, %v4581_v33  ;;  %v4591_v26 = vunpack.i.h.bf16 %v6007_v1  ;;  %v4590_v31 = vunpack.i.l.bf16 %v6007_v1 }
 0x31f   : > { %4703 = vset.pattern.permute.xlu1 %v4784_v35  ;;  %2538 = vperm.xlu0 %4697, %v6003_v7  }
 0x320   : > { %2251 = vperm.xlu1 %4703, %v5877_v52   ;;  %v6017_v8 = vpop.permute.xlu0 %4613  ;;  %v4550_v52 = vunpack.i.l.bf16 %v5864_v49  ;;  %v4571_v49 = vunpack.i.h.bf16 %v5963_v50  ;;  %v1622_v50 = vsel %vm1608_vm13, %v4555_v12, %v4556_v47  ;;  %v1714_v12 = vsel %vm1713_vm14, %v4585_v37, %v4575_v58  ;;  %v6157_v37 = vld [vmem:[%s7867_s5 + $0x88] sm:$0xff] }
 0x321   : > { %4183 = vmatpush1.bf16.msra.mxu0 %v4182_v48  ;;  %v6028_v17 = vpop.permute.xlu1 %4593  ;;  %v4192_v19 = vpack.c.bf16 %v1624_v57, %v1622_v50  ;;  %v1715_v48 = vsel %vm1713_vm14, %v4575_v58, %v4576_v5  ;;  %v4616_v33 = vunpack.i.h.bf16 %v6017_v8 }
 0x322   : > { %4185 = vmatprep.subr.bf16.mxu0 %v4184_v10  ;;  %v1617_v2 = vsel %vm1608_vm13, %v4550_v52, %v4540_v61  ;;  %v1623_v30 = vsel %vm1608_vm13, %v4571_v49, %v4565_v24  ;;  %v4586_v61 = vunpack.i.h.bf16 %v5955_v60  ;;  %v4196_v1 = vpack.c.bf16 %v1717_v29, %v1715_v48 }
 0x323   : > { %2558 = vperm.xlu0 %4697, %v6023_v4   ;;  %v4190_v16 = vpack.c.bf16 %v1619_v55, %v1617_v2  ;;  %v4194_v10 = vpack.c.bf16 %v1623_v30, %v1621_v28  ;;  %v1719_v60 = vsel %vm1713_vm14, %v4590_v31, %v4591_v26  ;;  %v4596_v52 = vunpack.i.h.bf16 %v6028_v17  ;;  %v422_v26 = vld [vmem:[%s7867_s5 + $0x18] sm:$0xff] }
 0x324   : > { %4704 = vset.pattern.permute.xlu1 %v8091_v53  ;;  %v6047_v20 = vpop.permute.xlu0 %4623  ;;  %v1716_v13 = vsel %vm1713_vm14, %v4586_v61, %v4580_v38  ;;  %v4595_v14 = vunpack.i.l.bf16 %v6028_v17  ;;  %v4615_v38 = vunpack.i.l.bf16 %v6017_v8  ;;  %v426_v61 = vld [vmem:[%s7867_s5 + $0x38] sm:$0xff] }
 0x325   : > { %4187 = vmatpush1.bf16.msra.mxu0 %v4186_v59  ;;  %2151 = vperm.xlu1 %4704, %v6037_v62   ;;  %v6055_v63 = vpop.permute.xlu1 %4608  ;;  %v4198_v24 = vpack.c.bf16 %v1716_v13, %v1714_v12  ;;  %v420_v59 = vld [vmem:[%s7867_s5 + $0x8] sm:$0xff]  ;;  %v4625_v50 = vunpack.i.l.bf16 %v6047_v20 }
 0x326   : > { %4189 = vmatprep.subr.bf16.mxu0 %v4188_v43  ;;  %v4611_v21 = vunpack.i.h.bf16 %v6055_v63  ;;  %v4610_v47 = vunpack.i.l.bf16 %v6055_v63  ;;  %v4626_v63 = vunpack.i.h.bf16 %v6047_v20  ;;  %v1722_v57 = vsel %vm1713_vm14, %v4615_v38, %v4605_v36  ;;  %v6182_v38 = vld [vmem:[%s7867_s5 + $0xb0] sm:$0xff] }
 0x327   : > { %2578 = vperm.xlu0 %4697, %v6052_v32  }
 0x328   : > { %v4634_v15 = vpop.permute.xlu0 %4633  ;;  %v1725_v17 = vsel %vm1713_vm14, %v4610_v47, %v4611_v21  ;;  %v1729_v30 = vsel %vm1713_vm14, %v4625_v50, %v4626_v63  ;;  %v6164_v21 = vld [vmem:[%s7867_s5 + $0x90] sm:$0xff] }
 0x329   : > { %4191 = vmatpush1.bf16.msra.mxu0 %v4190_v16  ;;  %v4636_v25 = vunpack.i.h.bf16 %v4634_v15  ;;  %v4635_v54 = vunpack.i.l.bf16 %v4634_v15  ;;  %2156 = vperm.xlu1 %4704, %v418_v51   ;;  %v4619_v44 = vpop.permute.xlu1 %4618 }
 0x32a   : > { %4193 = vmatprep.subr.bf16.mxu0 %v4192_v19  ;;  %v4621_v43 = vunpack.i.h.bf16 %v4619_v44  ;;  %v4620_v49 = vunpack.i.l.bf16 %v4619_v44 }
 0x32b   : > { %v1721_v27 = vsel %vm1713_vm14, %v4635_v54, %v4636_v25  ;;  %4734 = vset.pattern.permute.xlu0 %v4784_v35  ;;  %v1720_v55 = vsel %vm1713_vm14, %v4596_v52, %v4635_v54  ;;  %v6134_v25 = vld [vmem:[%s7867_s5 + $0x50] sm:$0xff]  ;;  %v6141_v54 = vld [vmem:[%s7867_s5 + $0x68] sm:$0xff] }
 0x32c   : > { %2239 = vperm.xlu0 %4734, %v5850_v39   ;;  %v4200_v40 = vpack.c.bf16 %v1721_v27, %v1719_v60  ;;  %v4606_v39 = vunpack.i.h.bf16 %v5998_v56  ;;  %v1718_v56 = vsel %vm1713_vm14, %v4595_v14, %v4590_v31  ;;  %v1727_v8 = vsel %vm1713_vm14, %v4620_v49, %v4621_v43  ;;  %v425_v31 = vld [vmem:[%s7867_s5 + $0x30] sm:$0xff] }
 0x32d   : > { %4195 = vmatpush1.bf16.msra.mxu0 %v4194_v10  ;;  %4705 = vset.pattern.permute.xlu1 %v4784_v35  ;;  %v4629_v34 = vpop.permute.xlu1 %4628  ;;  %v4208_v15 = vpack.c.bf16 %v1729_v30, %v1727_v8 }
 0x32e   : > { %4197 = vmatprep.subr.bf16.mxu0 %v4196_v1  ;;  %2263 = vperm.xlu1 %4705, %v418_v51   ;;  %v1723_v2 = vsel %vm1713_vm14, %v4605_v36, %v4606_v39  ;;  %v1724_v51 = vsel %vm1713_vm14, %v4616_v33, %v4610_v47  ;;  %v4631_v5 = vunpack.i.h.bf16 %v4629_v34  ;;  %v4630_v58 = vunpack.i.l.bf16 %v4629_v34  ;;  %v6173_v36 = vld [vmem:[%s7867_s5 + $0xa8] sm:$0xff] }
 0x32f   : > { %v4204_v16 = vpack.c.bf16 %v1725_v17, %v1723_v2  ;;  %v4206_v20 = vpack.c.bf16 %v1724_v51, %v1722_v57 }
 0x330   : > { %2243 = vperm.xlu0 %4734, %v5895_v22   ;;  %v4202_v22 = vpack.c.bf16 %v1720_v55, %v1718_v56  ;;  %v1728_v28 = vsel %vm1713_vm14, %v4631_v5, %v4625_v50  ;;  %v1726_v19 = vsel %vm1713_vm14, %v4630_v58, %v4620_v49 }
 0x331   : > { %4199 = vmatpush1.bf16.msra.mxu0 %v4198_v24  ;;  %v4210_v29 = vpack.c.bf16 %v1728_v28, %v1726_v19 }
 0x332   : > { %4201 = vmatprep.subr.bf16.mxu0 %v4200_v40  ;;  %4706 = vset.pattern.permute.xlu1 %v8091_v53 }
 0x333   : > { %2443 = vperm.xlu1 %4706, %v420_v59  }
 0x334   : > { %2255 = vperm.xlu0 %4734, %v5977_v0   ;;  %v421_v0 = vld [vmem:[%s7867_s5 + $0x10] sm:$0xff] }
 0x335   : > { %4203 = vmatpush1.bf16.msra.mxu0 %v4202_v22 }
 0x336   : > { %4205 = vmatprep.subr.bf16.mxu0 %v4204_v16 }
 0x337   : > { %4707 = vset.pattern.permute.xlu1 %v4784_v35 }
 0x338   : > { %2864 = vperm.xlu1 %4707, %v5900_v9   ;;  %2259 = vperm.xlu0 %4734, %v6037_v62   ;;  %v8093_v9 = vmov 0.0   ;;  %v424_v62 = vld [vmem:[%s7867_s5 + $0x28] sm:$0xff] }
 0x339   : > { %4207 = vmatpush1.bf16.msra.mxu0 %v4206_v20  ;;  %v6191_v20 = vld [vmem:[%s7867_s5 + $0xc8] sm:$0xff] }
 0x33a   : > { %4209 = vmatprep.subr.bf16.mxu0 %v4208_v15 }
 0x33c   : > { %4708 = vset.pattern.permute.xlu1 %v8091_v53  ;;  %2868 = vperm.xlu0 %4734, %v420_v59  }
 0x33d   : > { %4211 = vmatpush1.bf16.msra.mxu0 %v4210_v29  ;;  %2448 = vperm.xlu1 %4708, %v421_v0  }
 0x340   : > { %1996 = vmatmul.mubr.f32.vlgmr.msra.gmra.mrb[0].mxu0 %v5829_v11  ;;  %2872 = vperm.xlu0 %4734, %v421_v0   ;;  %v428_v11 = vld [vmem:[%s7867_s5 + $0x48] sm:$0xff] }
 0x341   : > { %2453 = vperm.xlu1 %4708, %v422_v26   ;;  %2066 = vmatprep.mubr.f32.mxu0 %v8093_v9 }
 0x344   : > { %2884 = vperm.xlu0 %4734, %v424_v62  }
 0x345   : > { %4709 = vset.pattern.permute.xlu1 %v4784_v35 }
 0x346   : > { %2876 = vperm.xlu1 %4709, %v422_v26  }
 0x348   : > { %2888 = vperm.xlu0 %4734, %v425_v31  }
 0x34a   : > { %4710 = vset.pattern.permute.xlu1 %v8091_v53 }
 0x34b   : > { %2463 = vperm.xlu1 %4710, %v424_v62  }
 0x34c   : > { %2900 = vperm.xlu0 %4734, %v428_v11  }
 0x34f   : > { %4711 = vset.pattern.permute.xlu1 %v4784_v35 }
 0x350   : > { %2880 = vperm.xlu1 %4711, %v5927_v46   ;;  %2904 = vperm.xlu0 %4734, %v6134_v25   ;;  %v6151_v46 = vld [vmem:[%s7867_s5 + $0x70] sm:$0xff] }
 0x354   : > { %4712 = vset.pattern.permute.xlu1 %v8091_v53  ;;  %2916 = vperm.xlu0 %4734, %v6141_v54  }
 0x355   : > { %2468 = vperm.xlu1 %4712, %v425_v31   ;;  %v430_v31 = vld [vmem:[%s7867_s5 + $0x58] sm:$0xff] }
 0x358   : > { %2920 = vperm.xlu0 %4734, %v6151_v46  }
 0x359   : > { %2473 = vperm.xlu1 %4712, %v426_v61  }
 0x35c   : > { %2932 = vperm.xlu0 %4734, %v6157_v37  }
 0x35d   : > { %4713 = vset.pattern.permute.xlu1 %v4784_v35  ;;  %v4639_v44 = vpop.permute.xlu0 %4638  ;;  %v4644_v10 = vpop.permute.xlu1 %4643 }
 0x35e   : > { %v4641_v48 = vunpack.i.h.bf16 %v4639_v44  ;;  %v4640_v27 = vunpack.i.l.bf16 %v4639_v44  ;;  %v4646_v13 = vunpack.i.h.bf16 %v4644_v10  ;;  %v4645_v1 = vunpack.i.l.bf16 %v4644_v10  ;;  %2892 = vperm.xlu1 %4713, %v426_v61  }
 0x360   : > { %v1820_v47 = vsel %vm1818_vm15, %v4640_v27, %v4641_v48  ;;  %v1822_v60 = vsel %vm1818_vm15, %v4645_v1, %v4646_v13  ;;  %2936 = vperm.xlu0 %4734, %v6164_v21   ;;  %v6206_v48 = vld [vmem:[%s7867_s5 + $0xd0] sm:$0xff] }
 0x361   : > { %v4649_v12 = vpop.permute.xlu0 %4648  ;;  %v4654_v52 = vpop.permute.xlu1 %4653  ;;  %v4212_v14 = vpack.c.bf16 %v1822_v60, %v1820_v47 }
 0x362   : > { %v4651_v40 = vunpack.i.h.bf16 %v4649_v12  ;;  %v4650_v39 = vunpack.i.l.bf16 %v4649_v12  ;;  %4714 = vset.pattern.permute.xlu1 %v8091_v53  ;;  %v4656_v34 = vunpack.i.h.bf16 %v4654_v52  ;;  %v4655_v17 = vunpack.i.l.bf16 %v4654_v52 }
 0x363   : > { %2483 = vperm.xlu1 %4714, %v428_v11   ;;  %4213 = vmatprep.subr.bf16.mxu0 %v4212_v14 }
 0x364   : > { %v1819_v24 = vsel %vm1818_vm15, %v4650_v39, %v4640_v27  ;;  %v1821_v55 = vsel %vm1818_vm15, %v4651_v40, %v4645_v1  ;;  %2948 = vperm.xlu0 %4734, %v6173_v36   ;;  %v1824_v57 = vsel %vm1818_vm15, %v4655_v17, %v4656_v34  ;;  %v6215_v39 = vld [vmem:[%s7867_s5 + $0xe8] sm:$0xff]  ;;  %v6225_v34 = vld [vmem:[%s7867_s5 + $0xf0] sm:$0xff] }
 0x365   : > { %v4214_v59 = vpack.c.bf16 %v1821_v55, %v1819_v24  ;;  %v4664_v43 = vpop.permute.xlu0 %4663  ;;  %v4659_v49 = vpop.permute.xlu1 %4658 }
 0x366   : > { %v4660_v33 = vunpack.i.l.bf16 %v4659_v49  ;;  %v4666_v56 = vunpack.i.h.bf16 %v4664_v43  ;;  %v4665_v63 = vunpack.i.l.bf16 %v4664_v43  ;;  %v4661_v50 = vunpack.i.h.bf16 %v4659_v49 }
 0x367   : > { %4715 = vset.pattern.permute.xlu1 %v4784_v35  ;;  %4215 = vmatpush1.bf16.msra.mxu0 %v4214_v59 }
 0x368   : > { %2896 = vperm.xlu1 %4715, %v5947_v41   ;;  %2952 = vperm.xlu0 %4734, %v6182_v38   ;;  %v1823_v8 = vsel %vm1818_vm15, %v4660_v33, %v4655_v17  ;;  %v1828_v11 = vsel %vm1818_vm15, %v4665_v63, %v4666_v56  ;;  %v457_v17 = vld [vmem:[%s7870_s8 + $0x10] sm:$0xf]  ;;  %v434_v33 = vld [vmem:[%s7867_s5 + $0x78] sm:$0xff] }
 0x369   : > { %v4674_v22 = vpop.permute.xlu0 %4673  ;;  %v4669_v2 = vpop.permute.xlu1 %4668  ;;  %v446_v56 = vld [vmem:[%s7867_s5 + $0xd8] sm:$0xff] }
 0x36a   : > { %v4676_v51 = vunpack.i.h.bf16 %v4674_v22  ;;  %v4675_v5 = vunpack.i.l.bf16 %v4674_v22  ;;  %v4671_v58 = vunpack.i.h.bf16 %v4669_v2  ;;  %v4670_v16 = vunpack.i.l.bf16 %v4669_v2  ;;  %v450_v2 = vld [vmem:[%s7867_s5 + $0xf8] sm:$0xff] }
 0x36c   : > { %v1825_v41 = vsel %vm1818_vm15, %v4661_v50, %v4675_v5  ;;  %4716 = vset.pattern.permute.xlu1 %v8091_v53  ;;  %v1826_v30 = vsel %vm1818_vm15, %v4675_v5, %v4676_v51  ;;  %v1830_v28 = vsel %vm1818_vm15, %v4670_v16, %v4671_v58  ;;  %2964 = vperm.xlu0 %4734, %v6191_v20  }
 0x36d   : > { %v4218_v19 = vpack.c.bf16 %v1825_v41, %v1823_v8  ;;  %2488 = vperm.xlu1 %4716, %v6134_v25   ;;  %v4679_v15 = vpop.permute.xlu0 %4678  ;;  %v4684_v0 = vpop.permute.xlu1 %4683  ;;  %v4216_v29 = vpack.c.bf16 %v1826_v30, %v1824_v57  ;;  %v4220_v10 = vpack.c.bf16 %v1830_v28, %v1828_v11 }
 0x36e   : > { %v4681_v26 = vunpack.i.h.bf16 %v4679_v15  ;;  %v4680_v62 = vunpack.i.l.bf16 %v4679_v15  ;;  %v4686_v61 = vunpack.i.h.bf16 %v4684_v0  ;;  %v4685_v44 = vunpack.i.l.bf16 %v4684_v0 }
 0x36f   : > { %4217 = vmatprep.subr.bf16.mxu0 %v4216_v29 }
 0x370   : > { %v1827_v25 = vsel %vm1818_vm15, %v4680_v62, %v4665_v63  ;;  %v1829_v27 = vsel %vm1818_vm15, %v4681_v26, %v4670_v16  ;;  %4219 = vmatpush1.bf16.msra.mxu0 %v4218_v19  ;;  %2968 = vperm.xlu0 %4734, %v6206_v48   ;;  %v1832_v40 = vsel %vm1818_vm15, %v4685_v44, %v4686_v61 }
 0x371   : > { %v4222_v13 = vpack.c.bf16 %v1829_v27, %v1827_v25  ;;  %2493 = vperm.xlu1 %4716, %v430_v31   ;;  %v4689_v1 = vpop.permute.xlu0 %4688  ;;  %v4694_v47 = vpop.permute.xlu1 %4693  ;;  %4221 = vmatprep.subr.bf16.mxu0 %v4220_v10  ;;  %v4785_v25 = vmov 1966171168  }
 0x372   : > { %v4691_v60 = vunpack.i.h.bf16 %v4689_v1  ;;  %v4690_v12 = vunpack.i.l.bf16 %v4689_v1  ;;  %v4696_v52 = vunpack.i.h.bf16 %v4694_v47  ;;  %v4695_v14 = vunpack.i.l.bf16 %v4694_v47 }
 0x373   : > { %v2079_v27 = vunpack.c.l.s4 %v4785_v25 }
 0x374   : > { %v1833_v24 = vsel %vm1818_vm15, %v4696_v52, %v4690_v12  ;;  %v1831_v55 = vsel %vm1818_vm15, %v4695_v14, %v4685_v44  ;;  %4223 = vmatpush1.bf16.msra.mxu0 %v4222_v13  ;;  %v1834_v59 = vsel %vm1818_vm15, %v4690_v12, %v4691_v60  ;;  %2980 = vperm.xlu0 %4734, %v6215_v39  }
 0x375   : > { %4717 = vset.pattern.permute.xlu1 %v4784_v35  ;;  %v4224_v43 = vpack.c.bf16 %v1834_v59, %v1832_v40  ;;  %v4226_v49 = vpack.c.bf16 %v1833_v24, %v1831_v55  ;;  %v2080_v1 = vunpack.c.0.s8 %v2079_v27  ;;  %v8107_v40 = vld [vmem:[#allocation4_spill] sm:$0xff] }
 0x376   : > { %2908 = vperm.xlu1 %4717, %v430_v31  }
 0x377   : > { %4225 = vmatprep.subr.bf16.mxu0 %v4224_v43 }
 0x378   : > { %4227 = vmatpush1.bf16.msra.mxu0 %v4226_v49  ;;  %2984 = vperm.xlu0 %4734, %v6225_v34  }
 0x37a   : > { %4718 = vset.pattern.permute.xlu1 %v8091_v53 }
 0x37b   : > { %2503 = vperm.xlu1 %4718, %v6141_v54   ;;  %3970 = vmatmul.mubr.msk.f32.vlgmr.msra.gmra.mrb[0].mxu0 %vm582_vm1, %v457_v17 }
 0x37c   : > { %4740 = vset.pattern.permute.xlu0 %v8091_v53 }
 0x37f   : > { %4719 = vset.pattern.permute.xlu1 %v4784_v35 }
 0x380   : > { %2912 = vperm.xlu1 %4719, %v5960_v42   ;;  %v438_v42 = vld [vmem:[%s7867_s5 + $0x98] sm:$0xff] }
 0x382   : > { %v6253_v54 = vpop.permute.xlu1 %2126 }
 0x383   : > { %8094 = vst [vmem:[#allocation22_spill] sm:$0xff] %v6253_v54 }
 0x384   : > { %4720 = vset.pattern.permute.xlu1 %v8091_v53 }
 0x385   : > { %2508 = vperm.xlu1 %4720, %v6151_v46  }
 0x387   : > { %v6257_v46 = vpop.permute.xlu1 %2235 }
 0x388   : > { %8095 = vst [vmem:[#allocation21_spill] sm:$0xff] %v6257_v46 }
 0x389   : > { %2513 = vperm.xlu1 %4720, %v434_v33  }
 0x38d   : > { %4721 = vset.pattern.permute.xlu1 %v4784_v35 }
 0x38e   : > { %2924 = vperm.xlu1 %4721, %v434_v33  }
 0x392   : > { %4722 = vset.pattern.permute.xlu1 %v8091_v53 }
 0x393   : > { %2523 = vperm.xlu1 %4722, %v6157_v37   ;;  %v442_v37 = vld [vmem:[%s7867_s5 + $0xb8] sm:$0xff] }
 0x397   : > { %4723 = vset.pattern.permute.xlu1 %v4784_v35 }
 0x398   : > { %2928 = vperm.xlu1 %4723, %v5983_v18   ;;  %v6262_v18 = vpop.permute.xlu1 %2131 }
 0x399   : > { %8096 = vst [vmem:[#allocation16_spill] sm:$0xff] %v6262_v18 }
 0x39c   : > { %4724 = vset.pattern.permute.xlu1 %v8091_v53 }
 0x39d   : > { %2528 = vperm.xlu1 %4724, %v6164_v21   ;;  %v6268_v21 = vpop.permute.xlu1 %2136 }
 0x39e   : > { %8097 = vst [vmem:[#allocation14_spill] sm:$0xff] %v6268_v21 }
 0x3a1   : > { %2533 = vperm.xlu1 %4724, %v438_v42  }
 0x3a5   : > { %4725 = vset.pattern.permute.xlu1 %v4784_v35 }
 0x3a6   : > { %2940 = vperm.xlu1 %4725, %v438_v42   ;;  %v408_v42 = vld [vmem:[%s7865_s3] ss:$2 sm:$0x3] }
 0x3aa   : > { %4726 = vset.pattern.permute.xlu1 %v8091_v53 }
 0x3ab   : > { %2543 = vperm.xlu1 %4726, %v6173_v36   ;;  %v6271_v36 = vpop.permute.xlu1 %2247 }
 0x3ac   : > { %8098 = vst [vmem:[#allocation23_spill] sm:$0xff] %v6271_v36 }
 0x3af   : > { %4727 = vset.pattern.permute.xlu1 %v4784_v35 }
 0x3b0   : > { %2944 = vperm.xlu1 %4727, %v6003_v7   ;;  %v6275_v7 = vpop.permute.xlu1 %2146 }
 0x3b1   : > { %8099 = vst [vmem:[#allocation15_spill] sm:$0xff] %v6275_v7 }
 0x3b4   : > { %4728 = vset.pattern.permute.xlu1 %v8091_v53 }
 0x3b5   : > { %2548 = vperm.xlu1 %4728, %v6182_v38   ;;  %v6280_v38 = vpop.permute.xlu1 %2251 }
 0x3b6   : > { %8100 = vst [vmem:[#allocation13_spill] sm:$0xff] %v6280_v38  ;;  %v3954_v38 = vld [vmem:[%s7865_s3 + $0x1] ss:$2 sm:$0x3] }
 0x3b9   : > { %2553 = vperm.xlu1 %4728, %v442_v37   ;;  %v6286_v63 = vpop.permute.xlu1 %2151 }
 0x3ba   : > { %8101 = vst [vmem:[#allocation20_spill] sm:$0xff] %v6286_v63 }
 0x3bd   : > { %4729 = vset.pattern.permute.xlu1 %v4784_v35  ;;  %v6289_v50 = vpop.permute.xlu1 %2156 }
 0x3be   : > { %2956 = vperm.xlu1 %4729, %v442_v37   ;;  %8102 = vst [vmem:[#allocation18_spill] sm:$0xff] %v6289_v50 }
 0x3c2   : > { %4730 = vset.pattern.permute.xlu1 %v8091_v53 }
 0x3c3   : > { %2563 = vperm.xlu1 %4730, %v6191_v20  }
 0x3c7   : > { %4731 = vset.pattern.permute.xlu1 %v4784_v35 }
 0x3c8   : > { %2960 = vperm.xlu1 %4731, %v6023_v4   ;;  %v6293_v4 = vpop.permute.xlu1 %2263 }
 0x3c9   : > { %8103 = vst [vmem:[#allocation19_spill] sm:$0xff] %v6293_v4 }
 0x3cc   : > { %4732 = vset.pattern.permute.xlu1 %v8091_v53  ;;  %v6298_v22 = vpop.permute.xlu1 %2443 }
 0x3cd   : > { %2568 = vperm.xlu1 %4732, %v6206_v48  }
 0x3d0   : > { %v6304_v51 = vpop.permute.xlu1 %2864 }
 0x3d1   : > { %2573 = vperm.xlu1 %4732, %v446_v56  }
 0x3d4   : > { %v6307_v5 = vpop.permute.xlu1 %2448 }
 0x3d5   : > { %4733 = vset.pattern.permute.xlu1 %v4784_v35 }
 0x3d6   : > { %2972 = vperm.xlu1 %4733, %v446_v56  }
 0x3da   : > { %4735 = vset.pattern.permute.xlu1 %v8091_v53 }
 0x3db   : > { %2583 = vperm.xlu1 %4735, %v6215_v39   ;;  %v2083_v39 = vsub.s32 %v2080_v1, %v8107_v40 }
 0x3df   : > { %4736 = vset.pattern.permute.xlu1 %v4784_v35 }
 0x3e0   : > { %2976 = vperm.xlu1 %4736, %v6052_v32   ;;  %v6310_v32 = vpop.permute.xlu1 %2453 }
 0x3e4   : > { %4737 = vset.pattern.permute.xlu1 %v8091_v53  ;;  %v6312_v58 = vpop.permute.xlu1 %2876 }
 0x3e5   : > { %2588 = vperm.xlu1 %4737, %v6225_v34  }
 0x3e8   : > { %v6314_v16 = vpop.permute.xlu1 %2463 }
 0x3e9   : > { %2593 = vperm.xlu1 %4737, %v450_v2  }
 0x3ec   : > { %v6316_v8 = vpop.permute.xlu1 %2880 }
 0x3ed   : > { %4738 = vset.pattern.permute.xlu1 %v4784_v35  ;;  %v6324_v35 = vpop.permute.xlu0 %2121 }
 0x3ee   : > { %2988 = vperm.xlu1 %4738, %v450_v2   ;;  %8104 = vst [vmem:[#allocation17_spill] sm:$0xff] %v6324_v35 }
 0x3f0   : > { %v6318_v57 = vpop.permute.xlu1 %2468 }
 0x3f1   : > { %v6328_v28 = vpop.permute.xlu0 %2141 }
 0x3f2   : > { %4739 = vset.pattern.permute.xlu1 %v8091_v53  ;;  %8105 = vst [vmem:[#allocation24_spill] sm:$0xff] %v6328_v28 }
 0x3f4   : > { %v6320_v20 = vpop.permute.xlu1 %2473 }
 0x3f5   : > { %v6332_v15 = vpop.permute.xlu0 %2438 }
 0x3f8   : > { %v6322_v41 = vpop.permute.xlu1 %2892 }
 0x3f9   : > { %v6336_v29 = vpop.permute.xlu0 %2458 }
 0x3fc   : > { %v6326_v30 = vpop.permute.xlu1 %2483 }
 0x3fd   : > { %v6340_v62 = vpop.permute.xlu0 %2478 }
 0x400   : > { %v6330_v19 = vpop.permute.xlu1 %2896 }
 0x401   : > { %v6344_v11 = vpop.permute.xlu0 %2498 }
 0x404   : > { %v6334_v0 = vpop.permute.xlu1 %2488 }
 0x405   : > { %v6348_v44 = vpop.permute.xlu0 %2518 }
 0x408   : > { %v6338_v26 = vpop.permute.xlu1 %2493 }
 0x409   : > { %8106 = vst [vmem:[#allocation25_spill] sm:$0xff] %v6338_v26  ;;  %v6352_v48 = vpop.permute.xlu0 %2538 }
 0x40c   : > { %v6342_v31 = vpop.permute.xlu1 %2908 }
 0x40d   : > { %v6356_v47 = vpop.permute.xlu0 %2558 }
 0x410   : > { %v6346_v61 = vpop.permute.xlu1 %2503 }
 0x411   : > { %v6361_v59 = vpop.permute.xlu0 %2578 }
 0x414   : > { %v6350_v10 = vpop.permute.xlu1 %2912 }
 0x415   : > { %v6365_v33 = vpop.permute.xlu0 %2239 }
 0x416   : > { %8108 = vst [vmem:[#allocation4_spill] sm:$0xff] %v6365_v33 }
 0x418   : > { %v6354_v13 = vpop.permute.xlu1 %2508 }
 0x419   : > { %v6372_v25 = vpop.permute.xlu0 %2243 }
 0x41a   : > { %8109 = vst [vmem:[#allocation26_spill] sm:$0xff] %v6372_v25 }
 0x41c   : > { %v6359_v24 = vpop.permute.xlu1 %2513 }
 0x41d   : > { %v6382_v40 = vpop.permute.xlu0 %2255 }
 0x41e   : > { %8115 = vst [vmem:[#allocation28_spill] sm:$0xff] %v6382_v40 }
 0x420   : > { %v6363_v34 = vpop.permute.xlu1 %2924 }
 0x421   : > { %v6390_v9 = vpop.permute.xlu0 %2259 }
 0x422   : > { %8116 = vst [vmem:[#allocation29_spill] sm:$0xff] %v6390_v9 }
 0x424   : > { %v6370_v2 = vpop.permute.xlu1 %2523 }
 0x425   : > { %v6394_v6 = vpop.permute.xlu0 %2868 }
 0x428   : > { %v6374_v1 = vpop.permute.xlu1 %2928 }
 0x429   : > { %8110 = vst [vmem:[#allocation27_spill] sm:$0xff] %v6374_v1 }
 0x44e   : > { %v2068_v60 = vpop.f32.mrb[0].mxu0 }
 0x44f   : > { %v2073_v12 = vmul.f32 0.0625, %v2068_v60  ;;  %v2070_v52 = vpop.f32.mrb[1].mxu0  ;;  %v8111_v60 = vld [vmem:[#allocation7_spill] sm:$0xff] }
 0x450   : > { %v2074_v14 = vmul.f32 0.0625, %v2070_v52  ;;  %v8113_v52 = vld [vmem:[#allocation6_spill] sm:$0xff] }
 0x452   : > { %v2077_v55 = vcombine.low %v2073_v12, %v2074_v14 }
 0x454   : > { %v2084_v43 = vrot.slane %v2077_v55, %v2083_v39 }
 0x456   : > { %v2091_v49 = vrot.slane %v2084_v43, %v2083_v39  ;;  %v2096_v4 = vcombine.high %v2084_v43, %v2084_v43 }
 0x458   : > { %v2415_v17 = vcombine.high %v2091_v49, %v2091_v49  ;;  %v2103_v50 = vrot.slane %v2096_v4, %v2083_v39  ;;  %v2093_v28 = vadd.f32 %v2091_v49, %v408_v42 }
 0x45a   : > { %v2417_v37 = vadd.f32 %v2415_v17, %v408_v42  ;;  %v2420_v7 = vcombine.high %v2103_v50, %v2103_v50  ;;  %v2105_v36 = vadd.f32 %v3954_v38, %v2103_v50  ;;  %v2094_v43 = vadd.f32 1.0, %v2093_v28 }
 0x45c   : > { %v2418_v56 = vadd.f32 1.0, %v2417_v37  ;;  %v6388_v37 = vpop.permute.xlu1 %2528  ;;  %v2422_v21 = vadd.f32 %v3954_v38, %v2420_v7  ;;  %v2106_v33 = vadd.f32 1.0, %v2105_v36  ;;  %v2095_v39 = vmul.f32 3.5, %v2094_v43 }
 0x45e   : > { %v2419_v27 = vmul.f32 7.5, %v2418_v56  ;;  %v2423_v46 = vadd.f32 1.0, %v2422_v21  ;;  %v2107_v54 = vmul.f32 3.5, %v2106_v33  ;;  %v6431_v50 = vrot.slane %v2095_v39, %v8113_v52 }
 0x460   : > { %v6377_v12 = vrot.slane %v2419_v27, %v8111_v60  ;;  %v6380_v14 = vrot.slane %v2419_v27, %v8113_v52  ;;  %v6392_v56 = vpop.permute.xlu1 %2533  ;;  %v6398_v27 = vpop.permute.xlu0 %2872  ;;  %v2424_v26 = vmul.f32 7.5, %v2423_v46  ;;  %8122 = vst [vmem:[#allocation35_spill] sm:$0xff] %v6431_v50  ;;  %v6434_v7 = vrot.slane %v2107_v54, %v8111_v60 }
 0x461   : > { %v6437_v38 = vrot.slane %v2107_v54, %v8113_v52 }
 0x462   : > { %8112 = vst [vmem:[#allocation7_spill] sm:$0xff] %v6377_v12  ;;  %8114 = vst [vmem:[#allocation6_spill] sm:$0xff] %v6380_v14  ;;  %v6446_v46 = vrot.slane %v2424_v26, %v8111_v60  ;;  %v6449_v49 = vrot.slane %v2424_v26, %v8113_v52  ;;  %v8132_v42 = vsub.f32 %v6377_v12, %v6332_v15 }
 0x463   : > { %8123 = vst [vmem:[#allocation36_spill] sm:$0xff] %v6434_v7  ;;  %8124 = vst [vmem:[#allocation37_spill] sm:$0xff] %v6437_v38  ;;  %v8145_v50 = vsub.f32 %v6377_v12, %v6336_v29 }
 0x464   : > { %v6396_v23 = vpop.permute.xlu1 %2940  ;;  %v6402_v45 = vpop.permute.xlu0 %2884  ;;  %8125 = vst [vmem:[#allocation38_spill] sm:$0xff] %v6446_v46  ;;  %8126 = vst [vmem:[#allocation39_spill] sm:$0xff] %v6449_v49 }
 0x465   : > { %8117 = vst [vmem:[#allocation30_spill] sm:$0xff] %v6396_v23 }
 0x468   : > { %v6400_v3 = vpop.permute.xlu1 %2543  ;;  %v6406_v53 = vpop.permute.xlu0 %2888 }
 0x46c   : > { %v6404_v55 = vpop.permute.xlu1 %2944  ;;  %v6410_v9 = vpop.permute.xlu0 %2900 }
 0x46d   : > { %8118 = vst [vmem:[#allocation31_spill] sm:$0xff] %v6404_v55  ;;  %v6428_v55 = vrot.slane %v2095_v39, %v8111_v60  ;;  %v6668_v60 = vand.u32 2147483647, %v8132_v42  ;;  %v8138_v42 = vsub.f32 %v6380_v14, %v6298_v22 }
 0x46f   : > { %8121 = vst [vmem:[#allocation34_spill] sm:$0xff] %v6428_v55  ;;  %v8135_v55 = vsub.f32 %v6377_v12, %v6298_v22  ;;  %v8144_v22 = vsub.f32 %v6380_v14, %v6310_v32 }
 0x470   : > { %v6408_v17 = vpop.permute.xlu1 %2548  ;;  %v6414_v40 = vpop.permute.xlu0 %2904 }
 0x471   : > { %8119 = vst [vmem:[#allocation32_spill] sm:$0xff] %v6414_v40  ;;  %v6678_v23 = vand.u32 2147483647, %v8135_v55 }
 0x473   : > { %8136 = vst [vmem:[#allocation45_spill] sm:$0xff] %v6678_v23  ;;  %v8142_v23 = vsub.f32 %v6377_v12, %v6310_v32  ;;  %v8150_v32 = vsub.f32 %v6380_v14, %v6314_v16 }
 0x474   : > { %v6412_v63 = vpop.permute.xlu1 %2553  ;;  %v6421_v18 = vpop.permute.xlu0 %2916 }
 0x478   : > { %v6419_v25 = vpop.permute.xlu1 %2956  ;;  %v6425_v35 = vpop.permute.xlu0 %2920 }
 0x479   : > { %8120 = vst [vmem:[#allocation33_spill] sm:$0xff] %v6425_v35 }
 0x47c   : > { %v6423_v4 = vpop.permute.xlu1 %2563  ;;  %v6463_v26 = vpop.permute.xlu0 %2932 }
 0x480   : > { %v6443_v28 = vpop.permute.xlu1 %2960  ;;  %v6515_v33 = vpop.permute.xlu0 %2936 }
 0x484   : > { %v6505_v36 = vpop.permute.xlu1 %2568  ;;  %v6567_v21 = vpop.permute.xlu0 %2948 }
 0x485   : > { %8128 = vst [vmem:[#allocation41_spill] sm:$0xff] %v6567_v21  ;;  %v2648_v52 = vsub.f32 %v6377_v12, %v6505_v36  ;;  %v2649_v54 = vsub.f32 %v6380_v14, %v6505_v36 }
 0x487   : > { %v2712_v43 = vand.u32 2147483647, %v2648_v52  ;;  %v2713_v35 = vand.u32 2147483647, %v2649_v54  ;;  %v8133_v52 = vsub.f32 %v6380_v14, %v6332_v15 }
 0x488   : > { %v6557_v7 = vpop.permute.xlu1 %2573  ;;  %v6627_v40 = vpop.permute.xlu0 %2952 }
 0x489   : > { %8127 = vst [vmem:[#allocation40_spill] sm:$0xff] %v6557_v7  ;;  %v2776_v54 = vsub.f32 1.0, %v2712_v43  ;;  %v2777_v1 = vsub.f32 1.0, %v2713_v35  ;;  %v6673_v21 = vand.u32 2147483647, %v8133_v52  ;;  %v8139_v35 = vsub.f32 %v6377_v12, %v6307_v5 }
 0x48a   : > { %v6687_v43 = vand.u32 2147483647, %v8138_v42  ;;  %v8140_v52 = vsub.f32 %v6380_v14, %v6307_v5  ;;  %v6707_v42 = vand.u32 2147483647, %v8144_v22  ;;  %v6729_v22 = vand.u32 2147483647, %v8150_v32 }
 0x48b   : > { %8134 = vst [vmem:[#allocation44_spill] sm:$0xff] %v6673_v21  ;;  %v6692_v15 = vand.u32 2147483647, %v8139_v35  ;;  %v6702_v21 = vand.u32 2147483647, %v8142_v23  ;;  %v8148_v23 = vsub.f32 %v6377_v12, %v6314_v16  ;;  %v6735_v5 = vmax.f32 %v2777_v1, 0.0 }
 0x48c   : > { %v6609_v38 = vpop.permute.xlu1 %2972  ;;  %v6680_v36 = vpop.permute.xlu0 %2964  ;;  %v6697_v55 = vand.u32 2147483647, %v8140_v52  ;;  %v6712_v35 = vand.u32 2147483647, %v8145_v50  ;;  %v8147_v52 = vsub.f32 %v6380_v14, %v6336_v29  ;;  %v8153_v29 = vsub.f32 %v6377_v12, %v6318_v57 }
 0x48d   : > { %8129 = vst [vmem:[#allocation42_spill] sm:$0xff] %v6609_v38  ;;  %8137 = vst [vmem:[#allocation46_spill] sm:$0xff] %v6680_v36  ;;  %v8157_v32 = vsub.f32 %v6377_v12, %v6320_v20  ;;  %v8159_v1 = vsub.f32 %v6380_v14, %v6320_v20  ;;  %v8166_v20 = vsub.f32 %v6380_v14, %v6326_v30 }
 0x48e   : > { %8141 = vst [vmem:[#allocation47_spill] sm:$0xff] %v6697_v55  ;;  %8143 = vst [vmem:[#allocation48_spill] sm:$0xff] %v6702_v21  ;;  %v6719_v55 = vand.u32 2147483647, %v8147_v52  ;;  %v6724_v21 = vand.u32 2147483647, %v8148_v23  ;;  %v8155_v23 = vsub.f32 %v6380_v14, %v6318_v57  ;;  %v8170_v57 = vsub.f32 %v6380_v14, %v6334_v0 }
 0x48f   : > { %8146 = vst [vmem:[#allocation49_spill] sm:$0xff] %v6712_v35  ;;  %v6733_v35 = vmax.f32 %v2776_v54, 0.0  ;;  %8152 = vst [vmem:[#allocation52_spill] sm:$0xff] %v6735_v5  ;;  %v6740_v52 = vand.u32 2147483647, %v8153_v29  ;;  %v8160_v29 = vsub.f32 %v6377_v12, %v6340_v62  ;;  %v8198_v38 = vsub.f32 %v6380_v14, %v6370_v2 }
 0x490   : > { %v6657_v39 = vpop.permute.xlu1 %2583  ;;  %8149 = vst [vmem:[#allocation50_spill] sm:$0xff] %v6724_v21  ;;  %v6745_v21 = vand.u32 2147483647, %v8155_v23  ;;  %v6752_v50 = vand.u32 2147483647, %v8157_v32  ;;  %v8162_v23 = vsub.f32 %v6380_v14, %v6340_v62  ;;  %v8164_v32 = vsub.f32 %v6377_v12, %v6326_v30 }
 0x491   : > { %8131 = vst [vmem:[#allocation43_spill] sm:$0xff] %v6657_v39  ;;  %8151 = vst [vmem:[#allocation51_spill] sm:$0xff] %v6733_v35  ;;  %v6757_v54 = vand.u32 2147483647, %v8159_v1  ;;  %v6762_v35 = vand.u32 2147483647, %v8160_v29  ;;  %v8169_v62 = vsub.f32 %v6377_v12, %v6334_v0  ;;  %v8177_v0 = vsub.f32 %v6380_v14, %v6344_v11 }
 0x492   : > { %8154 = vst [vmem:[#allocation53_spill] sm:$0xff] %v6740_v52  ;;  %8158 = vst [vmem:[#allocation55_spill] sm:$0xff] %v6752_v50  ;;  %v6769_v5 = vand.u32 2147483647, %v8162_v23  ;;  %v6774_v50 = vand.u32 2147483647, %v8164_v32  ;;  %v8179_v29 = vsub.f32 %v6377_v12, %v6346_v61 }
 0x493   : > { %8161 = vst [vmem:[#allocation56_spill] sm:$0xff] %v6762_v35  ;;  %v6779_v1 = vand.u32 2147483647, %v8166_v20  ;;  %v6783_v35 = vpop.permute.xlu0 %2968  ;;  %v6788_v23 = vand.u32 2147483647, %v8169_v62  ;;  %v8175_v62 = vsub.f32 %v6377_v12, %v6344_v11  ;;  %v8194_v11 = vsub.f32 %v6380_v14, %v6348_v44 }
 0x494   : > { %v6747_v16 = vpop.permute.xlu1 %2976  ;;  %8163 = vst [vmem:[#allocation57_spill] sm:$0xff] %v6769_v5  ;;  %8165 = vst [vmem:[#allocation58_spill] sm:$0xff] %v6774_v50  ;;  %v6793_v32 = vand.u32 2147483647, %v8170_v57  ;;  %v8172_v50 = vld [vmem:[#allocation25_spill] sm:$0xff] }
 0x495   : > { %8156 = vst [vmem:[#allocation54_spill] sm:$0xff] %v6747_v16  ;;  %8167 = vst [vmem:[#allocation59_spill] sm:$0xff] %v6779_v1  ;;  %v8173_v30 = vsub.f32 %v6377_v12, %v8172_v50  ;;  %v8174_v7 = vsub.f32 %v6380_v14, %v8172_v50  ;;  %v6810_v5 = vand.u32 2147483647, %v8175_v62  ;;  %v6815_v57 = vand.u32 2147483647, %v8177_v0 }
 0x496   : > { %8168 = vst [vmem:[#allocation60_spill] sm:$0xff] %v6783_v35  ;;  %8171 = vst [vmem:[#allocation61_spill] sm:$0xff] %v6793_v32  ;;  %v6822_v32 = vand.u32 2147483647, %v8179_v29  ;;  %v8183_v62 = vsub.f32 %v6377_v12, %v6354_v13  ;;  %v8185_v0 = vsub.f32 %v6380_v14, %v6354_v13  ;;  %v8187_v29 = vsub.f32 %v6377_v12, %v6359_v24 }
 0x497   : > { %v6798_v20 = vand.u32 2147483647, %v8173_v30  ;;  %v6805_v1 = vand.u32 2147483647, %v8174_v7  ;;  %8176 = vst [vmem:[#allocation25_spill] sm:$0xff] %v6810_v5  ;;  %8178 = vst [vmem:[#allocation62_spill] sm:$0xff] %v6815_v57  ;;  %v8181_v7 = vsub.f32 %v6380_v14, %v6346_v61  ;;  %v8189_v61 = vsub.f32 %v6380_v14, %v6359_v24 }
 0x498   : > { %8180 = vst [vmem:[#allocation63_spill] sm:$0xff] %v6822_v32  ;;  %v6832_v5 = vand.u32 2147483647, %v8183_v62  ;;  %v6839_v30 = vand.u32 2147483647, %v8185_v0  ;;  %v8192_v13 = vsub.f32 %v6377_v12, %v6348_v44  ;;  %v8196_v24 = vsub.f32 %v6377_v12, %v6370_v2 }
 0x499   : > { %v6827_v50 = vand.u32 2147483647, %v8181_v7  ;;  %v6844_v36 = vand.u32 2147483647, %v8187_v29  ;;  %v6849_v7 = vand.u32 2147483647, %v8189_v61  ;;  %v8202_v44 = vsub.f32 %v6380_v14, %v6388_v37 }
 0x49a   : > { %8184 = vst [vmem:[#allocation65_spill] sm:$0xff] %v6832_v5  ;;  %8186 = vst [vmem:[#allocation66_spill] sm:$0xff] %v6839_v30  ;;  %v6853_v5 = vpop.permute.xlu1 %2588  ;;  %v6858_v0 = vand.u32 2147483647, %v8192_v13  ;;  %v6863_v29 = vand.u32 2147483647, %v8194_v11  ;;  %v8200_v13 = vsub.f32 %v6377_v12, %v6388_v37  ;;  %v8205_v2 = vsub.f32 %v6377_v12, %v6392_v56 }
 0x49b   : > { %8182 = vst [vmem:[#allocation64_spill] sm:$0xff] %v6827_v50  ;;  %8188 = vst [vmem:[#allocation67_spill] sm:$0xff] %v6844_v36  ;;  %v6868_v61 = vand.u32 2147483647, %v8196_v24  ;;  %v6885_v11 = vand.u32 2147483647, %v8202_v44  ;;  %v8207_v62 = vsub.f32 %v6380_v14, %v6392_v56  ;;  %v8209_v37 = vsub.f32 %v6377_v12, %v6352_v48 }
 0x49c   : > { %8190 = vst [vmem:[#allocation68_spill] sm:$0xff] %v6849_v7  ;;  %8191 = vst [vmem:[#allocation69_spill] sm:$0xff] %v6853_v5  ;;  %v6875_v7 = vand.u32 2147483647, %v8198_v38  ;;  %v6894_v38 = vand.u32 2147483647, %v8205_v2  ;;  %v8211_v35 = vsub.f32 %v6380_v14, %v6352_v48  ;;  %v8213_v2 = vsub.f32 %v6377_v12, %v6400_v3 }
 0x49d   : > { %8193 = vst [vmem:[#allocation70_spill] sm:$0xff] %v6858_v0  ;;  %8195 = vst [vmem:[#allocation71_spill] sm:$0xff] %v6863_v29  ;;  %v6880_v0 = vand.u32 2147483647, %v8200_v13  ;;  %v6899_v13 = vand.u32 2147483647, %v8207_v62  ;;  %v8215_v56 = vsub.f32 %v6380_v14, %v6400_v3  ;;  %v8217_v24 = vsub.f32 %v6377_v12, %v6408_v17 }
 0x49e   : > { %8197 = vst [vmem:[#allocation72_spill] sm:$0xff] %v6868_v61  ;;  %8199 = vst [vmem:[#allocation73_spill] sm:$0xff] %v6875_v7  ;;  %v6889_v61 = vpop.permute.xlu0 %2980  ;;  %v6904_v44 = vand.u32 2147483647, %v8209_v37  ;;  %v8218_v48 = vsub.f32 %v6380_v14, %v6408_v17  ;;  %v8224_v17 = vsub.f32 %v6380_v14, %v6356_v47  ;;  %v8229_v3 = vsub.f32 %v6380_v14, %v6423_v4 }
 0x49f   : > { %8201 = vst [vmem:[#allocation74_spill] sm:$0xff] %v6880_v0  ;;  %8203 = vst [vmem:[#allocation75_spill] sm:$0xff] %v6885_v11  ;;  %v6911_v11 = vand.u32 2147483647, %v8211_v35  ;;  %v6921_v62 = vand.u32 2147483647, %v8215_v56  ;;  %v8220_v56 = vsub.f32 %v6380_v14, %v6412_v63  ;;  %v8244_v16 = vsub.f32 %v6449_v49, %v6398_v27 }
 0x4a0   : > { %8204 = vst [vmem:[#allocation76_spill] sm:$0xff] %v6889_v61  ;;  %8206 = vst [vmem:[#allocation77_spill] sm:$0xff] %v6894_v38  ;;  %v6916_v38 = vand.u32 2147483647, %v8213_v2  ;;  %v6933_v35 = vand.u32 2147483647, %v8218_v48  ;;  %v8219_v2 = vsub.f32 %v6377_v12, %v6412_v63  ;;  %v8227_v63 = vsub.f32 %v6377_v12, %v6423_v4 }
 0x4a1   : > { %8208 = vst [vmem:[#allocation78_spill] sm:$0xff] %v6899_v13  ;;  %8210 = vst [vmem:[#allocation79_spill] sm:$0xff] %v6904_v44  ;;  %v6928_v44 = vand.u32 2147483647, %v8217_v24  ;;  %v6945_v37 = vand.u32 2147483647, %v8220_v56  ;;  %v8222_v24 = vsub.f32 %v6377_v12, %v6356_v47  ;;  %v8231_v47 = vsub.f32 %v6377_v12, %v6361_v59 }
 0x4a2   : > { %8212 = vst [vmem:[#allocation80_spill] sm:$0xff] %v6911_v11  ;;  %8214 = vst [vmem:[#allocation81_spill] sm:$0xff] %v6916_v38  ;;  %v6938_v38 = vand.u32 2147483647, %v8219_v2  ;;  %v6955_v48 = vand.u32 2147483647, %v8224_v17  ;;  %v8233_v61 = vsub.f32 %v6380_v14, %v6361_v59  ;;  %v8236_v4 = vsub.f32 %v6449_v49, %v6304_v51 }
 0x4a3   : > { %8216 = vst [vmem:[#allocation82_spill] sm:$0xff] %v6921_v62  ;;  %8221 = vst [vmem:[#allocation83_spill] sm:$0xff] %v6945_v37  ;;  %v6950_v39 = vand.u32 2147483647, %v8222_v24  ;;  %v6959_v62 = vpop.permute.xlu1 %2593  ;;  %v6964_v56 = vand.u32 2147483647, %v8227_v63  ;;  %v8235_v63 = vsub.f32 %v6446_v46, %v6304_v51  ;;  %v8239_v59 = vsub.f32 %v6446_v46, %v6394_v6 }
 0x4a4   : > { %8225 = vst [vmem:[#allocation85_spill] sm:$0xff] %v6955_v48  ;;  %8226 = vst [vmem:[#allocation86_spill] sm:$0xff] %v6959_v62  ;;  %v6969_v24 = vand.u32 2147483647, %v8229_v3  ;;  %v6974_v17 = vand.u32 2147483647, %v8231_v47  ;;  %v8241_v2 = vsub.f32 %v6449_v49, %v6394_v6  ;;  %v8242_v51 = vsub.f32 %v6446_v46, %v6398_v27 }
 0x4a5   : > { %8223 = vst [vmem:[#allocation84_spill] sm:$0xff] %v6950_v39  ;;  %8228 = vst [vmem:[#allocation87_spill] sm:$0xff] %v6964_v56  ;;  %v6981_v48 = vand.u32 2147483647, %v8233_v61  ;;  %v6986_v56 = vand.u32 2147483647, %v8235_v63  ;;  %v8247_v6 = vsub.f32 %v6449_v49, %v6312_v58  ;;  %v8248_v47 = vsub.f32 %v6446_v46, %v6316_v8 }
 0x4a6   : > { %8230 = vst [vmem:[#allocation88_spill] sm:$0xff] %v6969_v24  ;;  %8232 = vst [vmem:[#allocation89_spill] sm:$0xff] %v6974_v17  ;;  %v6991_v3 = vand.u32 2147483647, %v8236_v4  ;;  %v6995_v17 = vpop.permute.xlu0 %2984  ;;  %v7000_v61 = vand.u32 2147483647, %v8239_v59  ;;  %v8245_v59 = vsub.f32 %v6446_v46, %v6312_v58  ;;  %v8249_v27 = vsub.f32 %v6449_v49, %v6316_v8 }
 0x4a7   : > { %8234 = vst [vmem:[#allocation90_spill] sm:$0xff] %v6981_v48  ;;  %8238 = vst [vmem:[#allocation92_spill] sm:$0xff] %v6995_v17  ;;  %v7005_v63 = vand.u32 2147483647, %v8241_v2  ;;  %v7010_v4 = vand.u32 2147483647, %v8242_v51  ;;  %v8255_v8 = vsub.f32 %v6449_v49, %v6406_v53  ;;  %v8260_v58 = vsub.f32 %v6449_v49, %v6322_v41 }
 0x4a8   : > { %8237 = vst [vmem:[#allocation91_spill] sm:$0xff] %v6991_v3  ;;  %8240 = vst [vmem:[#allocation93_spill] sm:$0xff] %v7000_v61  ;;  %v7017_v3 = vand.u32 2147483647, %v8244_v16  ;;  %v7022_v61 = vand.u32 2147483647, %v8245_v59  ;;  %v8250_v59 = vsub.f32 %v6446_v46, %v6402_v45  ;;  %v8264_v5 = vsub.f32 %v6449_v49, %v6330_v19 }
 0x4a9   : > { %8243 = vst [vmem:[#allocation94_spill] sm:$0xff] %v7010_v4  ;;  %v7027_v2 = vand.u32 2147483647, %v8247_v6  ;;  %v7034_v4 = vand.u32 2147483647, %v8248_v47  ;;  %v8252_v6 = vsub.f32 %v6449_v49, %v6402_v45  ;;  %v8253_v47 = vsub.f32 %v6446_v46, %v6406_v53 }
 0x4aa   : > { %8246 = vst [vmem:[#allocation95_spill] sm:$0xff] %v7022_v61  ;;  %v7039_v16 = vand.u32 2147483647, %v8249_v27  ;;  %v7044_v61 = vand.u32 2147483647, %v8250_v59  ;;  %v8258_v45 = vsub.f32 %v6446_v46, %v6322_v41  ;;  %v8262_v53 = vsub.f32 %v6446_v46, %v6330_v19  ;;  %v8270_v59 = vld [vmem:[#allocation32_spill] sm:$0xff] }
 0x4ab   : > { %v7051_v51 = vand.u32 2147483647, %v8252_v6  ;;  %v7056_v17 = vand.u32 2147483647, %v8253_v47  ;;  %v7061_v27 = vand.u32 2147483647, %v8255_v8  ;;  %v8268_v41 = vsub.f32 %v6449_v49, %v6410_v9 }
 0x4ac   : > { %8251 = vst [vmem:[#allocation96_spill] sm:$0xff] %v7044_v61  ;;  %v7065_v61 = vpop.permute.xlu1 %2988  ;;  %v7070_v6 = vand.u32 2147483647, %v8258_v45  ;;  %v7075_v47 = vand.u32 2147483647, %v8260_v58  ;;  %v8266_v45 = vsub.f32 %v6446_v46, %v6410_v9  ;;  %v8271_v12 = vsub.f32 %v6446_v46, %v8270_v59 }
 0x4ad   : > { %8254 = vst [vmem:[#allocation97_spill] sm:$0xff] %v7056_v17  ;;  %8256 = vst [vmem:[#allocation98_spill] sm:$0xff] %v7061_v27  ;;  %v7080_v8 = vand.u32 2147483647, %v8262_v53  ;;  %v7087_v27 = vand.u32 2147483647, %v8264_v5  ;;  %v8272_v19 = vsub.f32 %v6446_v46, %v6342_v31  ;;  %v8276_v53 = vsub.f32 %v6446_v46, %v6350_v10 }
 0x4ae   : > { %8257 = vst [vmem:[#allocation99_spill] sm:$0xff] %v7065_v61  ;;  %8259 = vst [vmem:[#allocation100_spill] sm:$0xff] %v7070_v6  ;;  %v7092_v6 = vand.u32 2147483647, %v8266_v45  ;;  %v7097_v58 = vand.u32 2147483647, %v8268_v41  ;;  %v8273_v45 = vsub.f32 %v6449_v49, %v6342_v31  ;;  %v8274_v41 = vsub.f32 %v6449_v49, %v8270_v59 }
 0x4af   : > { %8261 = vst [vmem:[#allocation101_spill] sm:$0xff] %v7075_v47  ;;  %8263 = vst [vmem:[#allocation102_spill] sm:$0xff] %v7080_v8  ;;  %v3075_v8 = vand.u32 2147483647, %v8271_v12  ;;  %v3077_v5 = vand.u32 2147483647, %v8272_v19  ;;  %v8282_v59 = vsub.f32 %v6446_v46, %v6421_v18  ;;  %v8296_v19 = vsub.f32 %v6449_v49, %v6363_v34 }
 0x4b0   : > { %8265 = vst [vmem:[#allocation103_spill] sm:$0xff] %v7087_v27  ;;  %8267 = vst [vmem:[#allocation104_spill] sm:$0xff] %v7092_v6  ;;  %v3078_v6 = vand.u32 2147483647, %v8273_v45  ;;  %v7120_v12 = vand.u32 2147483647, %v8276_v53  ;;  %v8280_v45 = vsub.f32 %v6449_v49, %v6350_v10  ;;  %v8284_v53 = vsub.f32 %v6449_v49, %v6421_v18 }
 0x4b1   : > { %8269 = vst [vmem:[#allocation105_spill] sm:$0xff] %v7097_v58  ;;  %v7115_v58 = vand.u32 2147483647, %v8274_v41  ;;  %v7134_v41 = vand.u32 2147483647, %v8282_v59  ;;  %v8287_v31 = vld [vmem:[#allocation33_spill] sm:$0xff]  ;;  %v8292_v59 = vsub.f32 %v6446_v46, %v6363_v34  ;;  %v8305_v34 = vsub.f32 %v6446_v46, %v6419_v25 }
 0x4b2   : > { %8277 = vst [vmem:[#allocation106_spill] sm:$0xff] %v7120_v12  ;;  %v7129_v9 = vand.u32 2147483647, %v8280_v45  ;;  %v7139_v12 = vand.u32 2147483647, %v8284_v53  ;;  %v8288_v61 = vsub.f32 %v6446_v46, %v8287_v31  ;;  %v8290_v10 = vsub.f32 %v6449_v49, %v8287_v31  ;;  %v8294_v18 = vld [vmem:[#allocation21_spill] sm:$0xff] }
 0x4b3   : > { %8275 = vst [vmem:[#allocation32_spill] sm:$0xff] %v7115_v58  ;;  %8283 = vst [vmem:[#allocation108_spill] sm:$0xff] %v7134_v41  ;;  %v8286_v58 = vld [vmem:[#allocation22_spill] sm:$0xff]  ;;  %v7156_v41 = vand.u32 2147483647, %v8292_v59  ;;  %v3141_v31 = vsub.f32 1.0, %v3077_v5 }
 0x4b4   : > { %8281 = vst [vmem:[#allocation107_spill] sm:$0xff] %v7129_v9  ;;  %8285 = vst [vmem:[#allocation109_spill] sm:$0xff] %v7139_v12  ;;  %v7146_v27 = vand.u32 2147483647, %v8288_v61  ;;  %v7151_v45 = vand.u32 2147483647, %v8290_v10  ;;  %v8303_v12 = vsub.f32 %v6446_v46, %v6463_v26 }
 0x4b5   : > { %8293 = vst [vmem:[#allocation110_spill] sm:$0xff] %v7156_v41  ;;  %v7163_v14 = vand.u32 2147483647, %v8296_v19  ;;  %v8298_v61 = vld [vmem:[#allocation27_spill] sm:$0xff]  ;;  %v3142_v10 = vsub.f32 1.0, %v3078_v6  ;;  %v8307_v6 = vsub.f32 %v6449_v49, %v6463_v26  ;;  %v8314_v26 = vld [vmem:[#allocation30_spill] sm:$0xff] }
 0x4b6   : > { %8289 = vst [vmem:[#allocation22_spill] sm:$0xff] %v7146_v27  ;;  %8291 = vst [vmem:[#allocation33_spill] sm:$0xff] %v7151_v45  ;;  %v8299_v27 = vsub.f32 %v6446_v46, %v8298_v61  ;;  %v8301_v45 = vsub.f32 %v6449_v49, %v8298_v61  ;;  %v7178_v41 = vand.u32 2147483647, %v8303_v12  ;;  %v3101_v19 = vand.u32 2147483647, %v8305_v34 }
 0x4b7   : > { %8297 = vst [vmem:[#allocation21_spill] sm:$0xff] %v7163_v14  ;;  %v8306_v14 = vld [vmem:[#allocation4_spill] sm:$0xff]  ;;  %v7188_v5 = vand.u32 2147483647, %v8307_v6  ;;  %v2747_v12 = vsub.f32 1.0, %v6805_v1  ;;  %v8315_v6 = vsub.f32 %v6446_v46, %v8314_v26  ;;  %v8318_v1 = vsub.f32 %v6449_v49, %v6627_v40  ;;  %v8368_v11 = vld [vmem:[#allocation91_spill] sm:$0xff] }
 0x4b8   : > { %v7168_v9 = vand.u32 2147483647, %v8299_v27  ;;  %v7173_v59 = vand.u32 2147483647, %v8301_v45  ;;  %8304 = vst [vmem:[#allocation112_spill] sm:$0xff] %v7178_v41  ;;  %v8309_v45 = vsub.f32 %v6446_v46, %v6627_v40  ;;  %v8310_v41 = vsub.f32 %v6446_v46, %v6515_v33  ;;  %v8370_v37 = vld [vmem:[#allocation94_spill] sm:$0xff] }
 0x4b9   : > { %8308 = vst [vmem:[#allocation4_spill] sm:$0xff] %v7188_v5  ;;  %v8312_v27 = vsub.f32 %v6449_v49, %v6515_v33  ;;  %v7208_v5 = vand.u32 2147483647, %v8315_v6  ;;  %v3139_v47 = vsub.f32 1.0, %v3075_v8  ;;  %v8319_v33 = vsub.f32 %v6449_v49, %v8314_v26  ;;  %v8371_v7 = vld [vmem:[#allocation95_spill] sm:$0xff]  ;;  %v8372_v48 = vld [vmem:[#allocation96_spill] sm:$0xff] }
 0x4ba   : > { %8300 = vst [vmem:[#allocation27_spill] sm:$0xff] %v7168_v9  ;;  %8302 = vst [vmem:[#allocation111_spill] sm:$0xff] %v7173_v59  ;;  %v3099_v61 = vand.u32 2147483647, %v8309_v45  ;;  %v2746_v59 = vsub.f32 1.0, %v6798_v20  ;;  %v8317_v45 = vld [vmem:[#allocation34_spill] sm:$0xff] }
 0x4bb   : > { %v7198_v34 = vand.u32 2147483647, %v8310_v41  ;;  %v7203_v53 = vand.u32 2147483647, %v8312_v27  ;;  %8316 = vst [vmem:[#allocation30_spill] sm:$0xff] %v7208_v5  ;;  %v3205_v41 = vmax.f32 %v3141_v31, 0.0 }
 0x4bc   : > { %v3100_v9 = vand.u32 2147483647, %v8318_v1  ;;  %v7218_v27 = vand.u32 2147483647, %v8319_v33  ;;  %v3165_v5 = vsub.f32 1.0, %v3101_v19  ;;  %v3163_v62 = vsub.f32 1.0, %v3099_v61 }
 0x4bd   : > { %8311 = vst [vmem:[#allocation113_spill] sm:$0xff] %v7198_v34  ;;  %8313 = vst [vmem:[#allocation114_spill] sm:$0xff] %v7203_v53  ;;  %v3206_v34 = vmax.f32 %v3142_v10, 0.0  ;;  %v8321_v53 = vld [vmem:[#allocation31_spill] sm:$0xff]  ;;  %v2744_v40 = vsub.f32 1.0, %v6788_v23  ;;  %v2810_v8 = vmax.f32 %v2746_v59, 0.0 }
 0x4be   : > { %8320 = vst [vmem:[#allocation34_spill] sm:$0xff] %v7218_v27  ;;  %v8322_v17 = vsub.f32 %v6446_v46, %v8321_v53  ;;  %v2811_v31 = vmax.f32 %v2747_v12, 0.0  ;;  %v8324_v10 = vsub.f32 %v6449_v49, %v8321_v53  ;;  %v2768_v1 = vsub.f32 1.0, %v6928_v44  ;;  %v8327_v23 = vld [vmem:[#allocation41_spill] sm:$0xff]  ;;  %v8374_v24 = vld [vmem:[#allocation98_spill] sm:$0xff] }
 0x4bf   : > { %v2769_v33 = vsub.f32 1.0, %v6933_v35  ;;  %v3164_v19 = vsub.f32 1.0, %v3100_v9  ;;  %v7236_v27 = vmul.f32 %v3205_v41, %v2810_v8  ;;  %v8328_v59 = vsub.f32 %v6446_v46, %v8327_v23  ;;  %v8334_v35 = vld [vmem:[#allocation36_spill] sm:$0xff]  ;;  %v8347_v8 = vld [vmem:[#allocation50_spill] sm:$0xff]  ;;  %v8376_v39 = vld [vmem:[#allocation101_spill] sm:$0xff] }
 0x4c0   : > { %v7223_v6 = vand.u32 2147483647, %v8322_v17  ;;  %v7231_v26 = vand.u32 2147483647, %v8324_v10  ;;  %v2770_v17 = vsub.f32 1.0, %v6938_v38  ;;  %v7238_v61 = vmul.f32 %v3206_v34, %v2811_v31 }
 0x4c1   : > { %8326 = vst [vmem:[#allocation116_spill] sm:$0xff] %v7236_v27  ;;  %v7243_v12 = vand.u32 2147483647, %v8328_v59  ;;  %v8330_v53 = vsub.f32 %v6449_v49, %v8327_v23  ;;  %v8332_v44 = vsub.f32 %v6449_v49, %v6419_v25  ;;  %v3227_v9 = vmax.f32 %v3163_v62, 0.0 }
 0x4c2   : > { %8323 = vst [vmem:[#allocation31_spill] sm:$0xff] %v7223_v6  ;;  %8325 = vst [vmem:[#allocation115_spill] sm:$0xff] %v7231_v26  ;;  %v3203_v6 = vmax.f32 %v3139_v47, 0.0  ;;  %v3229_v34 = vmax.f32 %v3165_v5, 0.0  ;;  %v2808_v41 = vmax.f32 %v2744_v40, 0.0  ;;  %v8335_v31 = vsub.f32 %v6446_v46, %v6443_v28  ;;  %v8340_v40 = vld [vmem:[#allocation44_spill] sm:$0xff] }
 0x4c3   : > { %8329 = vst [vmem:[#allocation41_spill] sm:$0xff] %v7243_v12  ;;  %v7248_v10 = vand.u32 2147483647, %v8330_v53  ;;  %v7253_v38 = vand.u32 2147483647, %v8332_v44  ;;  %v8337_v59 = vsub.f32 %v6449_v49, %v6443_v28  ;;  %v2832_v53 = vmax.f32 %v2768_v1, 0.0 }
 0x4c4   : > { %v7262_v23 = vand.u32 2147483647, %v8335_v31  ;;  %v2833_v44 = vmax.f32 %v2769_v33, 0.0  ;;  %v2834_v20 = vmax.f32 %v2770_v17, 0.0  ;;  %v3228_v47 = vmax.f32 %v3164_v19, 0.0  ;;  %v8344_v1 = vld [vmem:[#allocation47_spill] sm:$0xff] }
 0x4c5   : > { %8331 = vst [vmem:[#allocation117_spill] sm:$0xff] %v7248_v10  ;;  %8333 = vst [vmem:[#allocation118_spill] sm:$0xff] %v7253_v38  ;;  %v7267_v25 = vand.u32 2147483647, %v8337_v59  ;;  %v7270_v5 = vmul.f32 %v3203_v6, %v2808_v41  ;;  %v8341_v38 = vld [vmem:[#allocation45_spill] sm:$0xff]  ;;  %v8345_v17 = vld [vmem:[#allocation48_spill] sm:$0xff] }
 0x4c6   : > { %8336 = vst [vmem:[#allocation36_spill] sm:$0xff] %v7262_v23  ;;  %v7276_v23 = vmul.f32 %v3227_v9, %v2832_v53  ;;  %v7278_v28 = vmul.f32 %v3229_v34, %v2834_v20  ;;  %v8346_v6 = vld [vmem:[#allocation49_spill] sm:$0xff]  ;;  %v7286_v49 = vmul.f32 %v3228_v47, %v2833_v44  ;;  %v8381_v12 = vld [vmem:[#allocation32_spill] sm:$0xff]  ;;  %v8384_v33 = vld [vmem:[#allocation35_spill] sm:$0xff] }
 0x4c7   : > { %8338 = vst [vmem:[#allocation119_spill] sm:$0xff] %v7267_v25  ;;  %8339 = vst [vmem:[#allocation120_spill] sm:$0xff] %v7270_v5  ;;  %v8385_v5 = vld [vmem:[#allocation17_spill] sm:$0xff]  ;;  %v8390_v10 = vsub.f32 %v8384_v33, %v8286_v58  ;;  %v8407_v26 = vld [vmem:[#allocation14_spill] sm:$0xff] }
 0x4c8   : > { %8342 = vst [vmem:[#allocation44_spill] sm:$0xff] %v7276_v23  ;;  %8343 = vst [vmem:[#allocation45_spill] sm:$0xff] %v7278_v28  ;;  %v8369_v23 = vld [vmem:[#allocation93_spill] sm:$0xff]  ;;  %v8386_v57 = vsub.f32 %v8384_v33, %v8385_v5  ;;  %v2166_v52 = vsub.f32 %v8384_v33, %v8407_v26 }
 0x4c9   : > { %8348 = vst [vmem:[#allocation47_spill] sm:$0xff] %v7286_v49  ;;  %v8354_v49 = vld [vmem:[#allocation61_spill] sm:$0xff]  ;;  %v2178_v44 = vand.u32 2147483647, %v8390_v10  ;;  %v8399_v10 = vsub.f32 1.0, %v8340_v40  ;;  %v8404_v40 = vld [vmem:[#allocation16_spill] sm:$0xff] }
 0x4ca   : > { %v2176_v34 = vand.u32 2147483647, %v8386_v57  ;;  %v8396_v20 = vld [vmem:[#allocation37_spill] sm:$0xff] }
 0x4cb   : > { %v2194_v19 = vsub.f32 1.0, %v2178_v44  ;;  %v8397_v59 = vsub.f32 %v8396_v20, %v8294_v18  ;;  %v7372_v53 = vmax.f32 %v8399_v10, 0.0  ;;  %v8400_v9 = vsub.f32 %v8396_v20, %v8306_v14 }
 0x4cc   : > { %v2192_v36 = vsub.f32 1.0, %v2176_v34  ;;  %v8401_v34 = vsub.f32 %v8317_v45, %v8385_v5  ;;  %v8402_v44 = vsub.f32 1.0, %v8354_v49  ;;  %v2164_v10 = vsub.f32 %v8384_v33, %v8404_v40 }
 0x4cd   : > { %v2283_v27 = vand.u32 2147483647, %v8397_v59  ;;  %v2285_v25 = vand.u32 2147483647, %v8400_v9  ;;  %v8403_v59 = vsub.f32 %v8317_v45, %v8286_v58  ;;  %v8405_v9 = vsub.f32 %v8334_v35, %v8294_v18 }
 0x4ce   : > { %v2175_v31 = vand.u32 2147483647, %v8401_v34  ;;  %v7382_v47 = vmax.f32 %v8402_v44, 0.0  ;;  %v2208_v41 = vmax.f32 %v2192_v36, 0.0  ;;  %v2210_v34 = vmax.f32 %v2194_v19, 0.0  ;;  %v8408_v19 = vld [vmem:[#allocation26_spill] sm:$0xff] }
 0x4cf   : > { %v2299_v46 = vsub.f32 1.0, %v2283_v27  ;;  %v2177_v62 = vand.u32 2147483647, %v8403_v59  ;;  %v2301_v28 = vsub.f32 1.0, %v2285_v25  ;;  %v2282_v5 = vand.u32 2147483647, %v8405_v9 }
 0x4d0   : > { %v2191_v57 = vsub.f32 1.0, %v2175_v31  ;;  %v8406_v27 = vsub.f32 %v8334_v35, %v8306_v14  ;;  %v2180_v32 = vand.u32 2147483647, %v2164_v10  ;;  %v2182_v9 = vand.u32 2147483647, %v2166_v52  ;;  %v8409_v14 = vld [vmem:[#allocation23_spill] sm:$0xff] }
 0x4d1   : > { %v2315_v13 = vmax.f32 %v2299_v46, 0.0  ;;  %v2193_v49 = vsub.f32 1.0, %v2177_v62  ;;  %v2317_v29 = vmax.f32 %v2301_v28, 0.0  ;;  %v2298_v59 = vsub.f32 1.0, %v2282_v5 }
 0x4d2   : > { %v2284_v44 = vand.u32 2147483647, %v8406_v27  ;;  %v2207_v58 = vmax.f32 %v2191_v57, 0.0  ;;  %v2271_v46 = vsub.f32 %v8396_v20, %v8408_v19  ;;  %v2196_v0 = vsub.f32 1.0, %v2180_v32 }
 0x4d3   : > { %v2331_v36 = vmul.f32 %v2315_v13, %v2208_v41  ;;  %v2209_v25 = vmax.f32 %v2193_v49, 0.0  ;;  %v2333_v30 = vmul.f32 %v2317_v29, %v2210_v34  ;;  %v2314_v18 = vmax.f32 %v2298_v59, 0.0 }
 0x4d4   : > { %v2300_v31 = vsub.f32 1.0, %v2284_v44  ;;  %v2273_v28 = vsub.f32 %v8396_v20, %v8409_v14  ;;  %v2163_v57 = vsub.f32 %v8317_v45, %v8404_v40  ;;  %v2198_v13 = vsub.f32 1.0, %v2182_v9 }
 0x4d5   : > { %v2349_v5 = vpack.c.bf16 %v2333_v30, %v2331_v36  ;;  %v2330_v27 = vmul.f32 %v2314_v18, %v2207_v58  ;;  %v2287_v41 = vand.u32 2147483647, %v2271_v46  ;;  %v2212_v10 = vmax.f32 %v2196_v0, 0.0 }
 0x4d6   : > { %v2316_v62 = vmax.f32 %v2300_v31, 0.0  ;;  %v2289_v29 = vand.u32 2147483647, %v2273_v28  ;;  %v2165_v52 = vsub.f32 %v8317_v45, %v8407_v26  ;;  %v2214_v34 = vmax.f32 %v2198_v13, 0.0 }
 0x4d7   : > { %2362 = vmatprep.subr.bf16.mxu1 %v2349_v5  ;;  %v2303_v44 = vsub.f32 1.0, %v2287_v41  ;;  %v2179_v32 = vand.u32 2147483647, %v2163_v57  ;;  %v2270_v59 = vsub.f32 %v8334_v35, %v8408_v19  ;;  %v2272_v30 = vsub.f32 %v8334_v35, %v8409_v14 }
 0x4d8   : > { %v2332_v49 = vmul.f32 %v2316_v62, %v2209_v25  ;;  %v2305_v50 = vsub.f32 1.0, %v2289_v29  ;;  %v2181_v40 = vand.u32 2147483647, %v2165_v52  ;;  %v8410_v25 = vld [vmem:[#allocation24_spill] sm:$0xff]  ;;  %v8411_v62 = vld [vmem:[#allocation15_spill] sm:$0xff] }
 0x4d9   : > { %v2319_v58 = vmax.f32 %v2303_v44, 0.0  ;;  %v2195_v36 = vsub.f32 1.0, %v2179_v32  ;;  %v2286_v0 = vand.u32 2147483647, %v2270_v59  ;;  %v2168_v18 = vsub.f32 %v8384_v33, %v8410_v25  ;;  %v8412_v44 = vld [vmem:[#allocation13_spill] sm:$0xff]  ;;  %v8413_v59 = vld [vmem:[#allocation28_spill] sm:$0xff] }
 0x4da   : > { %v2348_v31 = vpack.c.bf16 %v2332_v49, %v2330_v27  ;;  %v2321_v26 = vmax.f32 %v2305_v50, 0.0  ;;  %v2197_v9 = vsub.f32 1.0, %v2181_v40  ;;  %v2288_v46 = vand.u32 2147483647, %v2272_v30 }
 0x4db   : > { %v2170_v28 = vsub.f32 %v8384_v33, %v8411_v62  ;;  %v2335_v19 = vmul.f32 %v2319_v58, %v2212_v10  ;;  %v2211_v57 = vmax.f32 %v2195_v36, 0.0  ;;  %v2302_v5 = vsub.f32 1.0, %v2286_v0 }
 0x4dc   : > { %2363 = vmatpush1.bf16.msra.mxu1 %v2348_v31  ;;  %v2184_v27 = vand.u32 2147483647, %v2168_v18  ;;  %v2337_v13 = vmul.f32 %v2321_v26, %v2214_v34  ;;  %v2213_v41 = vmax.f32 %v2197_v9, 0.0  ;;  %v2304_v14 = vsub.f32 1.0, %v2288_v46 }
 0x4dd   : > { %v2186_v49 = vand.u32 2147483647, %v2170_v28  ;;  %v2318_v29 = vmax.f32 %v2302_v5, 0.0  ;;  %v2275_v32 = vsub.f32 %v8396_v20, %v8412_v44  ;;  %v2277_v50 = vsub.f32 %v8396_v20, %v8413_v59 }
 0x4de   : > { %v2200_v52 = vsub.f32 1.0, %v2184_v27  ;;  %v2351_v31 = vpack.c.bf16 %v2337_v13, %v2335_v19  ;;  %v2320_v40 = vmax.f32 %v2304_v14, 0.0  ;;  %v2167_v10 = vsub.f32 %v8317_v45, %v8410_v25  ;;  %v8414_v14 = vld [vmem:[#allocation20_spill] sm:$0xff] }
 0x4df   : > { %v2202_v30 = vsub.f32 1.0, %v2186_v49  ;;  %v2334_v58 = vmul.f32 %v2318_v29, %v2211_v57  ;;  %v2291_v34 = vand.u32 2147483647, %v2275_v32  ;;  %v2293_v0 = vand.u32 2147483647, %v2277_v50 }
 0x4e0   : > { %v2216_v36 = vmax.f32 %v2200_v52, 0.0  ;;  %2364 = vmatprep.subr.bf16.mxu1 %v2351_v31  ;;  %v2336_v18 = vmul.f32 %v2320_v40, %v2213_v41  ;;  %v2169_v9 = vsub.f32 %v8317_v45, %v8411_v62  ;;  %v2183_v46 = vand.u32 2147483647, %v2167_v10  ;;  %v8416_v40 = vld [vmem:[#allocation18_spill] sm:$0xff] }
 0x4e1   : > { %v2218_v26 = vmax.f32 %v2202_v30, 0.0  ;;  %v2307_v28 = vsub.f32 1.0, %v2291_v34  ;;  %v2309_v5 = vsub.f32 1.0, %v2293_v0  ;;  %v2274_v19 = vsub.f32 %v8334_v35, %v8412_v44 }
 0x4e2   : > { %v2276_v27 = vsub.f32 %v8334_v35, %v8413_v59  ;;  %v2350_v25 = vpack.c.bf16 %v2336_v18, %v2334_v58  ;;  %v2185_v57 = vand.u32 2147483647, %v2169_v9  ;;  %v2199_v13 = vsub.f32 1.0, %v2183_v46  ;;  %v8417_v46 = vld [vmem:[#allocation29_spill] sm:$0xff] }
 0x4e3   : > { %v2172_v49 = vsub.f32 %v8384_v33, %v8414_v14  ;;  %v2323_v41 = vmax.f32 %v2307_v28, 0.0  ;;  %v2325_v29 = vmax.f32 %v2309_v5, 0.0  ;;  %v2290_v52 = vand.u32 2147483647, %v2274_v19 }
 0x4e4   : > { %v2292_v32 = vand.u32 2147483647, %v2276_v27  ;;  %v8415_v62 = vsub.f32 1.0, %v8381_v12  ;;  %2365 = vmatpush1.bf16.msra.mxu1 %v2350_v25  ;;  %v2201_v31 = vsub.f32 1.0, %v2185_v57  ;;  %v2174_v44 = vsub.f32 %v8384_v33, %v8416_v40  ;;  %v8418_v27 = vld [vmem:[#allocation19_spill] sm:$0xff] }
 0x4e5   : > { %v2188_v30 = vand.u32 2147483647, %v2172_v49  ;;  %v2339_v59 = vmul.f32 %v2323_v41, %v2216_v36  ;;  %v2341_v10 = vmul.f32 %v2325_v29, %v2218_v26  ;;  %v2306_v58 = vsub.f32 1.0, %v2290_v52 }
 0x4e6   : > { %v3204_v50 = vmax.f32 %v8415_v62, 0.0  ;;  %v2308_v34 = vsub.f32 1.0, %v2292_v32  ;;  %v2215_v0 = vmax.f32 %v2199_v13, 0.0  ;;  %v2217_v18 = vmax.f32 %v2201_v31, 0.0 }
 0x4e7   : > { %v2190_v9 = vand.u32 2147483647, %v2174_v44  ;;  %v2279_v28 = vsub.f32 %v8396_v20, %v8417_v46  ;;  %v2353_v5 = vpack.c.bf16 %v2341_v10, %v2339_v59  ;;  %v2322_v19 = vmax.f32 %v2306_v58, 0.0 }
 0x4e8   : > { %v2324_v12 = vmax.f32 %v2308_v34, 0.0  ;;  %v2281_v25 = vsub.f32 %v8396_v20, %v8418_v27  ;;  %v2204_v57 = vsub.f32 1.0, %v2188_v30  ;;  %v2171_v36 = vsub.f32 %v8317_v45, %v8414_v14 }
 0x4e9   : > { %v2206_v62 = vsub.f32 1.0, %v2190_v9  ;;  %v2295_v33 = vand.u32 2147483647, %v2279_v28  ;;  %2366 = vmatprep.subr.bf16.mxu1 %v2353_v5  ;;  %v2338_v26 = vmul.f32 %v2322_v19, %v2215_v0  ;;  %v2173_v41 = vsub.f32 %v8317_v45, %v8416_v40 }
 0x4ea   : > { %v2340_v13 = vmul.f32 %v2324_v12, %v2217_v18  ;;  %v2297_v49 = vand.u32 2147483647, %v2281_v25  ;;  %v7440_v29 = vmul.f32 %v3204_v50, %v7382_v47  ;;  %v2187_v32 = vand.u32 2147483647, %v2171_v36 }
 0x4eb   : > { %v2311_v52 = vsub.f32 1.0, %v2295_v33  ;;  %v2278_v20 = vsub.f32 %v8334_v35, %v8417_v46  ;;  %v2189_v30 = vand.u32 2147483647, %v2173_v41  ;;  %v2280_v14 = vsub.f32 %v8334_v35, %v8418_v27 }
 0x4ec   : > { %v2352_v31 = vpack.c.bf16 %v2340_v13, %v2338_v26  ;;  %v2313_v44 = vsub.f32 1.0, %v2297_v49  ;;  %v2220_v59 = vmax.f32 %v2204_v57, 0.0  ;;  %v2203_v58 = vsub.f32 1.0, %v2187_v32 }
 0x4ed   : > { %v2327_v10 = vmax.f32 %v2311_v52, 0.0  ;;  %v2294_v34 = vand.u32 2147483647, %v2278_v20  ;;  %v2222_v45 = vmax.f32 %v2206_v62, 0.0  ;;  %v2205_v47 = vsub.f32 1.0, %v2189_v30 }
 0x4ee   : > { %2367 = vmatpush1.bf16.msra.mxu1 %v2352_v31  ;;  %v2329_v40 = vmax.f32 %v2313_v44, 0.0  ;;  %v2296_v50 = vand.u32 2147483647, %v2280_v14  ;;  %v8419_v0 = vsub.f32 1.0, %v8368_v11  ;;  %v8420_v9 = vsub.f32 1.0, %v7005_v63 }
 0x4ef   : > { %v2343_v28 = vmul.f32 %v2327_v10, %v2220_v59  ;;  %v2310_v5 = vsub.f32 1.0, %v2294_v34  ;;  %v8421_v19 = vsub.f32 1.0, %v6687_v43  ;;  %v8422_v12 = vsub.f32 1.0, %v6986_v56 }
 0x4f0   : > { %v3184_v18 = vmax.f32 %v8419_v0, 0.0  ;;  %v3186_v46 = vmax.f32 %v8420_v9, 0.0  ;;  %v2345_v25 = vmul.f32 %v2329_v40, %v2222_v45  ;;  %v2312_v57 = vsub.f32 1.0, %v2296_v50 }
 0x4f1   : > { %v2791_v35 = vmax.f32 %v8421_v19, 0.0  ;;  %v3183_v27 = vmax.f32 %v8422_v12, 0.0  ;;  %v8423_v62 = vsub.f32 1.0, %v8369_v23  ;;  %v2219_v36 = vmax.f32 %v2203_v58, 0.0  ;;  %v8426_v23 = vld [vmem:[#allocation4_spill] sm:$0xff]  ;;  %v8436_v12 = vld [vmem:[#allocation114_spill] sm:$0xff] }
 0x4f2   : > { %v2326_v26 = vmax.f32 %v2310_v5, 0.0  ;;  %v3326_v11 = vpack.c.bf16 %v7238_v61, %v7440_v29  ;;  %v8424_v63 = vsub.f32 1.0, %v7017_v3  ;;  %v2355_v49 = vpack.c.bf16 %v2345_v25, %v2343_v28 }
 0x4f3   : > { %v3185_v33 = vmax.f32 %v8423_v62, 0.0  ;;  %v2221_v41 = vmax.f32 %v2205_v47, 0.0  ;;  %v2328_v43 = vmax.f32 %v2312_v57, 0.0  ;;  %v8425_v52 = vsub.f32 1.0, %v7027_v2 }
 0x4f4   : > { %v3188_v13 = vmax.f32 %v8424_v63, 0.0  ;;  %v3248_v32 = vmul.f32 %v3184_v18, %v7372_v53  ;;  %v3250_v20 = vmul.f32 %v3186_v46, %v2791_v35  ;;  %v2342_v31 = vmul.f32 %v2326_v26, %v2219_v36  ;;  %2368 = vmatprep.subr.bf16.mxu1 %v2355_v49 }
 0x4f5   : > { %v3190_v56 = vmax.f32 %v8425_v52, 0.0  ;;  %v3154_v44 = vsub.f32 1.0, %v8426_v23  ;;  %v8427_v30 = vsub.f32 1.0, %v6668_v60  ;;  %v8428_v59 = vsub.f32 1.0, %v8341_v38 }
 0x4f6   : > { %v2344_v3 = vmul.f32 %v2328_v43, %v2221_v41  ;;  %v8429_v58 = vsub.f32 1.0, %v8344_v1  ;;  %v8430_v2 = vsub.f32 1.0, %v6707_v42  ;;  %v8431_v53 = vsub.f32 1.0, %v8370_v37  ;;  %v8435_v42 = vld [vmem:[#allocation113_spill] sm:$0xff] }
 0x4f7   : > { %v2788_v14 = vmax.f32 %v8427_v30, 0.0  ;;  %v2790_v10 = vmax.f32 %v8428_v59, 0.0  ;;  %v8432_v47 = vsub.f32 1.0, %v8371_v7  ;;  %v8433_v60 = vsub.f32 1.0, %v7039_v16  ;;  %v8450_v59 = vld [vmem:[#allocation40_spill] sm:$0xff] }
 0x4f8   : > { %v2793_v34 = vmax.f32 %v8429_v58, 0.0  ;;  %v2795_v45 = vmax.f32 %v8430_v2, 0.0  ;;  %v3187_v40 = vmax.f32 %v8431_v53, 0.0  ;;  %v2354_v9 = vpack.c.bf16 %v2344_v3, %v2342_v31 }
 0x4f9   : > { %v3189_v50 = vmax.f32 %v8432_v47, 0.0  ;;  %v3192_v0 = vmax.f32 %v8433_v60, 0.0  ;;  %v3247_v18 = vmul.f32 %v3183_v27, %v2788_v14  ;;  %v3249_v38 = vmul.f32 %v3185_v33, %v2790_v10  ;;  %v8449_v14 = vld [vmem:[#allocation7_spill] sm:$0xff] }
 0x4fa   : > { %v8434_v46 = vsub.f32 1.0, %v7051_v51  ;;  %v3252_v1 = vmul.f32 %v3188_v13, %v2793_v34  ;;  %v3254_v5 = vmul.f32 %v3190_v56, %v2795_v45  ;;  %v3316_v19 = vpack.c.bf16 %v3250_v20, %v3248_v32  ;;  %2369 = vmatpush1.bf16.msra.mxu1 %v2354_v9  ;;  %v8446_v20 = vld [vmem:[#allocation10_spill] sm:$0xff] }
 0x4fb   : > { %v3155_v35 = vsub.f32 1.0, %v8435_v42  ;;  %v3156_v37 = vsub.f32 1.0, %v8436_v12  ;;  %v8437_v25 = vsub.f32 1.0, %v6692_v15  ;;  %v8438_v57 = vsub.f32 1.0, %v8345_v17  ;;  %v8569_v12 = vld [vmem:[#allocation87_spill] sm:$0xff] }
 0x4fc   : > { %v3194_v28 = vmax.f32 %v8434_v46, 0.0  ;;  %v8439_v27 = vsub.f32 1.0, %v6719_v55  ;;  %v8440_v51 = vsub.f32 1.0, %v6729_v22  ;;  %v8441_v36 = vsub.f32 1.0, %v7034_v4  ;;  %3347 = vmatprep.subr.bf16.mxu1 %v3316_v19  ;;  %v8445_v22 = vld [vmem:[#allocation9_spill] sm:$0xff] }
 0x4fd   : > { %v2792_v7 = vmax.f32 %v8437_v25, 0.0  ;;  %v2794_v16 = vmax.f32 %v8438_v57, 0.0  ;;  %v8442_v63 = vsub.f32 1.0, %v8372_v48  ;;  %v8443_v15 = vsub.f32 1.0, %v8374_v24  ;;  %v8448_v48 = vld [vmem:[#allocation30_spill] sm:$0xff]  ;;  %v8463_v19 = vld [vmem:[#allocation105_spill] sm:$0xff] }
 0x4fe   : > { %v2797_v62 = vmax.f32 %v8439_v27, 0.0  ;;  %v2799_v33 = vmax.f32 %v8440_v51, 0.0  ;;  %v3191_v26 = vmax.f32 %v8441_v36, 0.0  ;;  %v3315_v43 = vpack.c.bf16 %v3249_v38, %v3247_v18  ;;  %v8459_v18 = vld [vmem:[#allocation100_spill] sm:$0xff]  ;;  %v8468_v36 = vld [vmem:[#allocation53_spill] sm:$0xff] }
 0x4ff   : > { %v3193_v13 = vmax.f32 %v8442_v63, 0.0  ;;  %v3196_v49 = vmax.f32 %v8443_v15, 0.0  ;;  %v3251_v41 = vmul.f32 %v3187_v40, %v2792_v7  ;;  %v3253_v17 = vmul.f32 %v3189_v50, %v2794_v16  ;;  %v8457_v50 = vld [vmem:[#allocation97_spill] sm:$0xff]  ;;  %v8465_v16 = vld [vmem:[#allocation34_spill] sm:$0xff] }
 0x500   : > { %v8444_v52 = vsub.f32 1.0, %v8376_v39  ;;  %v3256_v56 = vmul.f32 %v3192_v0, %v2797_v62  ;;  %v3258_v32 = vmul.f32 %v3194_v28, %v2799_v33  ;;  %v8447_v31 = vpack.c.bf16 %v8445_v22, %v8446_v20  ;;  %v8466_v62 = vld [vmem:[#allocation6_spill] sm:$0xff] }
 0x501   : > { %v3318_v4 = vpack.c.bf16 %v3254_v5, %v3252_v1  ;;  %v3157_v30 = vsub.f32 1.0, %v8448_v48  ;;  %v8451_v24 = vsub.f32 %v8449_v14, %v8450_v59  ;;  %v8452_v3 = vsub.f32 1.0, %v8346_v6  ;;  %v8461_v6 = vld [vmem:[#allocation103_spill] sm:$0xff]  ;;  %v8477_v20 = vld [vmem:[#allocation102_spill] sm:$0xff]  ;;  %v8574_v48 = vld [vmem:[#allocation88_spill] sm:$0xff] }
 0x502   : > { %v3198_v55 = vmax.f32 %v8444_v52, 0.0  ;;  %3971 = vmatmul.mubr.msk.bf16.vlgmr.msra.gmra.mrb[12].mxu1 %vm582_vm1, %v8447_v31  ;;  %v8453_v39 = vsub.f32 1.0, %v8347_v8  ;;  %v8454_v2 = vmov 0   ;;  %v8455_v45 = vsub.f32 1.0, %v6745_v21 }
 0x503   : > { %v2714_v10 = vand.u32 2147483647, %v8451_v24  ;;  %v2796_v58 = vmax.f32 %v8452_v3, 0.0  ;;  %3348 = vmatpush1.bf16.msra.mxu1 %v3315_v43  ;;  %2404 = vmatprep.mubr.bf16.mxu1 %v8454_v2  ;;  %v8456_v40 = vsub.f32 1.0, %v6757_v54  ;;  %v8458_v60 = vsub.f32 1.0, %v8457_v50  ;;  %v8470_v43 = vld [vmem:[#allocation55_spill] sm:$0xff] }
 0x504   : > { %v2798_v34 = vmax.f32 %v8453_v39, 0.0  ;;  %v2801_v53 = vmax.f32 %v8455_v45, 0.0  ;;  %v8460_v38 = vsub.f32 1.0, %v8459_v18  ;;  %3349 = vmatprep.subr.bf16.mxu1 %v3318_v4  ;;  %v8462_v46 = vsub.f32 1.0, %v8461_v6  ;;  %v8484_v18 = vld [vmem:[#allocation115_spill] sm:$0xff] }
 0x505   : > { %v2803_v47 = vmax.f32 %v8456_v40, 0.0  ;;  %v3195_v0 = vmax.f32 %v8458_v60, 0.0  ;;  %v3255_v28 = vmul.f32 %v3191_v26, %v2796_v58  ;;  %v3317_v5 = vpack.c.bf16 %v3253_v17, %v3251_v41  ;;  %v8473_v17 = vld [vmem:[#allocation57_spill] sm:$0xff]  ;;  %v8481_v40 = vld [vmem:[#allocation11_spill] sm:$0xff] }
 0x506   : > { %v3197_v9 = vmax.f32 %v8460_v38, 0.0  ;;  %v3200_v8 = vmax.f32 %v8462_v46, 0.0  ;;  %v3257_v1 = vmul.f32 %v3193_v13, %v2798_v34  ;;  %v8464_v25 = vsub.f32 1.0, %v8463_v19  ;;  %v8472_v13 = vld [vmem:[#allocation31_spill] sm:$0xff]  ;;  %v8485_v46 = vld [vmem:[#allocation56_spill] sm:$0xff] }
 0x507   : > { %v3260_v7 = vmul.f32 %v3196_v49, %v2801_v53  ;;  %v3262_v57 = vmul.f32 %v3198_v55, %v2803_v47  ;;  %v3320_v54 = vpack.c.bf16 %v3258_v32, %v3256_v56  ;;  %v3158_v27 = vsub.f32 1.0, %v8465_v16  ;;  %3350 = vmatpush1.bf16.msra.mxu1 %v3317_v5  ;;  %v8475_v55 = vld [vmem:[#allocation59_spill] sm:$0xff]  ;;  %v8482_v47 = vld [vmem:[#allocation12_spill] sm:$0xff] }
 0x508   : > { %v3202_v21 = vmax.f32 %v8464_v25, 0.0  ;;  %v8467_v51 = vsub.f32 %v8466_v62, %v8450_v59  ;;  %v8469_v63 = vsub.f32 1.0, %v8468_v36  ;;  %v8471_v52 = vsub.f32 1.0, %v8470_v43  ;;  %v8479_v59 = vld [vmem:[#allocation104_spill] sm:$0xff]  ;;  %v8487_v25 = vld [vmem:[#allocation58_spill] sm:$0xff] }
 0x509   : > { %v8474_v22 = vsub.f32 1.0, %v8473_v17  ;;  %v8476_v56 = vsub.f32 1.0, %v8475_v55  ;;  %v8478_v31 = vsub.f32 1.0, %v8477_v20  ;;  %3351 = vmatprep.subr.bf16.mxu1 %v3320_v54  ;;  %v8480_v24 = vsub.f32 1.0, %v8479_v59  ;;  %v8493_v36 = vld [vmem:[#allocation36_spill] sm:$0xff] }
 0x50a   : > { %v2715_v33 = vand.u32 2147483647, %v8467_v51  ;;  %v2800_v15 = vmax.f32 %v8469_v63, 0.0  ;;  %v2802_v26 = vmax.f32 %v8471_v52, 0.0  ;;  %v3319_v34 = vpack.c.bf16 %v3257_v1, %v3255_v28  ;;  %v8491_v28 = vld [vmem:[#allocation117_spill] sm:$0xff] }
 0x50b   : > { %v2805_v49 = vmax.f32 %v8474_v22, 0.0  ;;  %v2807_v32 = vmax.f32 %v8476_v56, 0.0  ;;  %v3199_v4 = vmax.f32 %v8478_v31, 0.0  ;;  %v3201_v3 = vmax.f32 %v8480_v24, 0.0  ;;  %v8499_v31 = vld [vmem:[#allocation25_spill] sm:$0xff] }
 0x50c   : > { %v3259_v58 = vmul.f32 %v3195_v0, %v2800_v15  ;;  %v3261_v39 = vmul.f32 %v3197_v9, %v2802_v26  ;;  %v2778_v2 = vsub.f32 1.0, %v2714_v10  ;;  %v8483_v50 = vpack.c.bf16 %v8481_v40, %v8482_v47  ;;  %3352 = vmatpush1.bf16.msra.mxu1 %v3319_v34  ;;  %v8489_v9 = vld [vmem:[#allocation2_spill] sm:$0xff]  ;;  %v8490_v10 = vld [vmem:[#allocation41_spill] sm:$0xff]  ;;  %v8495_v26 = vld [vmem:[#allocation107_spill] sm:$0xff] }
 0x50d   : > { %v3264_v45 = vmul.f32 %v3200_v8, %v2805_v49  ;;  %v3266_v53 = vmul.f32 %v3202_v21, %v2807_v32  ;;  %v3322_v60 = vpack.c.bf16 %v3262_v57, %v3260_v7  ;;  %v3160_v38 = vsub.f32 1.0, %v8484_v18  ;;  %v8492_v21 = vld [vmem:[#allocation118_spill] sm:$0xff]  ;;  %v8494_v57 = vld [vmem:[#allocation119_spill] sm:$0xff]  ;;  %v8497_v49 = vld [vmem:[#allocation109_spill] sm:$0xff] }
 0x50e   : > { %3972 = vmatmul.mubr.msk.bf16.gmra.mrb[16].mxu1 %vm582_vm1, %v8483_v50  ;;  %v2779_v6 = vsub.f32 1.0, %v2715_v33  ;;  %v8486_v5 = vsub.f32 1.0, %v8485_v46  ;;  %v8488_v54 = vsub.f32 1.0, %v8487_v25  ;;  %v3321_v43 = vpack.c.bf16 %v3261_v39, %v3259_v58  ;;  %v8501_v34 = vld [vmem:[#allocation62_spill] sm:$0xff]  ;;  %v8505_v39 = vld [vmem:[#allocation64_spill] sm:$0xff]  ;;  %v8545_v7 = vld [vmem:[#allocation79_spill] sm:$0xff] }
 0x50f   : > { %3379 = vmatprep.mubr.bf16.mxu1 %v8489_v9  ;;  %3353 = vmatprep.subr.bf16.mxu1 %v3322_v60  ;;  %v7555_v52 = vmax.f32 %v2778_v2, 0.0  ;;  %v8496_v17 = vsub.f32 1.0, %v8495_v26  ;;  %v8498_v55 = vsub.f32 1.0, %v8497_v49  ;;  %v3324_v32 = vpack.c.bf16 %v3266_v53, %v3264_v45  ;;  %v8507_v60 = vld [vmem:[#allocation65_spill] sm:$0xff] }
 0x510   : > { %v2804_v19 = vmax.f32 %v8486_v5, 0.0  ;;  %v2806_v0 = vmax.f32 %v8488_v54, 0.0  ;;  %v7561_v20 = vmax.f32 %v2779_v6, 0.0  ;;  %v8500_v59 = vsub.f32 1.0, %v8499_v31  ;;  %3354 = vmatpush1.bf16.msra.mxu1 %v3321_v43  ;;  %v8511_v6 = vld [vmem:[#allocation67_spill] sm:$0xff]  ;;  %v8517_v43 = vld [vmem:[#allocation108_spill] sm:$0xff] }
 0x511   : > { %v3208_v22 = vmax.f32 %v8496_v17, 0.0  ;;  %v3210_v56 = vmax.f32 %v8498_v55, 0.0  ;;  %v8502_v40 = vsub.f32 1.0, %v8501_v34  ;;  %v8506_v2 = vsub.f32 1.0, %v8505_v39  ;;  %3355 = vmatprep.subr.bf16.mxu1 %v3324_v32  ;;  %v8515_v17 = vld [vmem:[#allocation106_spill] sm:$0xff]  ;;  %v8521_v39 = vld [vmem:[#allocation21_spill] sm:$0xff] }
 0x512   : > { %v3263_v63 = vmul.f32 %v3199_v4, %v2804_v19  ;;  %v3265_v15 = vmul.f32 %v3201_v3, %v2806_v0  ;;  %v2812_v24 = vmax.f32 %v8500_v59, 0.0  ;;  %v8503_v4 = vld [vmem:[#allocation63_spill] sm:$0xff]  ;;  %v8508_v46 = vsub.f32 1.0, %v8507_v60  ;;  %v8509_v19 = vld [vmem:[#allocation66_spill] sm:$0xff]  ;;  %v8513_v0 = vld [vmem:[#allocation68_spill] sm:$0xff] }
 0x513   : > { %v2813_v47 = vmax.f32 %v8502_v40, 0.0  ;;  %v8504_v3 = vsub.f32 1.0, %v8503_v4  ;;  %v2815_v50 = vmax.f32 %v8506_v2, 0.0  ;;  %v8510_v45 = vsub.f32 1.0, %v8509_v19  ;;  %v8519_v40 = vld [vmem:[#allocation33_spill] sm:$0xff] }
 0x514   : > { %v2816_v5 = vmax.f32 %v8508_v46, 0.0  ;;  %v8512_v25 = vsub.f32 1.0, %v8511_v6  ;;  %v8514_v9 = vsub.f32 1.0, %v8513_v0  ;;  %v8516_v49 = vsub.f32 1.0, %v8515_v17  ;;  %v8527_v17 = vld [vmem:[#allocation72_spill] sm:$0xff] }
 0x515   : > { %v2814_v58 = vmax.f32 %v8504_v3, 0.0  ;;  %v2817_v53 = vmax.f32 %v8510_v45, 0.0  ;;  %v8518_v31 = vsub.f32 1.0, %v8517_v43  ;;  %v3323_v34 = vpack.c.bf16 %v3265_v15, %v3263_v63  ;;  %v8523_v45 = vld [vmem:[#allocation70_spill] sm:$0xff]  ;;  %v8529_v43 = vld [vmem:[#allocation73_spill] sm:$0xff] }
 0x516   : > { %v2818_v54 = vmax.f32 %v8512_v25, 0.0  ;;  %v2819_v26 = vmax.f32 %v8514_v9, 0.0  ;;  %v3207_v55 = vmax.f32 %v8516_v49, 0.0  ;;  %v8520_v4 = vsub.f32 1.0, %v8519_v40  ;;  %v8525_v25 = vld [vmem:[#allocation71_spill] sm:$0xff]  ;;  %v8531_v15 = vld [vmem:[#allocation74_spill] sm:$0xff] }
 0x517   : > { %v3209_v59 = vmax.f32 %v8518_v31, 0.0  ;;  %v8522_v2 = vsub.f32 1.0, %v8521_v39  ;;  %v3272_v46 = vmul.f32 %v3208_v22, %v2813_v47  ;;  %v3274_v19 = vmul.f32 %v3210_v56, %v2815_v50  ;;  %3356 = vmatpush1.bf16.msra.mxu1 %v3323_v34  ;;  %v8533_v39 = vld [vmem:[#allocation75_spill] sm:$0xff]  ;;  %v8535_v56 = vld [vmem:[#allocation77_spill] sm:$0xff] }
 0x518   : > { %v3212_v3 = vmax.f32 %v8520_v4, 0.0  ;;  %v8524_v32 = vsub.f32 1.0, %v8523_v45  ;;  %v8526_v0 = vsub.f32 1.0, %v8525_v25  ;;  %v8528_v49 = vsub.f32 1.0, %v8527_v17  ;;  %v8537_v45 = vld [vmem:[#allocation22_spill] sm:$0xff]  ;;  %3357 = vmatprep.subr.bf16.mxu1 %v3326_v11  ;;  %v8541_v34 = vld [vmem:[#allocation111_spill] sm:$0xff] }
 0x519   : > { %v3214_v60 = vmax.f32 %v8522_v2, 0.0  ;;  %v8530_v31 = vsub.f32 1.0, %v8529_v43  ;;  %v8532_v40 = vsub.f32 1.0, %v8531_v15  ;;  %v8534_v2 = vsub.f32 1.0, %v8533_v39  ;;  %v8547_v11 = vld [vmem:[#allocation80_spill] sm:$0xff] }
 0x51a   : > { %v2820_v6 = vmax.f32 %v8524_v32, 0.0  ;;  %v2821_v9 = vmax.f32 %v8526_v0, 0.0  ;;  %v2822_v33 = vmax.f32 %v8528_v49, 0.0  ;;  %v8536_v47 = vsub.f32 1.0, %v8535_v56  ;;  %v8539_v0 = vld [vmem:[#allocation110_spill] sm:$0xff] }
 0x51b   : > { %v2823_v63 = vmax.f32 %v8530_v31, 0.0  ;;  %v2824_v4 = vmax.f32 %v8532_v40, 0.0  ;;  %v2825_v22 = vmax.f32 %v8534_v2, 0.0  ;;  %v8538_v32 = vsub.f32 1.0, %v8537_v45  ;;  %v8543_v45 = vld [vmem:[#allocation78_spill] sm:$0xff] }
 0x51c   : > { %v2826_v50 = vmax.f32 %v8536_v47, 0.0  ;;  %v8540_v17 = vsub.f32 1.0, %v8539_v0  ;;  %v8542_v43 = vsub.f32 1.0, %v8541_v34  ;;  %v3271_v15 = vmul.f32 %v3207_v55, %v2812_v24  ;;  %v8549_v34 = vld [vmem:[#allocation81_spill] sm:$0xff]  ;;  %v8552_v55 = vld [vmem:[#allocation120_spill] sm:$0xff] }
 0x51d   : > { %v3211_v25 = vmax.f32 %v8538_v32, 0.0  ;;  %v3273_v40 = vmul.f32 %v3209_v59, %v2814_v58  ;;  %v3218_v39 = vmax.f32 %v3154_v44, 0.0  ;;  %v3276_v2 = vmul.f32 %v3212_v3, %v2817_v53  ;;  %v8551_v58 = vld [vmem:[#allocation116_spill] sm:$0xff]  ;;  %v8554_v44 = vld [vmem:[#allocation82_spill] sm:$0xff]  ;;  %v8556_v59 = vld [vmem:[#allocation27_spill] sm:$0xff] }
 0x51e   : > { %v3213_v49 = vmax.f32 %v8540_v17, 0.0  ;;  %v3216_v31 = vmax.f32 %v8542_v43, 0.0  ;;  %v3278_v56 = vmul.f32 %v3214_v60, %v2819_v26  ;;  %v3328_v47 = vpack.c.bf16 %v3274_v19, %v3272_v46  ;;  %v8558_v46 = vld [vmem:[#allocation112_spill] sm:$0xff] }
 0x51f   : > { %v8544_v32 = vsub.f32 1.0, %v8543_v45  ;;  %v8546_v61 = vsub.f32 1.0, %v8545_v7  ;;  %v8548_v0 = vsub.f32 1.0, %v8547_v11  ;;  %v8550_v43 = vsub.f32 1.0, %v8549_v34  ;;  %v8560_v45 = vld [vmem:[#allocation38_spill] sm:$0xff] }
 0x520   : > { %v8553_v23 = vpack.c.bf16 %v8551_v58, %v8552_v55  ;;  %v8555_v53 = vsub.f32 1.0, %v8554_v44  ;;  %v8557_v3 = vsub.f32 1.0, %v8556_v59  ;;  %v8559_v7 = vsub.f32 1.0, %v8558_v46  ;;  %v8563_v59 = vld [vmem:[#allocation83_spill] sm:$0xff] }
 0x521   : > { %v2827_v51 = vmax.f32 %v8544_v32, 0.0  ;;  %v7616_v29 = vmax.f32 %v8546_v61, 0.0  ;;  %v2829_v17 = vmax.f32 %v8548_v0, 0.0  ;;  %v2830_v24 = vmax.f32 %v8550_v43, 0.0  ;;  %v8561_v32 = vld [vmem:[#allocation46_spill] sm:$0xff] }
 0x522   : > { %3358 = vmatpush1.bf16.msra.mxu1 %v8553_v23  ;;  %v2831_v26 = vmax.f32 %v8555_v53, 0.0  ;;  %v3215_v60 = vmax.f32 %v8557_v3, 0.0  ;;  %v3217_v19 = vmax.f32 %v8559_v7, 0.0  ;;  %v8562_v61 = vsub.f32 %v8560_v45, %v8561_v32  ;;  %v8565_v7 = vld [vmem:[#allocation84_spill] sm:$0xff] }
 0x523   : > { %3359 = vmatprep.subr.bf16.mxu1 %v3328_v47  ;;  %v3220_v0 = vmax.f32 %v3156_v37, 0.0  ;;  %v3275_v34 = vmul.f32 %v3211_v25, %v2816_v5  ;;  %v3277_v43 = vmul.f32 %v3213_v49, %v2818_v54  ;;  %v3327_v58 = vpack.c.bf16 %v3273_v40, %v3271_v15  ;;  %v8571_v54 = vld [vmem:[#allocation39_spill] sm:$0xff] }
 0x524   : > { %v3105_v11 = vand.u32 2147483647, %v8562_v61  ;;  %v3222_v55 = vmax.f32 %v3158_v27, 0.0  ;;  %v3280_v23 = vmul.f32 %v3216_v31, %v2821_v9  ;;  %v3282_v44 = vmul.f32 %v3218_v39, %v2823_v63  ;;  %v8567_v61 = vld [vmem:[#allocation85_spill] sm:$0xff] }
 0x525   : > { %v3330_v53 = vpack.c.bf16 %v3278_v56, %v3276_v2  ;;  %v8564_v3 = vsub.f32 1.0, %v8563_v59  ;;  %v8566_v8 = vsub.f32 1.0, %v8565_v7  ;;  %v8568_v47 = vsub.f32 1.0, %v8567_v61  ;;  %v8586_v61 = vld [vmem:[#allocation90_spill] sm:$0xff] }
 0x526   : > { %v8570_v37 = vsub.f32 1.0, %v8569_v12  ;;  %3360 = vmatpush1.bf16.msra.mxu1 %v3327_v58  ;;  %v3219_v16 = vmax.f32 %v3155_v35, 0.0  ;;  %v3221_v27 = vmax.f32 %v3157_v30, 0.0  ;;  %v8572_v9 = vsub.f32 %v8571_v54, %v8561_v32  ;;  %v8576_v58 = vld [vmem:[#allocation89_spill] sm:$0xff] }
 0x527   : > { %v2835_v46 = vmax.f32 %v8564_v3, 0.0  ;;  %v2836_v41 = vmax.f32 %v8566_v8, 0.0  ;;  %v2837_v1 = vmax.f32 %v8568_v47, 0.0  ;;  %v3169_v25 = vsub.f32 1.0, %v3105_v11  ;;  %3361 = vmatprep.subr.bf16.mxu1 %v3330_v53 }
 0x528   : > { %v2838_v5 = vmax.f32 %v8570_v37, 0.0  ;;  %v3106_v63 = vand.u32 2147483647, %v8572_v9  ;;  %v3224_v8 = vmax.f32 %v3160_v38, 0.0  ;;  %v3279_v49 = vmul.f32 %v3215_v60, %v2820_v6  ;;  %v8581_v60 = vld [vmem:[#allocation42_spill] sm:$0xff] }
 0x529   : > { %v3281_v31 = vmul.f32 %v3217_v19, %v2822_v33  ;;  %v3329_v15 = vpack.c.bf16 %v3277_v43, %v3275_v34  ;;  %v8573_v40 = vsub.f32 1.0, %v8491_v28  ;;  %v3284_v42 = vmul.f32 %v3220_v0, %v2825_v22 }
 0x52a   : > { %v3286_v35 = vmul.f32 %v3222_v55, %v2827_v51  ;;  %v3332_v2 = vpack.c.bf16 %v3282_v44, %v3280_v23  ;;  %v8575_v30 = vsub.f32 1.0, %v8574_v48  ;;  %v8577_v32 = vsub.f32 1.0, %v8576_v58 }
 0x52b   : > { %v3226_v39 = vmax.f32 %v8573_v40, 0.0  ;;  %v8578_v11 = vsub.f32 1.0, %v8472_v13  ;;  %v8579_v38 = vsub.f32 1.0, %v8490_v10  ;;  %3362 = vmatpush1.bf16.msra.mxu1 %v3329_v15  ;;  %v8580_v28 = vsub.f32 1.0, %v8493_v36  ;;  %v8583_v13 = vld [vmem:[#allocation60_spill] sm:$0xff] }
 0x52c   : > { %v2839_v56 = vmax.f32 %v8575_v30, 0.0  ;;  %v7661_v59 = vmax.f32 %v8577_v32, 0.0  ;;  %v3170_v22 = vsub.f32 1.0, %v3106_v63  ;;  %v3233_v51 = vmax.f32 %v3169_v25, 0.0  ;;  %3363 = vmatprep.subr.bf16.mxu1 %v3332_v2  ;;  %v8591_v15 = vld [vmem:[#allocation76_spill] sm:$0xff]  ;;  %v8595_v30 = vld [vmem:[#allocation43_spill] sm:$0xff] }
 0x52d   : > { %v3223_v18 = vmax.f32 %v8578_v11, 0.0  ;;  %v3225_v33 = vmax.f32 %v8579_v38, 0.0  ;;  %v3231_v6 = vmax.f32 %v8580_v28, 0.0  ;;  %v8582_v19 = vsub.f32 %v8571_v54, %v8581_v60 }
 0x52e   : > { %v3283_v34 = vmul.f32 %v3219_v16, %v2824_v4  ;;  %v3285_v43 = vmul.f32 %v3221_v27, %v2826_v50  ;;  %v3331_v55 = vpack.c.bf16 %v3281_v31, %v3279_v49  ;;  %v8584_v23 = vsub.f32 %v8571_v54, %v8583_v13 }
 0x52f   : > { %v3110_v0 = vand.u32 2147483647, %v8582_v19  ;;  %v8585_v10 = vsub.f32 1.0, %v8492_v21  ;;  %v3288_v3 = vmul.f32 %v3224_v8, %v2829_v17  ;;  %v3290_v36 = vmul.f32 %v3226_v39, %v2831_v26 }
 0x530   : > { %v3108_v44 = vand.u32 2147483647, %v8584_v23  ;;  %v3334_v7 = vpack.c.bf16 %v3286_v35, %v3284_v42  ;;  %v8587_v47 = vsub.f32 1.0, %v8586_v61  ;;  %v8588_v37 = vsub.f32 1.0, %v8494_v57  ;;  %3364 = vmatpush1.bf16.msra.mxu1 %v3331_v55  ;;  %v8593_v42 = vld [vmem:[#allocation54_spill] sm:$0xff]  ;;  %v8602_v55 = vld [vmem:[#allocation47_spill] sm:$0xff] }
 0x531   : > { %v3230_v53 = vmax.f32 %v8585_v10, 0.0  ;;  %v8589_v4 = vsub.f32 %v8560_v45, %v8581_v60  ;;  %v8590_v16 = vsub.f32 %v8560_v45, %v8583_v13  ;;  %v3234_v21 = vmax.f32 %v3170_v22, 0.0  ;;  %v8605_v61 = vld [vmem:[#allocation69_spill] sm:$0xff] }
 0x532   : > { %v7679_v12 = vmax.f32 %v8587_v47, 0.0  ;;  %v3232_v9 = vmax.f32 %v8588_v37, 0.0  ;;  %v7689_v17 = vmul.f32 %v3231_v6, %v2836_v41  ;;  %v7691_v26 = vmul.f32 %v3233_v51, %v2838_v5  ;;  %3365 = vmatprep.subr.bf16.mxu1 %v3334_v7 }
 0x533   : > { %v3109_v50 = vand.u32 2147483647, %v8589_v4  ;;  %v3107_v27 = vand.u32 2147483647, %v8590_v16  ;;  %v3174_v63 = vsub.f32 1.0, %v3110_v0  ;;  %v3287_v25 = vmul.f32 %v3223_v18, %v7616_v29  ;;  %v8609_v16 = vld [vmem:[#allocation52_spill] sm:$0xff] }
 0x534   : > { %v3289_v57 = vmul.f32 %v3225_v33, %v2830_v24  ;;  %v3333_v8 = vpack.c.bf16 %v3285_v43, %v3283_v34  ;;  %v3172_v49 = vsub.f32 1.0, %v3108_v44  ;;  %v3294_v31 = vmul.f32 %v3230_v53, %v2835_v46 }
 0x535   : > { %v8592_v40 = vsub.f32 %v8571_v54, %v8591_v15  ;;  %v8594_v35 = vsub.f32 %v8571_v54, %v8593_v42  ;;  %v3336_v41 = vpack.c.bf16 %v3290_v36, %v3288_v3  ;;  %v3173_v48 = vsub.f32 1.0, %v3109_v50  ;;  %v8603_v3 = vld [vmem:[#allocation92_spill] sm:$0xff] }
 0x536   : > { %v3171_v5 = vsub.f32 1.0, %v3107_v27  ;;  %v8596_v58 = vsub.f32 %v8449_v14, %v8595_v30  ;;  %v8597_v29 = vsub.f32 %v8466_v62, %v8595_v30  ;;  %3366 = vmatpush1.bf16.msra.mxu1 %v3333_v8  ;;  %v3298_v46 = vmul.f32 %v3234_v21, %v2839_v56  ;;  %v8600_v56 = vld [vmem:[#allocation99_spill] sm:$0xff] }
 0x537   : > { %v3114_v39 = vand.u32 2147483647, %v8592_v40  ;;  %v3112_v2 = vand.u32 2147483647, %v8594_v35  ;;  %v3339_v11 = vpack.c.bf16 %v7691_v26, %v7689_v17  ;;  %v3296_v18 = vmul.f32 %v3232_v9, %v2837_v1  ;;  %3367 = vmatprep.subr.bf16.mxu1 %v3336_v41  ;;  %v8607_v9 = vld [vmem:[#allocation86_spill] sm:$0xff]  ;;  %v8615_v35 = vld [vmem:[#allocation44_spill] sm:$0xff] }
 0x538   : > { %v2718_v32 = vand.u32 2147483647, %v8596_v58  ;;  %v2719_v24 = vand.u32 2147483647, %v8597_v29  ;;  %v3238_v38 = vmax.f32 %v3174_v63, 0.0  ;;  %v3335_v33 = vpack.c.bf16 %v3289_v57, %v3287_v25  ;;  %v8617_v30 = vld [vmem:[#allocation51_spill] sm:$0xff] }
 0x539   : > { %v3236_v28 = vmax.f32 %v3172_v49, 0.0  ;;  %v8598_v6 = vsub.f32 %v8560_v45, %v8591_v15  ;;  %v8599_v51 = vsub.f32 %v8560_v45, %v8593_v42  ;;  %v3178_v19 = vsub.f32 1.0, %v3114_v39  ;;  %v8614_v42 = vld [vmem:[#allocation45_spill] sm:$0xff] }
 0x53a   : > { %v3176_v0 = vsub.f32 1.0, %v3112_v2  ;;  %v8601_v34 = vsub.f32 %v8571_v54, %v8600_v56  ;;  %v3338_v1 = vpack.c.bf16 %v3294_v31, %v8602_v55  ;;  %v3237_v13 = vmax.f32 %v3173_v48, 0.0  ;;  %3368 = vmatpush1.bf16.msra.mxu1 %v3335_v33 }
 0x53b   : > { %v3113_v22 = vand.u32 2147483647, %v8598_v6  ;;  %v3111_v60 = vand.u32 2147483647, %v8599_v51  ;;  %v3235_v23 = vmax.f32 %v3171_v5, 0.0  ;;  %v2782_v44 = vsub.f32 1.0, %v2718_v32 }
 0x53c   : > { %v3118_v43 = vand.u32 2147483647, %v8601_v34  ;;  %v2783_v10 = vsub.f32 1.0, %v2719_v24  ;;  %v3302_v53 = vmul.f32 %v3238_v38, %v7561_v20  ;;  %v8604_v36 = vsub.f32 %v8571_v54, %v8603_v3  ;;  %3369 = vmatprep.subr.bf16.mxu1 %v3338_v1 }
 0x53d   : > { %v8606_v47 = vsub.f32 %v8466_v62, %v8605_v61  ;;  %v8608_v4 = vsub.f32 %v8466_v62, %v8607_v9  ;;  %v3300_v27 = vmul.f32 %v3236_v28, %v8609_v16  ;;  %v3177_v21 = vsub.f32 1.0, %v3113_v22 }
 0x53e   : > { %v3116_v7 = vand.u32 2147483647, %v8604_v36  ;;  %v3175_v17 = vsub.f32 1.0, %v3111_v60  ;;  %v8610_v20 = vsub.f32 %v8560_v45, %v8600_v56  ;;  %v3242_v63 = vmax.f32 %v3178_v19, 0.0  ;;  %v8618_v36 = vld [vmem:[#allocation3_spill] sm:$0xff] }
 0x53f   : > { %v2721_v37 = vand.u32 2147483647, %v8606_v47  ;;  %v2723_v50 = vand.u32 2147483647, %v8608_v4  ;;  %v3240_v54 = vmax.f32 %v3176_v0, 0.0  ;;  %v3182_v25 = vsub.f32 1.0, %v3118_v43 }
 0x540   : > { %v3117_v26 = vand.u32 2147483647, %v8610_v20  ;;  %v3340_v57 = vpack.c.bf16 %v3298_v46, %v3296_v18  ;;  %v3301_v8 = vmul.f32 %v3237_v13, %v7555_v52  ;;  %v8611_v49 = vsub.f32 %v8560_v45, %v8603_v3 }
 0x541   : > { %v8612_v31 = vsub.f32 %v8449_v14, %v8605_v61  ;;  %v8613_v40 = vsub.f32 %v8449_v14, %v8607_v9  ;;  %v8616_v2 = vpack.c.bf16 %v8614_v42, %v8615_v35  ;;  %v2847_v41 = vmax.f32 %v2783_v10, 0.0 }
 0x542   : > { %v3115_v62 = vand.u32 2147483647, %v8611_v49  ;;  %v3180_v48 = vsub.f32 1.0, %v3116_v7  ;;  %v2785_v5 = vsub.f32 1.0, %v2721_v37  ;;  %v2787_v52 = vsub.f32 1.0, %v2723_v50  ;;  %v8620_v7 = vld [vmem:[#allocation8_spill] sm:$0xff] }
 0x543   : > { %v2720_v15 = vand.u32 2147483647, %v8612_v31  ;;  %v2722_v39 = vand.u32 2147483647, %v8613_v40  ;;  %3370 = vmatpush1.bf16.msra.mxu1 %v8616_v2  ;;  %v3299_v45 = vmul.f32 %v3235_v23, %v8617_v30  ;;  %v3241_v58 = vmax.f32 %v3177_v21, 0.0 }
 0x544   : > { %3371 = vmatprep.subr.bf16.mxu1 %v3340_v57  ;;  %v3239_v32 = vmax.f32 %v3175_v17, 0.0  ;;  %v3181_v29 = vsub.f32 1.0, %v3117_v26  ;;  %v3306_v24 = vmul.f32 %v3242_v63, %v2847_v41  ;;  %v3304_v46 = vmul.f32 %v3240_v54, %v7679_v12 }
 0x545   : > { %v3246_v18 = vmax.f32 %v3182_v25, 0.0  ;;  %v3342_v14 = vpack.c.bf16 %v3302_v53, %v3300_v27  ;;  %v2846_v38 = vmax.f32 %v2782_v44, 0.0  ;;  %v3179_v33 = vsub.f32 1.0, %v3115_v62 }
 0x546   : > { %v2784_v28 = vsub.f32 1.0, %v2720_v15  ;;  %v2786_v6 = vsub.f32 1.0, %v2722_v39  ;;  %v3244_v22 = vmax.f32 %v3180_v48, 0.0  ;;  %v2849_v51 = vmax.f32 %v2785_v5, 0.0 }
 0x547   : > { %3372 = vmatpush1.bf16.msra.mxu1 %v3339_v11  ;;  %v2851_v60 = vmax.f32 %v2787_v52, 0.0  ;;  %v3341_v19 = vpack.c.bf16 %v3301_v8, %v3299_v45  ;;  %v3305_v0 = vmul.f32 %v3241_v58, %v2846_v38  ;;  %v3303_v56 = vmul.f32 %v3239_v32, %v7661_v59  ;;  %v8619_v59 = vld [vmem:[#allocation5_spill] sm:$0xff] }
 0x548   : > { %3373 = vmatprep.subr.bf16.mxu1 %v3342_v14  ;;  %v3245_v34 = vmax.f32 %v3181_v29, 0.0  ;;  %v3344_v55 = vpack.c.bf16 %v3306_v24, %v3304_v46  ;;  %v3243_v1 = vmax.f32 %v3179_v33, 0.0  ;;  %v2848_v12 = vmax.f32 %v2784_v28, 0.0 }
 0x549   : > { %v3310_v43 = vmul.f32 %v3246_v18, %v2851_v60  ;;  %v2850_v13 = vmax.f32 %v2786_v6, 0.0  ;;  %v3308_v23 = vmul.f32 %v3244_v22, %v2849_v51  ;;  %v3343_v44 = vpack.c.bf16 %v3305_v0, %v3303_v56 }
 0x54a   : > { %v3307_v53 = vmul.f32 %v3243_v1, %v2848_v12  ;;  %v4786_v58 = vmov 0.0|0.0   ;;  %v8621_v32 = vmov 0.0   ;;  %vm3599_vm1 = vcmask 1041408  }
 0x54b   : > { %3374 = vmatpush1.bf16.msra.mxu1 %v3341_v19  ;;  %v3309_v10 = vmul.f32 %v3245_v34, %v2850_v13  ;;  %v3346_v11 = vpack.c.bf16 %v3310_v43, %v3308_v23  ;;  %v3437_v19 = vld [vmem:[%s7871_s9] sm:$0x3] }
 0x54c   : > { %3375 = vmatprep.subr.bf16.mxu1 %v3344_v55  ;;  %v3512_v55 = vld [vmem:[%s7872_s10] sm:$0xff] }
 0x54d   : > { %v3345_v3 = vpack.c.bf16 %v3309_v10, %v3307_v53  ;;  %v3513_v10 = vld [vmem:[%s7872_s10 + $0x8] sm:$0xff]  ;;  %v3514_v53 = vld [vmem:[%s7872_s10 + $0x10] sm:$0xff] }
 0x54f   : > { %3376 = vmatpush1.bf16.msra.mxu1 %v3343_v44 }
 0x550   : > { %3377 = vmatprep.subr.bf16.mxu1 %v3346_v11 }
 0x553   : > { %3378 = vmatpush1.bf16.msra.mxu1 %v3345_v3  ;;  %v3515_v3 = vld [vmem:[%s7872_s10 + $0x18] sm:$0xff] }
 0x554   : > { %4228 = vmatprep.subr.bf16.mxu1 %v4786_v58 }
 0x556   : > { %3380 = vmatmul.mubr.bf16.vlgmr.msra.gmra.mrb[20].mxu1 %v8618_v36 }
 0x557   : > { %3389 = vmatprep.mubr.bf16.mxu1 %v8619_v59 }
 0x55e   : > { %3390 = vmatmul.mubr.bf16.gmra.mrb[24].mxu1 %v8620_v7 }
 0x55f   : > { %4034 = vmatprep.mubr.msk.f32.mxu1 %vm4787_vm0, %v8621_v32 }
 0x5d5   : > { %v7751_v61 = vpop.f32.mrb[12].mxu1 }
 0x5d6   : > { %v7753_v47 = vpop.f32.mrb[13].mxu1 }
 0x5d7   : > { %v7755_v37 = vpop.f32.mrb[14].mxu1 }
 0x5d8   : > { %v7757_v9 = vpop.f32.mrb[15].mxu1 }
 0x5e1   : > { %v7759_v4 = vpop.f32.mrb[16].mxu1 }
 0x5e2   : > { %v7761_v50 = vpop.f32.mrb[17].mxu1 }
 0x5e3   : > { %v7763_v16 = vpop.f32.mrb[18].mxu1 }
 0x5e4   : > { %v7765_v27 = vpop.f32.mrb[19].mxu1 }
 0x629   : > { %v7767_v21 = vpop.f32.mrb[20].mxu1 }
 0x62a   : > { %v3400_v17 = vadd.f32 %v7767_v21, %v7751_v61  ;;  %v7771_v20 = vpop.f32.mrb[21].mxu1 }
 0x62b   : > { %v3401_v26 = vadd.f32 %v7771_v20, %v7753_v47  ;;  %v7775_v63 = vpop.f32.mrb[22].mxu1 }
 0x62c   : > { %v3402_v54 = vadd.f32 %v7775_v63, %v7755_v37  ;;  %v7779_v25 = vpop.f32.mrb[23].mxu1 }
 0x62d   : > { %v3408_v57 = vadd.f32 %v3401_v26, %v3400_v17  ;;  %v3425_v8 = vmax.f32 %v3400_v17, %v3401_v26  ;;  %v3403_v49 = vadd.f32 %v7779_v25, %v7757_v9 }
 0x62f   : > { %v3411_v62 = vadd.f32 %v3403_v49, %v3402_v54  ;;  %v3428_v31 = vmax.f32 %v3402_v54, %v3403_v49  ;;  %3409 = vadd.xlane.f32.xlu0 %v3408_v57 }
 0x631   : > { %3412 = vadd.xlane.f32.xlu1 %v3411_v62  ;;  %v7783_v15 = vpop.f32.mrb[24].mxu1 }
 0x632   : > { %v3404_v40 = vadd.f32 %v7783_v15, %v7759_v4  ;;  %v7787_v39 = vpop.f32.mrb[25].mxu1 }
 0x633   : > { %v3405_v42 = vadd.f32 %v7787_v39, %v7761_v50  ;;  %v7791_v35 = vpop.f32.mrb[26].mxu1 }
 0x634   : > { %v3406_v2 = vadd.f32 %v7791_v35, %v7763_v16  ;;  %v7795_v41 = vpop.f32.mrb[27].mxu1 }
 0x635   : > { %v3414_v48 = vadd.f32 %v3405_v42, %v3404_v40  ;;  %v3431_v5 = vmax.f32 %v3404_v40, %v3405_v42  ;;  %v3407_v52 = vadd.f32 %v7795_v41, %v7765_v27  ;;  %3426 = vmax.xlane.f32.xlu1 %v3425_v8 }
 0x637   : > { %v3417_v30 = vadd.f32 %v3407_v52, %v3406_v2  ;;  %v3434_v45 = vmax.f32 %v3406_v2, %v3407_v52  ;;  %3415 = vadd.xlane.f32.xlu0 %v3414_v48 }
 0x639   : > { %3432 = vmax.xlane.f32.xlu1 %v3431_v5 }
 0x63b   : > { %3418 = vadd.xlane.f32.xlu0 %v3417_v30 }
 0x63f   : > { %3429 = vmax.xlane.f32.xlu0 %v3428_v31 }
 0x643   : > { %3435 = vmax.xlane.f32.xlu0 %v3434_v45 }
 0x6bc   : > { %v3410_v29 = vpop.xlane.xlu0 %3409 }
 0x6bd   : > { %v3421_v46 = vmul.f32 0.00390625, %v3410_v29 }
 0x6be   : > { %v3413_v24 = vpop.xlane.xlu1 %3412 }
 0x6bf   : > { %v3422_v18 = vmul.f32 0.00390625, %v3413_v24 }
 0x6c1   : > { %v4229_v14 = vpack.c.bf16 %v3422_v18, %v3421_v46 }
 0x6c2   : > { %v3427_v51 = vpop.xlane.xlu1 %3426 }
 0x6c3   : > { %4230 = vmatpush3.bf16.msra.mxu1 %v4229_v14 }
 0x6c4   : > { %v3416_v38 = vpop.xlane.xlu0 %3415  ;;  %4231 = vmatprep.subr.bf16.mxu1 %v4786_v58 }
 0x6c5   : > { %v3423_v28 = vmul.f32 0.00390625, %v3416_v38 }
 0x6c6   : > { %v3433_v34 = vpop.xlane.xlu1 %3432 }
 0x6c8   : > { %v3419_v33 = vpop.xlane.xlu0 %3418 }
 0x6c9   : > { %v3424_v6 = vmul.f32 0.00390625, %v3419_v33 }
 0x6cb   : > { %v4232_v22 = vpack.c.bf16 %v3424_v6, %v3423_v28 }
 0x6cc   : > { %v3430_v60 = vpop.xlane.xlu0 %3429 }
 0x6cd   : > { %4233 = vmatpush3.bf16.msra.mxu1 %v4232_v22  ;;  %v4235_v0 = vpack.c.bf16 %v3430_v60, %v3427_v51 }
 0x6ce   : > { %4234 = vmatprep.subr.bf16.mxu1 %v4786_v58 }
 0x6d0   : > { %v3436_v56 = vpop.xlane.xlu0 %3435  ;;  %4035 = vmatmul.mubr.msk.f32.vlgmr.msra.gmra.mrb[28].mxu1 %vm999_vm6, %v3437_v19 }
 0x6d1   : > { %4236 = vmatpush3.bf16.msra.mxu1 %v4235_v0  ;;  %4045 = vmatprep.mubr.msk.f32.mxu1 %vm4787_vm0, %v8621_v32  ;;  %v4238_v43 = vpack.c.bf16 %v3436_v56, %v3433_v34 }
 0x6d2   : > { %4237 = vmatprep.subr.bf16.mxu1 %v4786_v58 }
 0x6d5   : > { %4239 = vmatpush3.bf16.msra.mxu1 %v4238_v43 }
 0x6d8   : > { %4046 = vmatmul.mubr.msk.f32.vlgmr.msra.gmra.mrb[30].mxu1 %vm999_vm6, %v3437_v19 }
 0x6d9   : > { %4050 = vmatprep.mubr.msk.f32.mxu1 %vm868_vm4, %v3512_v55 }
 0x7a3   : > { %v3507_v1 = vpop.f32.mrb[28].mxu1 }
 0x7a4   : > { %v4036_v12 = vpop.f32.mrb[29].mxu1  ;;  %v3511_v11 = vmax.f32 %v3507_v1, 0.0 }
 0x7ab   : > { %v3582_v13 = vpop.f32.mrb[30].mxu1 }
 0x7ac   : > { %v3586_v23 = vmax.f32 %v3582_v13, 0.0  ;;  %v4047_v44 = vpop.f32.mrb[31].mxu1 }
 0x7ae   : > { %4048 = vmatprep.subr.msk.mxu1 %vm3599_vm1, %v3586_v23 }
 0x7af   : > { %4049 = vmatpush3.msk.msra.mxu1 %vm3599_vm1, %v3586_v23 }
 0x7b0   : > { %4051 = vmatmul.mubr.msk.f32.vlgmr.msra.gmra.mrb[32].mxu1 %vm868_vm4, %v3513_v10  ;;  %4056 = vmatprep.subr.msk.mxu1 %vm3599_vm1, %v3511_v11 }
 0x7b1   : > { %4057 = vmatpush3.msk.msra.mxu1 %vm3599_vm1, %v3511_v11  ;;  %4053 = vmatprep.mubr.msk.f32.mxu1 %vm868_vm4, %v3514_v53 }
 0x7b4   : > { %4054 = vmatmul.mubr.msk.f32.gmra.mrb[34].mxu1 %vm868_vm4, %v3515_v3 }
 0x7b5   : > { %4058 = vmatprep.mubr.msk.f32.mxu1 %vm868_vm4, %v3512_v55 }
 0x7b8   : > { %4059 = vmatmul.mubr.msk.f32.vlgmr.msra.gmra.mrb[32].mxu1 %vm868_vm4, %v3513_v10 }
 0x7b9   : > { %4061 = vmatprep.mubr.msk.f32.mxu1 %vm868_vm4, %v3514_v53 }
 0x7bc   : > { %4062 = vmatmul.mubr.msk.f32.gmra.mrb[34].mxu1 %vm868_vm4, %v3515_v3 }
 0x88b   : > { %v4060_v36 = vpop.f32.mrb[32].mxu1 }
 0x88c   : > { %v3777_v59 = vsub.f32 0.0, %v4060_v36  ;;  %v3757_v7 = vpop.f32.mrb[33].mxu1 }
 0x88d   : > { %v3776_v17 = vsub.f32 0.0, %v3757_v7 }
 0x88e   : > { %v3782_v26 = vmul.f32 1.442695, %v3777_v59 }
 0x88f   : > { %v3780_v54 = vmul.f32 1.442695, %v3776_v17  ;;  %v4063_v57 = vpop.f32.mrb[34].mxu1 }
 0x890   : > { %4743 = vpow2.f32 %v3782_v26  ;;  %v3767_v8 = vpop.f32.mrb[35].mxu1  ;;  %v3779_v49 = vsub.f32 0.0, %v4063_v57 }
 0x891   : > { %4745 = vpow2.f32 %v3780_v54  ;;  %v3778_v62 = vsub.f32 0.0, %v3767_v8 }
 0x892   : > { %v3786_v31 = vmul.f32 1.442695, %v3779_v49 }
 0x893   : > { %v3784_v40 = vmul.f32 1.442695, %v3778_v62 }
 0x894   : > { %4747 = vpow2.f32 %v3786_v31 }
 0x895   : > { %4749 = vpow2.f32 %v3784_v40 }
 0x89a   : > { %v4744_v42 = vpop.eup %4743 }
 0x89b   : > { %v4746_v2 = vpop.eup %4745  ;;  %v3789_v48 = vadd.f32 1.0, %v4744_v42 }
 0x89c   : > { %v3788_v5 = vadd.f32 1.0, %v4746_v2 }
 0x89d   : > { %4751 = vrcp.f32 %v3789_v48 }
 0x89e   : > { %4753 = vrcp.f32 %v3788_v5  ;;  %v4748_v52 = vpop.eup %4747 }
 0x89f   : > { %v4750_v30 = vpop.eup %4749  ;;  %v3791_v45 = vadd.f32 1.0, %v4748_v52 }
 0x8a0   : > { %v3790_v29 = vadd.f32 1.0, %v4750_v30 }
 0x8a1   : > { %4755 = vrcp.f32 %v3791_v45 }
 0x8a2   : > { %4757 = vrcp.f32 %v3790_v29 }
 0x8a7   : > { %v4752_v58 = vpop.eup %4751 }
 0x8a8   : > { %v4754_v32 = vpop.eup %4753  ;;  %3807 = vperm.xlu0 %4740, %v4752_v58   ;;  %v3829_v24 = vsub.f32 1.0, %v4752_v58 }
 0x8a9   : > { %3802 = vperm.xlu1 %4739, %v4754_v32   ;;  %v3828_v46 = vsub.f32 1.0, %v4754_v32 }
 0x8ab   : > { %v4756_v18 = vpop.eup %4755 }
 0x8ac   : > { %v4758_v14 = vpop.eup %4757  ;;  %v3831_v33 = vsub.f32 1.0, %v4756_v18 }
 0x8ad   : > { %3839 = vperm.xlu1 %4739, %v3829_v24   ;;  %v3830_v38 = vsub.f32 1.0, %v4758_v14 }
 0x8b1   : > { %3834 = vperm.xlu1 %4739, %v3828_v46  }
 0x8b5   : > { %3817 = vperm.xlu1 %4739, %v4756_v18  }
 0x8b9   : > { %3812 = vperm.xlu1 %4739, %v4758_v14  }
 0x8bd   : > { %3844 = vperm.xlu1 %4739, %v3830_v38  }
 0x8c1   : > { %3849 = vperm.xlu1 %4739, %v3831_v33  }
 0x927   : > { %v3808_v6 = vpop.permute.xlu0 %3807 }
 0x928   : > { %v3803_v28 = vpop.permute.xlu1 %3802  ;;  %v3822_v51 = vmul.f32 %v3808_v6, %v7755_v37  ;;  %v3823_v60 = vmul.f32 %v3808_v6, %v7757_v9 }
 0x929   : > { %v3820_v37 = vmul.f32 %v3803_v28, %v7751_v61  ;;  %v3821_v9 = vmul.f32 %v3803_v28, %v7753_v47 }
 0x92c   : > { %v3840_v22 = vpop.permute.xlu1 %3839 }
 0x92d   : > { %v3854_v19 = vmul.f32 %v3840_v22, %v7775_v63  ;;  %v3855_v0 = vmul.f32 %v3840_v22, %v7779_v25 }
 0x92f   : > { %v3862_v56 = vadd.f32 %v3854_v19, %v3822_v51  ;;  %v3863_v34 = vadd.f32 %v3855_v0, %v3823_v60 }
 0x930   : > { %v3835_v43 = vpop.permute.xlu1 %3834 }
 0x931   : > { %3870 = vst [vmem:[%s7837_s21 + $0x10] sm:$0xff] %v3862_v56  ;;  %3871 = vst [vmem:[%s7837_s21 + $0x18] sm:$0xff] %v3863_v34  ;;  %v3852_v63 = vmul.f32 %v3835_v43, %v7767_v21  ;;  %v3853_v25 = vmul.f32 %v3835_v43, %v7771_v20 }
 0x933   : > { %v3860_v55 = vadd.f32 %v3852_v63, %v3820_v37  ;;  %v3861_v1 = vadd.f32 %v3853_v25, %v3821_v9 }
 0x934   : > { %v3818_v12 = vpop.permute.xlu1 %3817 }
 0x935   : > { %3868 = vst [vmem:[%s7837_s21] sm:$0xff] %v3860_v55  ;;  %3869 = vst [vmem:[%s7837_s21 + $0x8] sm:$0xff] %v3861_v1  ;;  %v3826_v53 = vmul.f32 %v3818_v12, %v7763_v16  ;;  %v3827_v3 = vmul.f32 %v3818_v12, %v7765_v27 }
 0x938   : > { %v3813_v13 = vpop.permute.xlu1 %3812 }
 0x939   : > { %v3824_v61 = vmul.f32 %v3813_v13, %v7759_v4  ;;  %v3825_v47 = vmul.f32 %v3813_v13, %v7761_v50 }
 0x93c   : > { %v3845_v23 = vpop.permute.xlu1 %3844 }
 0x93d   : > { %v3856_v44 = vmul.f32 %v3845_v23, %v7783_v15  ;;  %v3857_v21 = vmul.f32 %v3845_v23, %v7787_v39 }
 0x93f   : > { %v3864_v20 = vadd.f32 %v3856_v44, %v3824_v61  ;;  %v3865_v10 = vadd.f32 %v3857_v21, %v3825_v47 }
 0x940   : > { %v3850_v11 = vpop.permute.xlu1 %3849 }
 0x941   : > { %3872 = vst [vmem:[%s7837_s21 + $0x20] sm:$0xff] %v3864_v20  ;;  %3873 = vst [vmem:[%s7837_s21 + $0x28] sm:$0xff] %v3865_v10  ;;  %v3858_v36 = vmul.f32 %v3850_v11, %v7791_v35  ;;  %v3859_v4 = vmul.f32 %v3850_v11, %v7795_v41 }
 0x943   : > { %v3866_v59 = vadd.f32 %v3858_v36, %v3826_v53  ;;  %v3867_v7 = vadd.f32 %v3859_v4, %v3827_v3 }
 0x945   : > { %3874 = vst [vmem:[%s7837_s21 + $0x30] sm:$0xff] %v3866_v59  ;;  %3875 = vst [vmem:[%s7837_s21 + $0x38] sm:$0xff] %v3867_v7 }
 0x946 PF: > { %s21_s17 = sadd.s32 1, %s4765_s17  }
 0x947   : > { %p18_p4 = scmp.ge.s32.totalorder %s21_s17, 4  }
 0x949   :  { %20 = sbr.rel (!%p18_p4) target bundleno = 1 (0x1), region = 105 }

</bundles_post_ra>
